<compile_context>
chip_gen: v7x
topology: tpu7x:2x2x1
jax: 0.10.0
libtpu: 0.0.40
codegen_flags: <defaults>
</compile_context>

<pallas_src>
import functools

import jax
import jax.numpy as jnp
from jax.experimental import pallas as pl
from jax.experimental.pallas import tpu as pltpu


# ----------------------------------------------------------------------------
# Tiling helpers
# ----------------------------------------------------------------------------
@functools.lru_cache(maxsize=None)
def _row_target():
    """Generation-aware M-tile target: v7x has 64 MiB VMEM/TC (vs 128 MiB)."""
    try:
        kind = jax.devices()[0].device_kind.lower()
    except Exception:
        return 256
    return 256 if "v7" in kind else 512


def _vmem_limit(footprint_bytes):
    """2x headroom for Mosaic internal scratch, floored at the 32 MiB default
    and capped below v7x's 64 MiB per-TensorCore VMEM."""
    return int(min(max(2 * footprint_bytes + (2 << 20), 32 << 20), 48 << 20))


def _pick_block(m, target, *, multiple=8, min_steps=1):
    """Largest divisor of m <= target, preferring sublane/lane-aligned
    multiples of `multiple`.  min_steps>1 additionally caps the block so the
    (parallel) grid axis has at least that many steps (keeps both v7x
    TensorCores busy); near-noop on single-TC v5e/v6e."""
    if min_steps > 1 and m >= multiple * min_steps:
        target = min(target, m // min_steps)
    if m <= target:
        return m
    aligned, any_div = None, 1
    for cand in range(target, 0, -1):
        if m % cand:
            continue
        if any_div == 1:
            any_div = cand
        if cand % multiple == 0:
            aligned = cand
            break
    return aligned if aligned is not None else any_div


# ----------------------------------------------------------------------------
# Pallas kernels
# ----------------------------------------------------------------------------
def _mm_kernel(*refs, has_ln, has_pre, has_res, act, eps, nk):
    """(LN | BN-affine+ReLU prologue) -> bf16 matmul (f32 acc over K tiles)
    -> bias / activation / residual epilogue."""
    it = iter(refs)
    x_ref = next(it)
    w_ref = next(it)
    b_ref = next(it)
    g_ref = gb_ref = sc_ref = sh_ref = r_ref = None
    if has_ln:
        g_ref = next(it)
        gb_ref = next(it)
    if has_pre:
        sc_ref = next(it)
        sh_ref = next(it)
    if has_res:
        r_ref = next(it)
    o_ref = next(it)
    acc_ref = next(it) if nk > 1 else None

    xv = x_ref[...]
    if has_ln or has_pre:
        xf = xv.astype(jnp.float32)          # elementwise prologue stays in f32
        if has_ln:
            # torch reference: (x - mean) / (sqrt(biased var) + eps) * g + b
            mean = jnp.mean(xf, axis=-1, keepdims=True)
            var = jnp.mean(jnp.square(xf - mean), axis=-1, keepdims=True)
            xf = (xf - mean) / (jnp.sqrt(var) + eps) * g_ref[...] + gb_ref[...]
        if has_pre:
            xf = jnp.maximum(xf * sc_ref[...] + sh_ref[...], 0.0)  # BN affine + ReLU
        xb = xf.astype(jnp.bfloat16)
    else:
        xb = xv.astype(jnp.bfloat16)

    part = jnp.dot(xb, w_ref[...], preferred_element_type=jnp.float32)

    def _epilogue(acc):
        acc = acc + b_ref[...]
        if act == "relu":
            acc = jnp.maximum(acc, 0.0)
        elif act == "gelu":
            acc = 0.5 * acc * (1.0 + jax.lax.erf(acc * 0.7071067811865476))
        elif act == "sigmoid":
            acc = jax.nn.sigmoid(acc)
        if has_res:
            acc = acc + r_ref[...].astype(jnp.float32)
        o_ref[...] = acc.astype(o_ref.dtype)

    if nk == 1:
        _epilogue(part)
    else:
        kk = pl.program_id(2)

        @pl.when(kk == 0)
        def _():
            acc_ref[...] = jnp.zeros_like(acc_ref)

        acc_ref[...] += part

        @pl.when(kk == nk - 1)
        def _():
            _epilogue(acc_ref[...])


def _conv3x3_kernel(x_ref, w_ref, b_ref, *rest, H, W, act, with_moments):
    """3x3 'same' conv: zero-padded im2col built in VMEM scratch, one bf16
    matmul with K = 9*Cin accumulated in f32.  Optionally emits per-step
    sum / sum-of-squares (pre-activation) for a following BatchNorm."""
    if with_moments:
        o_ref, s_ref, ss_ref, col_ref = rest
    else:
        o_ref, col_ref = rest
        s_ref = ss_ref = None

    Cin = x_ref.shape[3]
    Cout = w_ref.shape[1]
    x = x_ref[0]                                           # (H, W, Cin)

    col_ref[...] = jnp.zeros(col_ref.shape, col_ref.dtype)  # border taps = padding
    for ki in range(3):
        for kj in range(3):
            di, dj = ki - 1, kj - 1
            t0, t1 = max(0, -di), H - max(0, di)            # dest rows
            s0, s1 = max(0, di), H + min(0, di)             # src rows
            u0, u1 = max(0, -dj), W - max(0, dj)            # dest cols
            r0, r1 = max(0, dj), W + min(0, dj)             # src cols
            c0 = (ki * 3 + kj) * Cin
            col_ref[t0:t1, u0:u1, c0:c0 + Cin] = (
                x[s0:s1, r0:r1, :].astype(jnp.bfloat16))

    col = col_ref[...].reshape(H * W, 9 * Cin)
    acc = jnp.dot(col, w_ref[...], preferred_element_type=jnp.float32)
    acc = acc + b_ref[...]

    if with_moments:                         # BatchNorm batch-stat partial sums
        s_ref[0] = jnp.sum(acc, axis=0, keepdims=True)
        ss_ref[0] = jnp.sum(acc * acc, axis=0, keepdims=True)

    if act == "relu":
        acc = jnp.maximum(acc, 0.0)
    elif act == "gelu":
        acc = 0.5 * acc * (1.0 + jax.lax.erf(acc * 0.7071067811865476))
    o_ref[0] = acc.reshape(H, W, Cout).astype(o_ref.dtype)


def _win_attn_kernel(*refs, heads, dim_head, window, scale, has_skip):
    """Windowed multi-head attention on a (w, W, 3*inner) row band carved by
    the BlockSpec index_map.  Skip-path K/V (if any) are a second ref combined
    via a streamed two-chunk softmax.  Output keeps (w, W, heads*dim_head)
    layout -> lane-dense store and no inverse window transpose in XLA."""
    if has_skip:
        qkv_ref, kvs_ref, o_ref = refs
    else:
        qkv_ref, o_ref = refs
        kvs_ref = None

    w = window
    n = w * w
    inner = heads * dim_head
    x = qkv_ref[0]                                         # (w, W, 3*inner) bf16
    xs = kvs_ref[0] if has_skip else None
    ny = x.shape[1] // w

    for yi in range(ny):
        ysl = slice(yi * w, (yi + 1) * w)
        head_outs = []
        for hh in range(heads):
            qo = hh * dim_head
            ko = inner + hh * dim_head
            vo = 2 * inner + hh * dim_head
            q = x[:, ysl, qo:qo + dim_head].reshape(n, dim_head)
            k = x[:, ysl, ko:ko + dim_head].reshape(n, dim_head)
            v = x[:, ysl, vo:vo + dim_head].reshape(n, dim_head)

            sim = jax.lax.dot_general(
                q, k, (((1,), (1,)), ((), ())),
                preferred_element_type=jnp.float32) * scale

            if has_skip:
                ks = xs[:, ysl, hh * dim_head:(hh + 1) * dim_head].reshape(n, dim_head)
                vs = xs[:, ysl, inner + hh * dim_head:
                        inner + (hh + 1) * dim_head].reshape(n, dim_head)
                sim_s = jax.lax.dot_general(
                    q, ks, (((1,), (1,)), ((), ())),
                    preferred_element_type=jnp.float32) * scale
                m = jnp.maximum(jnp.max(sim, axis=-1, keepdims=True),
                                jnp.max(sim_s, axis=-1, keepdims=True))
                p = jnp.exp(sim - m)
                ps = jnp.exp(sim_s - m)
                denom = (jnp.sum(p, axis=-1, keepdims=True)
                         + jnp.sum(ps, axis=-1, keepdims=True))
                o = (jnp.dot(p.astype(v.dtype), v, preferred_element_type=jnp.float32)
                     + jnp.dot(ps.astype(vs.dtype), vs,
                               preferred_element_type=jnp.float32))
            else:
                m = jnp.max(sim, axis=-1, keepdims=True)
                p = jnp.exp(sim - m)
                denom = jnp.sum(p, axis=-1, keepdims=True)
                o = jnp.dot(p.astype(v.dtype), v, preferred_element_type=jnp.float32)

            o = o * pl.reciprocal(denom, approx=True)
            head_outs.append(o.astype(o_ref.dtype))

        out_win = jnp.concatenate(head_outs, axis=-1).reshape(w, w, inner)
        o_ref[0, :, ysl, :] = out_win


# ----------------------------------------------------------------------------
# Pallas wrappers
# ----------------------------------------------------------------------------
def fused_matmul(x, w_bf16, bias=None, *, ln=None, pre_affine_relu=None,
                 residual=None, act="none", out_dtype=jnp.float32):
    """x:(M,K) @ w:(K,N) (bf16 weights) with fused prologue/epilogue and an
    (M, N, K) grid (K tiled only when no LayerNorm prologue needs the row)."""
    M, K = x.shape
    N = w_bf16.shape[1]
    has_ln = ln is not None
    has_pre = pre_affine_relu is not None
    has_res = residual is not None
    eps = ln[2] if has_ln else 1e-5

    bm = _pick_block(M, _row_target(), multiple=8, min_steps=2)
    bn = _pick_block(N, 1024, multiple=128)
    bk = K if has_ln else _pick_block(K, 1024, multiple=128)
    nk = K // bk

    b2 = bias if bias is not None else jnp.zeros((N,), jnp.float32)
    b2 = jnp.asarray(b2, jnp.float32).reshape(1, N)

    inputs = [x, w_bf16, b2]
    in_specs = [pl.BlockSpec((bm, bk), lambda i, j, k: (i, k)),
                pl.BlockSpec((bk, bn), lambda i, j, k: (k, j)),
                pl.BlockSpec((1, bn), lambda i, j, k: (0, j))]
    if has_ln:
        g, gb, _ = ln
        inputs += [jnp.asarray(g, jnp.float32).reshape(1, K),
                   jnp.asarray(gb, jnp.float32).reshape(1, K)]
        in_specs += [pl.BlockSpec((1, K), lambda i, j, k: (0, 0)),
                     pl.BlockSpec((1, K), lambda i, j, k: (0, 0))]
    if has_pre:
        sc, sh = pre_affine_relu
        inputs += [jnp.asarray(sc, jnp.float32).reshape(1, K),
                   jnp.asarray(sh, jnp.float32).reshape(1, K)]
        in_specs += [pl.BlockSpec((1, bk), lambda i, j, k: (0, k)),
                     pl.BlockSpec((1, bk), lambda i, j, k: (0, k))]
    if has_res:
        inputs += [residual]
        in_specs += [pl.BlockSpec((bm, bn), lambda i, j, k: (i, j))]

    # VMEM footprint: double-buffered ins/outs + optional f32 accumulator.
    xb = jnp.dtype(x.dtype).itemsize
    ob = jnp.dtype(out_dtype).itemsize
    rb = jnp.dtype(residual.dtype).itemsize if has_res else 0
    footprint = (2 * bm * bk * xb + 2 * bk * bn * 2 + 2 * bm * bn * (ob + rb)
                 + (bm * bn * 4 if nk > 1 else 0) + 8 * K * 4 + 4 * bn * 4)

    kernel = functools.partial(_mm_kernel, has_ln=has_ln, has_pre=has_pre,
                               has_res=has_res, act=act, eps=eps, nk=nk)
    return pl.pallas_call(
        kernel,
        out_shape=jax.ShapeDtypeStruct((M, N), out_dtype),
        grid=(M // bm, N // bn, nk),
        in_specs=in_specs,
        out_specs=pl.BlockSpec((bm, bn), lambda i, j, k: (i, j)),
        scratch_shapes=([pltpu.VMEM((bm, bn), jnp.float32)] if nk > 1 else []),
        compiler_params=pltpu.CompilerParams(
            dimension_semantics=("parallel", "parallel", "arbitrary"),
            vmem_limit_bytes=_vmem_limit(footprint)),
    )(*inputs)


def conv3x3(x_nhwc, w_packed, b=None, *, act="none", out_dtype=jnp.float32,
            with_moments=False):
    """PyTorch Conv2d(k=3, padding=1).  w_packed is (9*Cin, Cout) bf16 with rows
    ordered (kh, kw, cin).  No padded HBM copy; im2col lives in VMEM scratch.
    with_moments=True additionally returns per-batch-element (sum, sum_sq) of
    the pre-activation output for a following BatchNorm."""
    B, H, W, Cin = x_nhwc.shape
    Cout = w_packed.shape[1]
    b2 = b if b is not None else jnp.zeros((Cout,), jnp.float32)
    b2 = jnp.asarray(b2, jnp.float32).reshape(1, Cout)

    out_shapes = [jax.ShapeDtypeStruct((B, H, W, Cout), out_dtype)]
    out_specs = [pl.BlockSpec((1, H, W, Cout), lambda i: (i, 0, 0, 0))]
    if with_moments:
        out_shapes += [jax.ShapeDtypeStruct((B, 1, Cout), jnp.float32),
                       jax.ShapeDtypeStruct((B, 1, Cout), jnp.float32)]
        out_specs += [pl.BlockSpec((1, 1, Cout), lambda i: (i, 0, 0)),
                      pl.BlockSpec((1, 1, Cout), lambda i: (i, 0, 0))]

    # TODO(synk): for large H, add a row-tile grid axis with a 1-row halo so the
    # two v7x TensorCores split spatial work; B-only grid is enough at H=W=8.
    footprint = (2 * H * W * Cin * jnp.dtype(x_nhwc.dtype).itemsize
                 + 2 * 9 * Cin * Cout * 2 + H * W * 9 * Cin * 2
                 + 2 * H * W * Cout * jnp.dtype(out_dtype).itemsize + 8 * Cout * 4)

    res = pl.pallas_call(
        functools.partial(_conv3x3_kernel, H=H, W=W, act=act,
                          with_moments=with_moments),
        out_shape=tuple(out_shapes) if with_moments else out_shapes[0],
        grid=(B,),
        in_specs=[pl.BlockSpec((1, H, W, Cin), lambda i: (i, 0, 0, 0)),
                  pl.BlockSpec((9 * Cin, Cout), lambda i: (0, 0)),
                  pl.BlockSpec((1, Cout), lambda i: (0, 0))],
        out_specs=tuple(out_specs) if with_moments else out_specs[0],
        scratch_shapes=[pltpu.VMEM((H, W, 9 * Cin), jnp.bfloat16)],
        compiler_params=pltpu.CompilerParams(
            dimension_semantics=("parallel",),
            vmem_limit_bytes=_vmem_limit(footprint)),
    )(x_nhwc, w_packed, b2)
    return res


def window_attention(qkv, kvs, *, heads, dim_head, window_size, scale):
    """qkv:(B,H,W,3*inner) bf16 (q|k|v packed along channels); optional
    kvs:(B,H,W,2*inner) from the skip path.  Windows are carved by the
    BlockSpec index_map over (B, H//w) row bands; output stays in
    (B, H, W, inner) layout."""
    B, H, W, _ = qkv.shape
    inner = heads * dim_head
    w = window_size
    nx = H // w
    has_skip = kvs is not None

    in_specs = [pl.BlockSpec((1, w, W, 3 * inner), lambda b, xi: (b, xi, 0, 0))]
    inputs = [qkv]
    if has_skip:
        in_specs.append(pl.BlockSpec((1, w, W, 2 * inner),
                                     lambda b, xi: (b, xi, 0, 0)))
        inputs.append(kvs)

    footprint = 2 * w * W * (3 + (2 if has_skip else 0) + 1) * inner * 2 + (1 << 20)

    return pl.pallas_call(
        functools.partial(_win_attn_kernel, heads=heads, dim_head=dim_head,
                          window=w, scale=scale, has_skip=has_skip),
        out_shape=jax.ShapeDtypeStruct((B, H, W, inner), jnp.bfloat16),
        grid=(B, nx),
        in_specs=in_specs,
        out_specs=pl.BlockSpec((1, w, W, inner), lambda b, xi: (b, xi, 0, 0)),
        compiler_params=pltpu.CompilerParams(
            dimension_semantics=("parallel", "parallel"),
            vmem_limit_bytes=_vmem_limit(footprint)),
    )(*inputs)


# ----------------------------------------------------------------------------
# Module forwards (NHWC internally; PyTorch NCHW at the boundary)
# ----------------------------------------------------------------------------
def attention_fwd(p, ln, x, skip, *, heads, dim_head, window_size):
    """Attention(LN(x), skip) + x.  LN fused into the qkv projection, window
    carve via index_map, residual add fused into the output projection."""
    B, H, W, dim = x.shape
    inner = heads * dim_head
    scale = dim_head ** -0.5
    x_flat = x.reshape(B * H * W, dim)

    qkv = fused_matmul(x_flat, p["w_qkv"], ln=ln, out_dtype=jnp.bfloat16)
    qkv = qkv.reshape(B, H, W, 3 * inner)
    kvs = None
    if skip is not None:
        # skip tokens are NOT layer-normed in the reference ('(r b) n d -> b (r n) d')
        kvs = fused_matmul(skip.reshape(B * H * W, dim), p["w_kv"],
                           out_dtype=jnp.bfloat16).reshape(B, H, W, 2 * inner)

    o = window_attention(qkv, kvs, heads=heads, dim_head=dim_head,
                         window_size=window_size, scale=scale)
    out = fused_matmul(o.reshape(B * H * W, inner), p["w_o"], p["b_o"],
                       residual=x_flat)
    return out.reshape(B, H, W, dim)


def feedforward_fwd(p, ln, x):
    """FeedForward(LN(x)) + x (LN, GELU and residual fused)."""
    B, H, W, dim = x.shape
    x_flat = x.reshape(B * H * W, dim)
    h = fused_matmul(x_flat, p["w_in"], p["b_in"], ln=ln, out_dtype=jnp.bfloat16)
    g = conv3x3(h.reshape(B, H, W, dim), p["w_mid"], p["b_mid"],
                act="gelu", out_dtype=jnp.bfloat16)
    out = fused_matmul(g.reshape(B * H * W, -1), p["w_out"], p["b_out"],
                       residual=x_flat)
    return out.reshape(B, H, W, dim)


def rsab_fwd(p, x, skip, *, heads, dim_head, window_size):
    for idx, layer in enumerate(p["layers"]):
        ln_a = (layer["ln_attn"]["g"], layer["ln_attn"]["b"], 1e-5)
        s = skip if idx == 0 else None
        x = attention_fwd(layer["attn"], ln_a, x, s, heads=heads,
                          dim_head=dim_head, window_size=window_size)
        ln_f = (layer["ln_ff"]["g"], layer["ln_ff"]["b"], 1e-5)
        x = feedforward_fwd(layer["ff"], ln_f, x)
    B, H, W, dim = x.shape
    x_flat = x.reshape(B * H * W, dim)
    out = fused_matmul(x_flat, p["w_outer"], p["b_outer"], residual=x_flat)
    return out.reshape(B, H, W, dim)


def gsnb_fwd(p, x, skip, eps=1e-5):
    if skip is not None:
        xcat = jnp.concatenate([x, skip], axis=-1)          # channel concat (NHWC)
        B, H, W, C2 = xcat.shape
        x = fused_matmul(xcat.reshape(B * H * W, C2), p["w_up"], p["b_up"])
        x = x.reshape(B, H, W, p["w_up"].shape[1])
    B, H, W, dim = x.shape
    M = B * H * W
    cnt = float(M)

    # Conv3x3 emits batch-stat partial sums; BN1 + ReLU is fused as the
    # prologue of the following 1x1-conv matmul (training-mode batch stats).
    h1, s1, ss1 = conv3x3(x, p["w1"], p["b1"], out_dtype=jnp.bfloat16,
                          with_moments=True)
    m1 = jnp.sum(s1, axis=(0, 1)) / cnt
    v1 = jnp.maximum(jnp.sum(ss1, axis=(0, 1)) / cnt - m1 * m1, 0.0)
    sc1 = p["bn1_g"] / jnp.sqrt(v1 + eps)
    sh1 = p["bn1_b"] - m1 * sc1
    h2 = fused_matmul(h1.reshape(M, -1), p["w2"], p["b2"],
                      pre_affine_relu=(sc1, sh1))            # (M, dim) f32

    # TODO(synk): BN2 stats could also be emitted from the w2 matmul epilogue;
    # kept in XLA here (dim-wide tensor, single fused elementwise pass).
    m2 = jnp.mean(h2, axis=0)
    v2 = jnp.mean(jnp.square(h2 - m2), axis=0)
    h2n = jnp.maximum((h2 - m2) / jnp.sqrt(v2 + eps) * p["bn2_g"] + p["bn2_b"], 0.0)
    return h2n.reshape(B, H, W, dim) + x


def fused_att_fwd(p, x):
    # TODO(synk): FusedAttentionBlock source not included in the reference file;
    # implemented as squeeze-excitation channel attention matching (dim, reduction).
    # M == batch (=2) matmuls are pure launch overhead in Pallas -> plain XLA.
    y = jnp.mean(x, axis=(1, 2))                             # (B, C)
    y = jax.nn.relu(y @ p["fc1"].T)                          # (B, C//r)
    y = jax.nn.sigmoid(y @ p["fc2"].T)                       # (B, C)
    return x * y[:, None, None, :]


def cfb_fwd(params, input_rsab, input_gsnb, skip_rsab=None, skip_gsnb=None,
            *, heads, dim_head, window_size):
    """Inputs/outputs in PyTorch NCHW; internal compute in NHWC."""
    to_nhwc = lambda t: None if t is None else jnp.transpose(t, (0, 2, 3, 1))
    to_nchw = lambda t: jnp.transpose(t, (0, 3, 1, 2))
    xr, xg = to_nhwc(input_rsab), to_nhwc(input_gsnb)
    sr, sg = to_nhwc(skip_rsab), to_nhwc(skip_gsnb)

    rsab_r = rsab_fwd(params["rsab"], xr, sr,
                      heads=heads, dim_head=dim_head, window_size=window_size)
    gsnb_r = gsnb_fwd(params["gsnb"], xg, sg)
    fused = fused_att_fwd(params["fused"], rsab_r + gsnb_r)
    return to_nchw(rsab_r + fused), to_nchw(gsnb_r + fused)


# ----------------------------------------------------------------------------
# Deterministic parameter init (torch shapes, pre-packed once for the kernels)
# ----------------------------------------------------------------------------
def init_params(key, *, dim, heads, dim_head, reduction, depth_rsab=2,
                ff_out_dim=128):
    inner = heads * dim_head
    keys = iter(jax.random.split(key, 256))
    w = lambda shape: 0.02 * jax.random.normal(next(keys), shape, dtype=jnp.float32)
    zeros = lambda n: jnp.zeros((n,), jnp.float32)
    ones = lambda n: jnp.ones((n,), jnp.float32)

    def pack_1x1(wt):                 # torch (Cout, Cin) -> (Cin, Cout) bf16
        return jnp.asarray(wt.T, jnp.bfloat16)

    def pack_3x3(wt):                 # torch (Cout, Cin, 3, 3) -> (9*Cin, Cout) bf16
        cout, cin = wt.shape[0], wt.shape[1]
        return jnp.asarray(jnp.transpose(wt, (2, 3, 1, 0)).reshape(9 * cin, cout),
                           jnp.bfloat16)

    layers = []
    for _ in range(depth_rsab):
        wq, wkv, wo = w((inner, dim)), w((2 * inner, dim)), w((dim, inner))
        layers.append(dict(
            ln_attn=dict(g=ones(dim), b=zeros(dim)),
            attn=dict(
                w_qkv=jnp.concatenate([pack_1x1(wq), pack_1x1(wkv)], axis=1),
                w_kv=pack_1x1(wkv),
                w_o=pack_1x1(wo), b_o=zeros(dim)),
            ln_ff=dict(g=ones(dim), b=zeros(dim)),
            ff=dict(w_in=pack_1x1(w((dim, dim))), b_in=zeros(dim),
                    w_mid=pack_3x3(w((ff_out_dim, dim, 3, 3))), b_mid=zeros(ff_out_dim),
                    w_out=pack_1x1(w((dim, ff_out_dim))), b_out=zeros(dim)),
        ))
    rsab = dict(layers=layers, w_outer=pack_1x1(w((dim, dim))), b_outer=zeros(dim))

    gdim = dim * 4
    gsnb = dict(w_up=jnp.asarray(w((2 * dim, dim)), jnp.bfloat16),  # ConvTranspose2d(2d,d,1)
                b_up=zeros(dim),
                w1=pack_3x3(w((gdim, dim, 3, 3))), b1=zeros(gdim),
                bn1_g=ones(gdim), bn1_b=zeros(gdim),
                w2=pack_1x1(w((dim, gdim))), b2=zeros(dim),
                bn2_g=ones(dim), bn2_b=zeros(dim))

    hid = max(dim // reduction, 1)
    fused = dict(fc1=w((hid, dim)), fc2=w((dim, hid)))
    return dict(rsab=rsab, gsnb=gsnb, fused=fused)


# ----------------------------------------------------------------------------
if __name__ == "__main__":
    key = jax.random.PRNGKey(0)
    kp, kr, kg = jax.random.split(key, 3)

    # Small but structurally consistent hyper-params.
    dim, heads, dim_head, window_size, reduction = 16, 2, 8, 4, 4
    B, Hs, Ws = 2, 8, 8

    params = init_params(kp, dim=dim, heads=heads, dim_head=dim_head,
                         reduction=reduction, depth_rsab=2, ff_out_dim=128)

    input_rsab = jax.random.normal(kr, (B, dim, Hs, Ws), dtype=jnp.float32)  # NCHW
    input_gsnb = jax.random.normal(kg, (B, dim, Hs, Ws), dtype=jnp.float32)  # NCHW

    fwd = jax.jit(functools.partial(cfb_fwd, heads=heads, dim_head=dim_head,
                                    window_size=window_size))
    out_rsab, out_gsnb = fwd(params, input_rsab, input_gsnb)
    jax.block_until_ready((out_rsab, out_gsnb))

    assert out_rsab.shape == (B, dim, Hs, Ws)
    assert out_gsnb.shape == (B, dim, Hs, Ws)
    assert jnp.all(jnp.isfinite(out_rsab)) and jnp.all(jnp.isfinite(out_gsnb))
    print("KERNEL_OK")
</pallas_src>

<mosaic_0001>
module attributes {stable_mosaic.version = 11 : i64} {
  func.func @_win_attn_kernel(%arg0: i32, %arg1: i32, %arg2: memref<1x4x8x48xbf16, #tpu.memory_space<vmem>>, %arg3: memref<1x4x8x16xbf16, #tpu.memory_space<vmem>>) attributes {dimension_semantics = [#tpu.dimension_semantics<parallel>, #tpu.dimension_semantics<parallel>], iteration_bounds = array<i64: 2, 2>, scalar_prefetch = 0 : i64, scratch_operands = 0 : i64, tpu.core_type = #tpu.core_type<tc>, window_params = [{transform_indices = @transform_0, window_bounds = array<i64: 1, 4, 8, 48>}, {transform_indices = @transform_1, window_bounds = array<i64: 1, 4, 8, 16>}]} {
    %c0 = arith.constant 0 : index
    %c0_0 = arith.constant 0 : index
    %c0_1 = arith.constant 0 : index
    %c0_2 = arith.constant 0 : index
    %0 = vector.load %arg2[%c0, %c0_0, %c0_1, %c0_2] : memref<1x4x8x48xbf16, #tpu.memory_space<vmem>>, vector<1x4x8x48xbf16>
    %1 = vector.shape_cast %0 : vector<1x4x8x48xbf16> to vector<4x8x48xbf16>
    %2 = vector.extract_strided_slice %1 {offsets = [0, 0, 0], sizes = [4, 4, 8], strides = [1, 1, 1]} : vector<4x8x48xbf16> to vector<4x4x8xbf16>
    %3 = vector.shape_cast %2 : vector<4x4x8xbf16> to vector<16x8xbf16>
    %4 = vector.extract_strided_slice %1 {offsets = [0, 0, 16], sizes = [4, 4, 8], strides = [1, 1, 1]} : vector<4x8x48xbf16> to vector<4x4x8xbf16>
    %5 = vector.shape_cast %4 : vector<4x4x8xbf16> to vector<16x8xbf16>
    %6 = vector.extract_strided_slice %1 {offsets = [0, 0, 32], sizes = [4, 4, 8], strides = [1, 1, 1]} : vector<4x8x48xbf16> to vector<4x4x8xbf16>
    %7 = vector.shape_cast %6 : vector<4x4x8xbf16> to vector<16x8xbf16>
    %cst = arith.constant dense<0.000000e+00> : vector<16x16xf32>
    %8 = tpu.matmul %3, %5, %cst {dimension_numbers = #tpu.dot_dimension_numbers<[1], [1], [0], [0], [0, 0, 1, 0], [], []>} : vector<16x8xbf16>, vector<16x8xbf16>, vector<16x16xf32> -> vector<16x16xf32>
    %cst_3 = arith.constant 0.353553385 : f32
    %9 = vector.broadcast %cst_3 : f32 to vector<16x16xf32>
    %10 = arith.mulf %8, %9 : vector<16x16xf32>
    %cst_4 = arith.constant dense<0xFF800000> : vector<16xf32>
    %11 = vector.multi_reduction <maximumf>, %10, %cst_4 [1] : vector<16x16xf32> to vector<16xf32>
    %12 = vector.shape_cast %11 : vector<16xf32> to vector<16x1xf32>
    %13 = vector.broadcast %12 : vector<16x1xf32> to vector<16x16xf32>
    %14 = arith.subf %10, %13 : vector<16x16xf32>
    %15 = math.exp %14 : vector<16x16xf32>
    %cst_5 = arith.constant dense<0.000000e+00> : vector<16xf32>
    %16 = vector.multi_reduction <add>, %15, %cst_5 [1] : vector<16x16xf32> to vector<16xf32>
    %17 = vector.shape_cast %16 : vector<16xf32> to vector<16x1xf32>
    %18 = arith.truncf %15 : vector<16x16xf32> to vector<16x16xbf16>
    %cst_6 = arith.constant dense<0.000000e+00> : vector<16x8xf32>
    %19 = tpu.matmul %18, %7, %cst_6 {dimension_numbers = #tpu.dot_dimension_numbers<[1], [0], [0], [1], [0, 0, 1, 1], [], []>} : vector<16x16xbf16>, vector<16x8xbf16>, vector<16x8xf32> -> vector<16x8xf32>
    %20 = tpu.reciprocal %17 {approx = true} : vector<16x1xf32> -> vector<16x1xf32>
    %21 = vector.broadcast %20 : vector<16x1xf32> to vector<16x8xf32>
    %22 = arith.mulf %19, %21 : vector<16x8xf32>
    %23 = arith.truncf %22 : vector<16x8xf32> to vector<16x8xbf16>
    %24 = vector.extract_strided_slice %1 {offsets = [0, 0, 8], sizes = [4, 4, 8], strides = [1, 1, 1]} : vector<4x8x48xbf16> to vector<4x4x8xbf16>
    %25 = vector.shape_cast %24 : vector<4x4x8xbf16> to vector<16x8xbf16>
    %26 = vector.extract_strided_slice %1 {offsets = [0, 0, 24], sizes = [4, 4, 8], strides = [1, 1, 1]} : vector<4x8x48xbf16> to vector<4x4x8xbf16>
    %27 = vector.shape_cast %26 : vector<4x4x8xbf16> to vector<16x8xbf16>
    %28 = vector.extract_strided_slice %1 {offsets = [0, 0, 40], sizes = [4, 4, 8], strides = [1, 1, 1]} : vector<4x8x48xbf16> to vector<4x4x8xbf16>
    %29 = vector.shape_cast %28 : vector<4x4x8xbf16> to vector<16x8xbf16>
    %cst_7 = arith.constant dense<0.000000e+00> : vector<16x16xf32>
    %30 = tpu.matmul %25, %27, %cst_7 {dimension_numbers = #tpu.dot_dimension_numbers<[1], [1], [0], [0], [0, 0, 1, 0], [], []>} : vector<16x8xbf16>, vector<16x8xbf16>, vector<16x16xf32> -> vector<16x16xf32>
    %cst_8 = arith.constant 0.353553385 : f32
    %31 = vector.broadcast %cst_8 : f32 to vector<16x16xf32>
    %32 = arith.mulf %30, %31 : vector<16x16xf32>
    %cst_9 = arith.constant dense<0xFF800000> : vector<16xf32>
    %33 = vector.multi_reduction <maximumf>, %32, %cst_9 [1] : vector<16x16xf32> to vector<16xf32>
    %34 = vector.shape_cast %33 : vector<16xf32> to vector<16x1xf32>
    %35 = vector.broadcast %34 : vector<16x1xf32> to vector<16x16xf32>
    %36 = arith.subf %32, %35 : vector<16x16xf32>
    %37 = math.exp %36 : vector<16x16xf32>
    %cst_10 = arith.constant dense<0.000000e+00> : vector<16xf32>
    %38 = vector.multi_reduction <add>, %37, %cst_10 [1] : vector<16x16xf32> to vector<16xf32>
    %39 = vector.shape_cast %38 : vector<16xf32> to vector<16x1xf32>
    %40 = arith.truncf %37 : vector<16x16xf32> to vector<16x16xbf16>
    %cst_11 = arith.constant dense<0.000000e+00> : vector<16x8xf32>
    %41 = tpu.matmul %40, %29, %cst_11 {dimension_numbers = #tpu.dot_dimension_numbers<[1], [0], [0], [1], [0, 0, 1, 1], [], []>} : vector<16x16xbf16>, vector<16x8xbf16>, vector<16x8xf32> -> vector<16x8xf32>
    %42 = tpu.reciprocal %39 {approx = true} : vector<16x1xf32> -> vector<16x1xf32>
    %43 = vector.broadcast %42 : vector<16x1xf32> to vector<16x8xf32>
    %44 = arith.mulf %41, %43 : vector<16x8xf32>
    %45 = arith.truncf %44 : vector<16x8xf32> to vector<16x8xbf16>
    %46 = tpu.concatenate %23, %45 in 1 : vector<16x8xbf16>, vector<16x8xbf16> -> vector<16x16xbf16>
    %47 = vector.shape_cast %46 : vector<16x16xbf16> to vector<4x4x16xbf16>
    %c0_12 = arith.constant 0 : index
    %c0_13 = arith.constant 0 : index
    %c0_14 = arith.constant 0 : index
    %c0_15 = arith.constant 0 : index
    %48 = vector.load %arg3[%c0_12, %c0_13, %c0_14, %c0_15] : memref<1x4x8x16xbf16, #tpu.memory_space<vmem>>, vector<1x4x4x16xbf16>
    %49 = vector.shape_cast %48 : vector<1x4x4x16xbf16> to vector<4x4x16xbf16>
    %50 = vector.shape_cast %47 : vector<4x4x16xbf16> to vector<1x4x4x16xbf16>
    tpu.vector_store %arg3[%c0_12, %c0_13, %c0_14, %c0_15], %50 {strides = array<i32>} : memref<1x4x8x16xbf16, #tpu.memory_space<vmem>>, vector<1x4x4x16xbf16>,
    %51 = vector.extract_strided_slice %1 {offsets = [0, 4, 0], sizes = [4, 4, 8], strides = [1, 1, 1]} : vector<4x8x48xbf16> to vector<4x4x8xbf16>
    %52 = vector.shape_cast %51 : vector<4x4x8xbf16> to vector<16x8xbf16>
    %53 = vector.extract_strided_slice %1 {offsets = [0, 4, 16], sizes = [4, 4, 8], strides = [1, 1, 1]} : vector<4x8x48xbf16> to vector<4x4x8xbf16>
    %54 = vector.shape_cast %53 : vector<4x4x8xbf16> to vector<16x8xbf16>
    %55 = vector.extract_strided_slice %1 {offsets = [0, 4, 32], sizes = [4, 4, 8], strides = [1, 1, 1]} : vector<4x8x48xbf16> to vector<4x4x8xbf16>
    %56 = vector.shape_cast %55 : vector<4x4x8xbf16> to vector<16x8xbf16>
    %cst_16 = arith.constant dense<0.000000e+00> : vector<16x16xf32>
    %57 = tpu.matmul %52, %54, %cst_16 {dimension_numbers = #tpu.dot_dimension_numbers<[1], [1], [0], [0], [0, 0, 1, 0], [], []>} : vector<16x8xbf16>, vector<16x8xbf16>, vector<16x16xf32> -> vector<16x16xf32>
    %cst_17 = arith.constant 0.353553385 : f32
    %58 = vector.broadcast %cst_17 : f32 to vector<16x16xf32>
    %59 = arith.mulf %57, %58 : vector<16x16xf32>
    %cst_18 = arith.constant dense<0xFF800000> : vector<16xf32>
    %60 = vector.multi_reduction <maximumf>, %59, %cst_18 [1] : vector<16x16xf32> to vector<16xf32>
    %61 = vector.shape_cast %60 : vector<16xf32> to vector<16x1xf32>
    %62 = vector.broadcast %61 : vector<16x1xf32> to vector<16x16xf32>
    %63 = arith.subf %59, %62 : vector<16x16xf32>
    %64 = math.exp %63 : vector<16x16xf32>
    %cst_19 = arith.constant dense<0.000000e+00> : vector<16xf32>
    %65 = vector.multi_reduction <add>, %64, %cst_19 [1] : vector<16x16xf32> to vector<16xf32>
    %66 = vector.shape_cast %65 : vector<16xf32> to vector<16x1xf32>
    %67 = arith.truncf %64 : vector<16x16xf32> to vector<16x16xbf16>
    %cst_20 = arith.constant dense<0.000000e+00> : vector<16x8xf32>
    %68 = tpu.matmul %67, %56, %cst_20 {dimension_numbers = #tpu.dot_dimension_numbers<[1], [0], [0], [1], [0, 0, 1, 1], [], []>} : vector<16x16xbf16>, vector<16x8xbf16>, vector<16x8xf32> -> vector<16x8xf32>
    %69 = tpu.reciprocal %66 {approx = true} : vector<16x1xf32> -> vector<16x1xf32>
    %70 = vector.broadcast %69 : vector<16x1xf32> to vector<16x8xf32>
    %71 = arith.mulf %68, %70 : vector<16x8xf32>
    %72 = arith.truncf %71 : vector<16x8xf32> to vector<16x8xbf16>
    %73 = vector.extract_strided_slice %1 {offsets = [0, 4, 8], sizes = [4, 4, 8], strides = [1, 1, 1]} : vector<4x8x48xbf16> to vector<4x4x8xbf16>
    %74 = vector.shape_cast %73 : vector<4x4x8xbf16> to vector<16x8xbf16>
    %75 = vector.extract_strided_slice %1 {offsets = [0, 4, 24], sizes = [4, 4, 8], strides = [1, 1, 1]} : vector<4x8x48xbf16> to vector<4x4x8xbf16>
    %76 = vector.shape_cast %75 : vector<4x4x8xbf16> to vector<16x8xbf16>
    %77 = vector.extract_strided_slice %1 {offsets = [0, 4, 40], sizes = [4, 4, 8], strides = [1, 1, 1]} : vector<4x8x48xbf16> to vector<4x4x8xbf16>
    %78 = vector.shape_cast %77 : vector<4x4x8xbf16> to vector<16x8xbf16>
    %cst_21 = arith.constant dense<0.000000e+00> : vector<16x16xf32>
    %79 = tpu.matmul %74, %76, %cst_21 {dimension_numbers = #tpu.dot_dimension_numbers<[1], [1], [0], [0], [0, 0, 1, 0], [], []>} : vector<16x8xbf16>, vector<16x8xbf16>, vector<16x16xf32> -> vector<16x16xf32>
    %cst_22 = arith.constant 0.353553385 : f32
    %80 = vector.broadcast %cst_22 : f32 to vector<16x16xf32>
    %81 = arith.mulf %79, %80 : vector<16x16xf32>
    %cst_23 = arith.constant dense<0xFF800000> : vector<16xf32>
    %82 = vector.multi_reduction <maximumf>, %81, %cst_23 [1] : vector<16x16xf32> to vector<16xf32>
    %83 = vector.shape_cast %82 : vector<16xf32> to vector<16x1xf32>
    %84 = vector.broadcast %83 : vector<16x1xf32> to vector<16x16xf32>
    %85 = arith.subf %81, %84 : vector<16x16xf32>
    %86 = math.exp %85 : vector<16x16xf32>
    %cst_24 = arith.constant dense<0.000000e+00> : vector<16xf32>
    %87 = vector.multi_reduction <add>, %86, %cst_24 [1] : vector<16x16xf32> to vector<16xf32>
    %88 = vector.shape_cast %87 : vector<16xf32> to vector<16x1xf32>
    %89 = arith.truncf %86 : vector<16x16xf32> to vector<16x16xbf16>
    %cst_25 = arith.constant dense<0.000000e+00> : vector<16x8xf32>
    %90 = tpu.matmul %89, %78, %cst_25 {dimension_numbers = #tpu.dot_dimension_numbers<[1], [0], [0], [1], [0, 0, 1, 1], [], []>} : vector<16x16xbf16>, vector<16x8xbf16>, vector<16x8xf32> -> vector<16x8xf32>
    %91 = tpu.reciprocal %88 {approx = true} : vector<16x1xf32> -> vector<16x1xf32>
    %92 = vector.broadcast %91 : vector<16x1xf32> to vector<16x8xf32>
    %93 = arith.mulf %90, %92 : vector<16x8xf32>
    %94 = arith.truncf %93 : vector<16x8xf32> to vector<16x8xbf16>
    %95 = tpu.concatenate %72, %94 in 1 : vector<16x8xbf16>, vector<16x8xbf16> -> vector<16x16xbf16>
    %96 = vector.shape_cast %95 : vector<16x16xbf16> to vector<4x4x16xbf16>
    %c0_26 = arith.constant 0 : index
    %c0_27 = arith.constant 0 : index
    %c4 = arith.constant 4 : index
    %c0_28 = arith.constant 0 : index
    %97 = vector.load %arg3[%c0_26, %c0_27, %c4, %c0_28] : memref<1x4x8x16xbf16, #tpu.memory_space<vmem>>, vector<1x4x4x16xbf16>
    %98 = vector.shape_cast %97 : vector<1x4x4x16xbf16> to vector<4x4x16xbf16>
    %99 = vector.shape_cast %96 : vector<4x4x16xbf16> to vector<1x4x4x16xbf16>
    tpu.vector_store %arg3[%c0_26, %c0_27, %c4, %c0_28], %99 {strides = array<i32>} : memref<1x4x8x16xbf16, #tpu.memory_space<vmem>>, vector<1x4x4x16xbf16>,
    return
  }
  func.func @transform_0(%arg0: i32, %arg1: i32) -> (i32, i32, i32, i32) {
    %c0_i32 = arith.constant 0 : i32
    %c0_i32_0 = arith.constant 0 : i32
    %c0_i32_1 = arith.constant 0 : i32
    return %arg0, %arg1, %c0_i32, %c0_i32_0 : i32, i32, i32, i32
  }
  func.func @transform_1(%arg0: i32, %arg1: i32) -> (i32, i32, i32, i32) {
    %c0_i32 = arith.constant 0 : i32
    %c0_i32_0 = arith.constant 0 : i32
    %c0_i32_1 = arith.constant 0 : i32
    return %arg0, %arg1, %c0_i32, %c0_i32_0 : i32, i32, i32, i32
  }
}

module attributes {stable_mosaic.version = 11 : i64} {
  func.func @_mm_kernel(%arg0: i32, %arg1: i32, %arg2: i32, %arg3: memref<64x16xf32, #tpu.memory_space<vmem>>, %arg4: memref<16x48xbf16, #tpu.memory_space<vmem>>, %arg5: memref<1x48xf32, #tpu.memory_space<vmem>>, %arg6: memref<1x16xf32, #tpu.memory_space<vmem>>, %arg7: memref<1x16xf32, #tpu.memory_space<vmem>>, %arg8: memref<64x48xbf16, #tpu.memory_space<vmem>>) attributes {dimension_semantics = [#tpu.dimension_semantics<parallel>, #tpu.dimension_semantics<parallel>, #tpu.dimension_semantics<arbitrary>], iteration_bounds = array<i64: 2, 1, 1>, scalar_prefetch = 0 : i64, scratch_operands = 0 : i64, tpu.core_type = #tpu.core_type<tc>, window_params = [{transform_indices = @transform_0, window_bounds = array<i64: 64, 16>}, {transform_indices = @transform_1, window_bounds = array<i64: 16, 48>}, {transform_indices = @transform_2, window_bounds = array<i64: 1, 48>}, {pipeline_mode = #tpu.pipeline_mode<synchronous>, transform_indices = @transform_3, window_bounds = array<i64: 1, 16>}, {pipeline_mode = #tpu.pipeline_mode<synchronous>, transform_indices = @transform_4, window_bounds = array<i64: 1, 16>}, {transform_indices = @transform_5, window_bounds = array<i64: 64, 48>}]} {
    %c0 = arith.constant 0 : index
    %c0_0 = arith.constant 0 : index
    %0 = vector.load %arg3[%c0, %c0_0] : memref<64x16xf32, #tpu.memory_space<vmem>>, vector<64x16xf32>
    %cst = arith.constant dense<0.000000e+00> : vector<64xf32>
    %1 = vector.multi_reduction <add>, %0, %cst [1] : vector<64x16xf32> to vector<64xf32>
    %2 = vector.shape_cast %1 : vector<64xf32> to vector<64x1xf32>
    %cst_1 = arith.constant 1.600000e+01 : f32
    %3 = vector.broadcast %cst_1 : f32 to vector<64x1xf32>
    %4 = arith.divf %2, %3 : vector<64x1xf32>
    %5 = vector.broadcast %4 : vector<64x1xf32> to vector<64x16xf32>
    %6 = arith.subf %0, %5 : vector<64x16xf32>
    %7 = arith.mulf %6, %6 : vector<64x16xf32>
    %cst_2 = arith.constant dense<0.000000e+00> : vector<64xf32>
    %8 = vector.multi_reduction <add>, %7, %cst_2 [1] : vector<64x16xf32> to vector<64xf32>
    %9 = vector.shape_cast %8 : vector<64xf32> to vector<64x1xf32>
    %cst_3 = arith.constant 1.600000e+01 : f32
    %10 = vector.broadcast %cst_3 : f32 to vector<64x1xf32>
    %11 = arith.divf %9, %10 : vector<64x1xf32>
    %12 = vector.broadcast %4 : vector<64x1xf32> to vector<64x16xf32>
    %13 = arith.subf %0, %12 : vector<64x16xf32>
    %14 = math.sqrt %11 : vector<64x1xf32>
    %cst_4 = arith.constant 9.99999974E-6 : f32
    %15 = vector.broadcast %cst_4 : f32 to vector<64x1xf32>
    %16 = arith.addf %14, %15 : vector<64x1xf32>
    %17 = vector.broadcast %16 : vector<64x1xf32> to vector<64x16xf32>
    %18 = arith.divf %13, %17 : vector<64x16xf32>
    %c0_5 = arith.constant 0 : index
    %c0_6 = arith.constant 0 : index
    %19 = vector.load %arg6[%c0_5, %c0_6] : memref<1x16xf32, #tpu.memory_space<vmem>>, vector<1x16xf32>
    %20 = vector.broadcast %19 : vector<1x16xf32> to vector<64x16xf32>
    %21 = arith.mulf %18, %20 : vector<64x16xf32>
    %c0_7 = arith.constant 0 : index
    %c0_8 = arith.constant 0 : index
    %22 = vector.load %arg7[%c0_7, %c0_8] : memref<1x16xf32, #tpu.memory_space<vmem>>, vector<1x16xf32>
    %23 = vector.broadcast %22 : vector<1x16xf32> to vector<64x16xf32>
    %24 = arith.addf %21, %23 : vector<64x16xf32>
    %25 = arith.truncf %24 : vector<64x16xf32> to vector<64x16xbf16>
    %c0_9 = arith.constant 0 : index
    %c0_10 = arith.constant 0 : index
    %26 = vector.load %arg4[%c0_9, %c0_10] : memref<16x48xbf16, #tpu.memory_space<vmem>>, vector<16x48xbf16>
    %cst_11 = arith.constant dense<0.000000e+00> : vector<64x48xf32>
    %27 = tpu.matmul %25, %26, %cst_11 {dimension_numbers = #tpu.dot_dimension_numbers<[1], [0], [0], [1], [0, 0, 1, 1], [], []>} : vector<64x16xbf16>, vector<16x48xbf16>, vector<64x48xf32> -> vector<64x48xf32>
    %c0_12 = arith.constant 0 : index
    %c0_13 = arith.constant 0 : index
    %28 = vector.load %arg5[%c0_12, %c0_13] : memref<1x48xf32, #tpu.memory_space<vmem>>, vector<1x48xf32>
    %29 = vector.broadcast %28 : vector<1x48xf32> to vector<64x48xf32>
    %30 = arith.addf %27, %29 : vector<64x48xf32>
    %31 = arith.truncf %30 : vector<64x48xf32> to vector<64x48xbf16>
    %c0_14 = arith.constant 0 : index
    %c0_15 = arith.constant 0 : index
    %32 = vector.load %arg8[%c0_14, %c0_15] : memref<64x48xbf16, #tpu.memory_space<vmem>>, vector<64x48xbf16>
    tpu.vector_store %arg8[%c0_14, %c0_15], %31 {strides = array<i32>} : memref<64x48xbf16, #tpu.memory_space<vmem>>, vector<64x48xbf16>,
    return
  }
  func.func @transform_0(%arg0: i32, %arg1: i32, %arg2: i32) -> (i32, i32) {
    %c0_i32 = arith.constant 0 : i32
    return %arg0, %arg2 : i32, i32
  }
  func.func @transform_1(%arg0: i32, %arg1: i32, %arg2: i32) -> (i32, i32) {
    %c0_i32 = arith.constant 0 : i32
    return %arg2, %arg1 : i32, i32
  }
  func.func @transform_2(%arg0: i32, %arg1: i32, %arg2: i32) -> (i32, i32) {
    %c0_i32 = arith.constant 0 : i32
    %c0_i32_0 = arith.constant 0 : i32
    return %c0_i32, %arg1 : i32, i32
  }
  func.func @transform_3(%arg0: i32, %arg1: i32, %arg2: i32) -> (i32, i32) {
    %c0_i32 = arith.constant 0 : i32
    %c0_i32_0 = arith.constant 0 : i32
    %c0_i32_1 = arith.constant 0 : i32
    return %c0_i32, %c0_i32_0 : i32, i32
  }
  func.func @transform_4(%arg0: i32, %arg1: i32, %arg2: i32) -> (i32, i32) {
    %c0_i32 = arith.constant 0 : i32
    %c0_i32_0 = arith.constant 0 : i32
    %c0_i32_1 = arith.constant 0 : i32
    return %c0_i32, %c0_i32_0 : i32, i32
  }
  func.func @transform_5(%arg0: i32, %arg1: i32, %arg2: i32) -> (i32, i32) {
    %c0_i32 = arith.constant 0 : i32
    return %arg0, %arg1 : i32, i32
  }
}

module attributes {stable_mosaic.version = 11 : i64} {
  func.func @_mm_kernel(%arg0: i32, %arg1: i32, %arg2: i32, %arg3: memref<64x16xbf16, #tpu.memory_space<vmem>>, %arg4: memref<16x16xbf16, #tpu.memory_space<vmem>>, %arg5: memref<1x16xf32, #tpu.memory_space<vmem>>, %arg6: memref<64x16xf32, #tpu.memory_space<vmem>>, %arg7: memref<64x16xf32, #tpu.memory_space<vmem>>) attributes {dimension_semantics = [#tpu.dimension_semantics<parallel>, #tpu.dimension_semantics<parallel>, #tpu.dimension_semantics<arbitrary>], iteration_bounds = array<i64: 2, 1, 1>, scalar_prefetch = 0 : i64, scratch_operands = 0 : i64, tpu.core_type = #tpu.core_type<tc>, window_params = [{transform_indices = @transform_0, window_bounds = array<i64: 64, 16>}, {transform_indices = @transform_1, window_bounds = array<i64: 16, 16>}, {transform_indices = @transform_2, window_bounds = array<i64: 1, 16>}, {transform_indices = @transform_3, window_bounds = array<i64: 64, 16>}, {transform_indices = @transform_4, window_bounds = array<i64: 64, 16>}]} {
    %c0 = arith.constant 0 : index
    %c0_0 = arith.constant 0 : index
    %0 = vector.load %arg3[%c0, %c0_0] : memref<64x16xbf16, #tpu.memory_space<vmem>>, vector<64x16xbf16>
    %c0_1 = arith.constant 0 : index
    %c0_2 = arith.constant 0 : index
    %1 = vector.load %arg4[%c0_1, %c0_2] : memref<16x16xbf16, #tpu.memory_space<vmem>>, vector<16x16xbf16>
    %cst = arith.constant dense<0.000000e+00> : vector<64x16xf32>
    %2 = tpu.matmul %0, %1, %cst {dimension_numbers = #tpu.dot_dimension_numbers<[1], [0], [0], [1], [0, 0, 1, 1], [], []>} : vector<64x16xbf16>, vector<16x16xbf16>, vector<64x16xf32> -> vector<64x16xf32>
    %c0_3 = arith.constant 0 : index
    %c0_4 = arith.constant 0 : index
    %3 = vector.load %arg5[%c0_3, %c0_4] : memref<1x16xf32, #tpu.memory_space<vmem>>, vector<1x16xf32>
    %4 = vector.broadcast %3 : vector<1x16xf32> to vector<64x16xf32>
    %5 = arith.addf %2, %4 : vector<64x16xf32>
    %c0_5 = arith.constant 0 : index
    %c0_6 = arith.constant 0 : index
    %6 = vector.load %arg6[%c0_5, %c0_6] : memref<64x16xf32, #tpu.memory_space<vmem>>, vector<64x16xf32>
    %7 = arith.addf %5, %6 : vector<64x16xf32>
    %c0_7 = arith.constant 0 : index
    %c0_8 = arith.constant 0 : index
    %8 = vector.load %arg7[%c0_7, %c0_8] : memref<64x16xf32, #tpu.memory_space<vmem>>, vector<64x16xf32>
    tpu.vector_store %arg7[%c0_7, %c0_8], %7 {strides = array<i32>} : memref<64x16xf32, #tpu.memory_space<vmem>>, vector<64x16xf32>,
    return
  }
  func.func @transform_0(%arg0: i32, %arg1: i32, %arg2: i32) -> (i32, i32) {
    %c0_i32 = arith.constant 0 : i32
    return %arg0, %arg2 : i32, i32
  }
  func.func @transform_1(%arg0: i32, %arg1: i32, %arg2: i32) -> (i32, i32) {
    %c0_i32 = arith.constant 0 : i32
    return %arg2, %arg1 : i32, i32
  }
  func.func @transform_2(%arg0: i32, %arg1: i32, %arg2: i32) -> (i32, i32) {
    %c0_i32 = arith.constant 0 : i32
    %c0_i32_0 = arith.constant 0 : i32
    return %c0_i32, %arg1 : i32, i32
  }
  func.func @transform_3(%arg0: i32, %arg1: i32, %arg2: i32) -> (i32, i32) {
    %c0_i32 = arith.constant 0 : i32
    return %arg0, %arg1 : i32, i32
  }
  func.func @transform_4(%arg0: i32, %arg1: i32, %arg2: i32) -> (i32, i32) {
    %c0_i32 = arith.constant 0 : i32
    return %arg0, %arg1 : i32, i32
  }
}

module attributes {stable_mosaic.version = 11 : i64} {
  func.func @_mm_kernel(%arg0: i32, %arg1: i32, %arg2: i32, %arg3: memref<64x16xf32, #tpu.memory_space<vmem>>, %arg4: memref<16x16xbf16, #tpu.memory_space<vmem>>, %arg5: memref<1x16xf32, #tpu.memory_space<vmem>>, %arg6: memref<1x16xf32, #tpu.memory_space<vmem>>, %arg7: memref<1x16xf32, #tpu.memory_space<vmem>>, %arg8: memref<64x16xbf16, #tpu.memory_space<vmem>>) attributes {dimension_semantics = [#tpu.dimension_semantics<parallel>, #tpu.dimension_semantics<parallel>, #tpu.dimension_semantics<arbitrary>], iteration_bounds = array<i64: 2, 1, 1>, scalar_prefetch = 0 : i64, scratch_operands = 0 : i64, tpu.core_type = #tpu.core_type<tc>, window_params = [{transform_indices = @transform_0, window_bounds = array<i64: 64, 16>}, {transform_indices = @transform_1, window_bounds = array<i64: 16, 16>}, {transform_indices = @transform_2, window_bounds = array<i64: 1, 16>}, {pipeline_mode = #tpu.pipeline_mode<synchronous>, transform_indices = @transform_3, window_bounds = array<i64: 1, 16>}, {pipeline_mode = #tpu.pipeline_mode<synchronous>, transform_indices = @transform_4, window_bounds = array<i64: 1, 16>}, {transform_indices = @transform_5, window_bounds = array<i64: 64, 16>}]} {
    %c0 = arith.constant 0 : index
    %c0_0 = arith.constant 0 : index
    %0 = vector.load %arg3[%c0, %c0_0] : memref<64x16xf32, #tpu.memory_space<vmem>>, vector<64x16xf32>
    %cst = arith.constant dense<0.000000e+00> : vector<64xf32>
    %1 = vector.multi_reduction <add>, %0, %cst [1] : vector<64x16xf32> to vector<64xf32>
    %2 = vector.shape_cast %1 : vector<64xf32> to vector<64x1xf32>
    %cst_1 = arith.constant 1.600000e+01 : f32
    %3 = vector.broadcast %cst_1 : f32 to vector<64x1xf32>
    %4 = arith.divf %2, %3 : vector<64x1xf32>
    %5 = vector.broadcast %4 : vector<64x1xf32> to vector<64x16xf32>
    %6 = arith.subf %0, %5 : vector<64x16xf32>
    %7 = arith.mulf %6, %6 : vector<64x16xf32>
    %cst_2 = arith.constant dense<0.000000e+00> : vector<64xf32>
    %8 = vector.multi_reduction <add>, %7, %cst_2 [1] : vector<64x16xf32> to vector<64xf32>
    %9 = vector.shape_cast %8 : vector<64xf32> to vector<64x1xf32>
    %cst_3 = arith.constant 1.600000e+01 : f32
    %10 = vector.broadcast %cst_3 : f32 to vector<64x1xf32>
    %11 = arith.divf %9, %10 : vector<64x1xf32>
    %12 = vector.broadcast %4 : vector<64x1xf32> to vector<64x16xf32>
    %13 = arith.subf %0, %12 : vector<64x16xf32>
    %14 = math.sqrt %11 : vector<64x1xf32>
    %cst_4 = arith.constant 9.99999974E-6 : f32
    %15 = vector.broadcast %cst_4 : f32 to vector<64x1xf32>
    %16 = arith.addf %14, %15 : vector<64x1xf32>
    %17 = vector.broadcast %16 : vector<64x1xf32> to vector<64x16xf32>
    %18 = arith.divf %13, %17 : vector<64x16xf32>
    %c0_5 = arith.constant 0 : index
    %c0_6 = arith.constant 0 : index
    %19 = vector.load %arg6[%c0_5, %c0_6] : memref<1x16xf32, #tpu.memory_space<vmem>>, vector<1x16xf32>
    %20 = vector.broadcast %19 : vector<1x16xf32> to vector<64x16xf32>
    %21 = arith.mulf %18, %20 : vector<64x16xf32>
    %c0_7 = arith.constant 0 : index
    %c0_8 = arith.constant 0 : index
    %22 = vector.load %arg7[%c0_7, %c0_8] : memref<1x16xf32, #tpu.memory_space<vmem>>, vector<1x16xf32>
    %23 = vector.broadcast %22 : vector<1x16xf32> to vector<64x16xf32>
    %24 = arith.addf %21, %23 : vector<64x16xf32>
    %25 = arith.truncf %24 : vector<64x16xf32> to vector<64x16xbf16>
    %c0_9 = arith.constant 0 : index
    %c0_10 = arith.constant 0 : index
    %26 = vector.load %arg4[%c0_9, %c0_10] : memref<16x16xbf16, #tpu.memory_space<vmem>>, vector<16x16xbf16>
    %cst_11 = arith.constant dense<0.000000e+00> : vector<64x16xf32>
    %27 = tpu.matmul %25, %26, %cst_11 {dimension_numbers = #tpu.dot_dimension_numbers<[1], [0], [0], [1], [0, 0, 1, 1], [], []>} : vector<64x16xbf16>, vector<16x16xbf16>, vector<64x16xf32> -> vector<64x16xf32>
    %c0_12 = arith.constant 0 : index
    %c0_13 = arith.constant 0 : index
    %28 = vector.load %arg5[%c0_12, %c0_13] : memref<1x16xf32, #tpu.memory_space<vmem>>, vector<1x16xf32>
    %29 = vector.broadcast %28 : vector<1x16xf32> to vector<64x16xf32>
    %30 = arith.addf %27, %29 : vector<64x16xf32>
    %31 = arith.truncf %30 : vector<64x16xf32> to vector<64x16xbf16>
    %c0_14 = arith.constant 0 : index
    %c0_15 = arith.constant 0 : index
    %32 = vector.load %arg8[%c0_14, %c0_15] : memref<64x16xbf16, #tpu.memory_space<vmem>>, vector<64x16xbf16>
    tpu.vector_store %arg8[%c0_14, %c0_15], %31 {strides = array<i32>} : memref<64x16xbf16, #tpu.memory_space<vmem>>, vector<64x16xbf16>,
    return
  }
  func.func @transform_0(%arg0: i32, %arg1: i32, %arg2: i32) -> (i32, i32) {
    %c0_i32 = arith.constant 0 : i32
    return %arg0, %arg2 : i32, i32
  }
  func.func @transform_1(%arg0: i32, %arg1: i32, %arg2: i32) -> (i32, i32) {
    %c0_i32 = arith.constant 0 : i32
    return %arg2, %arg1 : i32, i32
  }
  func.func @transform_2(%arg0: i32, %arg1: i32, %arg2: i32) -> (i32, i32) {
    %c0_i32 = arith.constant 0 : i32
    %c0_i32_0 = arith.constant 0 : i32
    return %c0_i32, %arg1 : i32, i32
  }
  func.func @transform_3(%arg0: i32, %arg1: i32, %arg2: i32) -> (i32, i32) {
    %c0_i32 = arith.constant 0 : i32
    %c0_i32_0 = arith.constant 0 : i32
    %c0_i32_1 = arith.constant 0 : i32
    return %c0_i32, %c0_i32_0 : i32, i32
  }
  func.func @transform_4(%arg0: i32, %arg1: i32, %arg2: i32) -> (i32, i32) {
    %c0_i32 = arith.constant 0 : i32
    %c0_i32_0 = arith.constant 0 : i32
    %c0_i32_1 = arith.constant 0 : i32
    return %c0_i32, %c0_i32_0 : i32, i32
  }
  func.func @transform_5(%arg0: i32, %arg1: i32, %arg2: i32) -> (i32, i32) {
    %c0_i32 = arith.constant 0 : i32
    return %arg0, %arg1 : i32, i32
  }
}

module attributes {stable_mosaic.version = 11 : i64} {
  func.func @_conv3x3_kernel(%arg0: i32, %arg1: memref<1x8x8x16xbf16, #tpu.memory_space<vmem>>, %arg2: memref<144x128xbf16, #tpu.memory_space<vmem>>, %arg3: memref<1x128xf32, #tpu.memory_space<vmem>>, %arg4: memref<1x8x8x128xbf16, #tpu.memory_space<vmem>>, %arg5: memref<8x8x144xbf16, #tpu.memory_space<vmem>>) attributes {dimension_semantics = [#tpu.dimension_semantics<parallel>], iteration_bounds = array<i64: 2>, scalar_prefetch = 0 : i64, scratch_operands = 1 : i64, tpu.core_type = #tpu.core_type<tc>, window_params = [{transform_indices = @transform_0, window_bounds = array<i64: 1, 8, 8, 16>}, {pipeline_mode = #tpu.pipeline_mode<synchronous>, transform_indices = @transform_1, window_bounds = array<i64: 144, 128>}, {pipeline_mode = #tpu.pipeline_mode<synchronous>, transform_indices = @transform_2, window_bounds = array<i64: 1, 128>}, {transform_indices = @transform_3, window_bounds = array<i64: 1, 8, 8, 128>}]} {
    %c0 = arith.constant 0 : index
    %c0_0 = arith.constant 0 : index
    %c0_1 = arith.constant 0 : index
    %c0_2 = arith.constant 0 : index
    %0 = vector.load %arg1[%c0, %c0_0, %c0_1, %c0_2] : memref<1x8x8x16xbf16, #tpu.memory_space<vmem>>, vector<1x8x8x16xbf16>
    %1 = vector.shape_cast %0 : vector<1x8x8x16xbf16> to vector<8x8x16xbf16>
    %cst = arith.constant 0.000000e+00 : bf16
    %2 = vector.broadcast %cst : bf16 to vector<8x8x144xbf16>
    %c0_3 = arith.constant 0 : index
    %c0_4 = arith.constant 0 : index
    %c0_5 = arith.constant 0 : index
    %3 = vector.load %arg5[%c0_3, %c0_4, %c0_5] : memref<8x8x144xbf16, #tpu.memory_space<vmem>>, vector<8x8x144xbf16>
    tpu.vector_store %arg5[%c0_3, %c0_4, %c0_5], %2 {strides = array<i32>} : memref<8x8x144xbf16, #tpu.memory_space<vmem>>, vector<8x8x144xbf16>,
    %4 = vector.extract_strided_slice %1 {offsets = [0, 0, 0], sizes = [7, 7, 16], strides = [1, 1, 1]} : vector<8x8x16xbf16> to vector<7x7x16xbf16>
    %c1 = arith.constant 1 : index
    %c1_6 = arith.constant 1 : index
    %c0_7 = arith.constant 0 : index
    %5 = vector.load %arg5[%c1, %c1_6, %c0_7] : memref<8x8x144xbf16, #tpu.memory_space<vmem>>, vector<7x7x16xbf16>
    tpu.vector_store %arg5[%c1, %c1_6, %c0_7], %4 {strides = array<i32>} : memref<8x8x144xbf16, #tpu.memory_space<vmem>>, vector<7x7x16xbf16>,
    %6 = vector.extract_strided_slice %1 {offsets = [0, 0, 0], sizes = [7, 8, 16], strides = [1, 1, 1]} : vector<8x8x16xbf16> to vector<7x8x16xbf16>
    %c1_8 = arith.constant 1 : index
    %c0_9 = arith.constant 0 : index
    %c16 = arith.constant 16 : index
    %7 = vector.load %arg5[%c1_8, %c0_9, %c16] : memref<8x8x144xbf16, #tpu.memory_space<vmem>>, vector<7x8x16xbf16>
    tpu.vector_store %arg5[%c1_8, %c0_9, %c16], %6 {strides = array<i32>} : memref<8x8x144xbf16, #tpu.memory_space<vmem>>, vector<7x8x16xbf16>,
    %8 = vector.extract_strided_slice %1 {offsets = [0, 1, 0], sizes = [7, 7, 16], strides = [1, 1, 1]} : vector<8x8x16xbf16> to vector<7x7x16xbf16>
    %c1_10 = arith.constant 1 : index
    %c0_11 = arith.constant 0 : index
    %c32 = arith.constant 32 : index
    %9 = vector.load %arg5[%c1_10, %c0_11, %c32] : memref<8x8x144xbf16, #tpu.memory_space<vmem>>, vector<7x7x16xbf16>
    tpu.vector_store %arg5[%c1_10, %c0_11, %c32], %8 {strides = array<i32>} : memref<8x8x144xbf16, #tpu.memory_space<vmem>>, vector<7x7x16xbf16>,
    %10 = vector.extract_strided_slice %1 {offsets = [0, 0, 0], sizes = [8, 7, 16], strides = [1, 1, 1]} : vector<8x8x16xbf16> to vector<8x7x16xbf16>
    %c0_12 = arith.constant 0 : index
    %c1_13 = arith.constant 1 : index
    %c48 = arith.constant 48 : index
    %11 = vector.load %arg5[%c0_12, %c1_13, %c48] : memref<8x8x144xbf16, #tpu.memory_space<vmem>>, vector<8x7x16xbf16>
    tpu.vector_store %arg5[%c0_12, %c1_13, %c48], %10 {strides = array<i32>} : memref<8x8x144xbf16, #tpu.memory_space<vmem>>, vector<8x7x16xbf16>,
    %c0_14 = arith.constant 0 : index
    %c0_15 = arith.constant 0 : index
    %c64 = arith.constant 64 : index
    %12 = vector.load %arg5[%c0_14, %c0_15, %c64] : memref<8x8x144xbf16, #tpu.memory_space<vmem>>, vector<8x8x16xbf16>
    tpu.vector_store %arg5[%c0_14, %c0_15, %c64], %1 {strides = array<i32>} : memref<8x8x144xbf16, #tpu.memory_space<vmem>>, vector<8x8x16xbf16>,
    %13 = vector.extract_strided_slice %1 {offsets = [0, 1, 0], sizes = [8, 7, 16], strides = [1, 1, 1]} : vector<8x8x16xbf16> to vector<8x7x16xbf16>
    %c0_16 = arith.constant 0 : index
    %c0_17 = arith.constant 0 : index
    %c80 = arith.constant 80 : index
    %14 = vector.load %arg5[%c0_16, %c0_17, %c80] : memref<8x8x144xbf16, #tpu.memory_space<vmem>>, vector<8x7x16xbf16>
    tpu.vector_store %arg5[%c0_16, %c0_17, %c80], %13 {strides = array<i32>} : memref<8x8x144xbf16, #tpu.memory_space<vmem>>, vector<8x7x16xbf16>,
    %15 = vector.extract_strided_slice %1 {offsets = [1, 0, 0], sizes = [7, 7, 16], strides = [1, 1, 1]} : vector<8x8x16xbf16> to vector<7x7x16xbf16>
    %c0_18 = arith.constant 0 : index
    %c1_19 = arith.constant 1 : index
    %c96 = arith.constant 96 : index
    %16 = vector.load %arg5[%c0_18, %c1_19, %c96] : memref<8x8x144xbf16, #tpu.memory_space<vmem>>, vector<7x7x16xbf16>
    tpu.vector_store %arg5[%c0_18, %c1_19, %c96], %15 {strides = array<i32>} : memref<8x8x144xbf16, #tpu.memory_space<vmem>>, vector<7x7x16xbf16>,
    %17 = vector.extract_strided_slice %1 {offsets = [1, 0, 0], sizes = [7, 8, 16], strides = [1, 1, 1]} : vector<8x8x16xbf16> to vector<7x8x16xbf16>
    %c0_20 = arith.constant 0 : index
    %c0_21 = arith.constant 0 : index
    %c112 = arith.constant 112 : index
    %18 = vector.load %arg5[%c0_20, %c0_21, %c112] : memref<8x8x144xbf16, #tpu.memory_space<vmem>>, vector<7x8x16xbf16>
    tpu.vector_store %arg5[%c0_20, %c0_21, %c112], %17 {strides = array<i32>} : memref<8x8x144xbf16, #tpu.memory_space<vmem>>, vector<7x8x16xbf16>,
    %19 = vector.extract_strided_slice %1 {offsets = [1, 1, 0], sizes = [7, 7, 16], strides = [1, 1, 1]} : vector<8x8x16xbf16> to vector<7x7x16xbf16>
    %c0_22 = arith.constant 0 : index
    %c0_23 = arith.constant 0 : index
    %c128 = arith.constant 128 : index
    %20 = vector.load %arg5[%c0_22, %c0_23, %c128] : memref<8x8x144xbf16, #tpu.memory_space<vmem>>, vector<7x7x16xbf16>
    tpu.vector_store %arg5[%c0_22, %c0_23, %c128], %19 {strides = array<i32>} : memref<8x8x144xbf16, #tpu.memory_space<vmem>>, vector<7x7x16xbf16>,
    %c0_24 = arith.constant 0 : index
    %c0_25 = arith.constant 0 : index
    %c0_26 = arith.constant 0 : index
    %21 = vector.load %arg5[%c0_24, %c0_25, %c0_26] : memref<8x8x144xbf16, #tpu.memory_space<vmem>>, vector<8x8x144xbf16>
    %22 = vector.shape_cast %21 : vector<8x8x144xbf16> to vector<64x144xbf16>
    %c0_27 = arith.constant 0 : index
    %c0_28 = arith.constant 0 : index
    %23 = vector.load %arg2[%c0_27, %c0_28] : memref<144x128xbf16, #tpu.memory_space<vmem>>, vector<144x128xbf16>
    %cst_29 = arith.constant dense<0.000000e+00> : vector<64x128xf32>
    %24 = tpu.matmul %22, %23, %cst_29 {dimension_numbers = #tpu.dot_dimension_numbers<[1], [0], [0], [1], [0, 0, 1, 1], [], []>} : vector<64x144xbf16>, vector<144x128xbf16>, vector<64x128xf32> -> vector<64x128xf32>
    %c0_30 = arith.constant 0 : index
    %c0_31 = arith.constant 0 : index
    %25 = vector.load %arg3[%c0_30, %c0_31] : memref<1x128xf32, #tpu.memory_space<vmem>>, vector<1x128xf32>
    %26 = vector.broadcast %25 : vector<1x128xf32> to vector<64x128xf32>
    %27 = arith.addf %24, %26 : vector<64x128xf32>
    %cst_32 = arith.constant 5.000000e-01 : f32
    %28 = vector.broadcast %cst_32 : f32 to vector<64x128xf32>
    %29 = arith.mulf %28, %27 : vector<64x128xf32>
    %cst_33 = arith.constant 0.707106769 : f32
    %30 = vector.broadcast %cst_33 : f32 to vector<64x128xf32>
    %31 = arith.mulf %27, %30 : vector<64x128xf32>
    %32 = math.erf %31 : vector<64x128xf32>
    %cst_34 = arith.constant 1.000000e+00 : f32
    %33 = vector.broadcast %cst_34 : f32 to vector<64x128xf32>
    %34 = arith.addf %33, %32 : vector<64x128xf32>
    %35 = arith.mulf %29, %34 : vector<64x128xf32>
    %36 = vector.shape_cast %35 : vector<64x128xf32> to vector<8x8x128xf32>
    %37 = arith.truncf %36 : vector<8x8x128xf32> to vector<8x8x128xbf16>
    %c0_35 = arith.constant 0 : index
    %c0_36 = arith.constant 0 : index
    %c0_37 = arith.constant 0 : index
    %c0_38 = arith.constant 0 : index
    %38 = vector.load %arg4[%c0_35, %c0_36, %c0_37, %c0_38] : memref<1x8x8x128xbf16, #tpu.memory_space<vmem>>, vector<1x8x8x128xbf16>
    %39 = vector.shape_cast %38 : vector<1x8x8x128xbf16> to vector<8x8x128xbf16>
    %40 = vector.shape_cast %37 : vector<8x8x128xbf16> to vector<1x8x8x128xbf16>
    tpu.vector_store %arg4[%c0_35, %c0_36, %c0_37, %c0_38], %40 {strides = array<i32>} : memref<1x8x8x128xbf16, #tpu.memory_space<vmem>>, vector<1x8x8x128xbf16>,
    return
  }
  func.func @transform_0(%arg0: i32) -> (i32, i32, i32, i32) {
    %c0_i32 = arith.constant 0 : i32
    %c0_i32_0 = arith.constant 0 : i32
    %c0_i32_1 = arith.constant 0 : i32
    %c0_i32_2 = arith.constant 0 : i32
    return %arg0, %c0_i32, %c0_i32_0, %c0_i32_1 : i32, i32, i32, i32
  }
  func.func @transform_1(%arg0: i32) -> (i32, i32) {
    %c0_i32 = arith.constant 0 : i32
    %c0_i32_0 = arith.constant 0 : i32
    %c0_i32_1 = arith.constant 0 : i32
    return %c0_i32, %c0_i32_0 : i32, i32
  }
  func.func @transform_2(%arg0: i32) -> (i32, i32) {
    %c0_i32 = arith.constant 0 : i32
    %c0_i32_0 = arith.constant 0 : i32
    %c0_i32_1 = arith.constant 0 : i32
    return %c0_i32, %c0_i32_0 : i32, i32
  }
  func.func @transform_3(%arg0: i32) -> (i32, i32, i32, i32) {
    %c0_i32 = arith.constant 0 : i32
    %c0_i32_0 = arith.constant 0 : i32
    %c0_i32_1 = arith.constant 0 : i32
    %c0_i32_2 = arith.constant 0 : i32
    return %arg0, %c0_i32, %c0_i32_0, %c0_i32_1 : i32, i32, i32, i32
  }
}

module attributes {stable_mosaic.version = 11 : i64} {
  func.func @_mm_kernel(%arg0: i32, %arg1: i32, %arg2: i32, %arg3: memref<64x128xbf16, #tpu.memory_space<vmem>>, %arg4: memref<128x16xbf16, #tpu.memory_space<vmem>>, %arg5: memref<1x16xf32, #tpu.memory_space<vmem>>, %arg6: memref<64x16xf32, #tpu.memory_space<vmem>>, %arg7: memref<64x16xf32, #tpu.memory_space<vmem>>) attributes {dimension_semantics = [#tpu.dimension_semantics<parallel>, #tpu.dimension_semantics<parallel>, #tpu.dimension_semantics<arbitrary>], iteration_bounds = array<i64: 2, 1, 1>, scalar_prefetch = 0 : i64, scratch_operands = 0 : i64, tpu.core_type = #tpu.core_type<tc>, window_params = [{transform_indices = @transform_0, window_bounds = array<i64: 64, 128>}, {transform_indices = @transform_1, window_bounds = array<i64: 128, 16>}, {transform_indices = @transform_2, window_bounds = array<i64: 1, 16>}, {transform_indices = @transform_3, window_bounds = array<i64: 64, 16>}, {transform_indices = @transform_4, window_bounds = array<i64: 64, 16>}]} {
    %c0 = arith.constant 0 : index
    %c0_0 = arith.constant 0 : index
    %0 = vector.load %arg3[%c0, %c0_0] : memref<64x128xbf16, #tpu.memory_space<vmem>>, vector<64x128xbf16>
    %c0_1 = arith.constant 0 : index
    %c0_2 = arith.constant 0 : index
    %1 = vector.load %arg4[%c0_1, %c0_2] : memref<128x16xbf16, #tpu.memory_space<vmem>>, vector<128x16xbf16>
    %cst = arith.constant dense<0.000000e+00> : vector<64x16xf32>
    %2 = tpu.matmul %0, %1, %cst {dimension_numbers = #tpu.dot_dimension_numbers<[1], [0], [0], [1], [0, 0, 1, 1], [], []>} : vector<64x128xbf16>, vector<128x16xbf16>, vector<64x16xf32> -> vector<64x16xf32>
    %c0_3 = arith.constant 0 : index
    %c0_4 = arith.constant 0 : index
    %3 = vector.load %arg5[%c0_3, %c0_4] : memref<1x16xf32, #tpu.memory_space<vmem>>, vector<1x16xf32>
    %4 = vector.broadcast %3 : vector<1x16xf32> to vector<64x16xf32>
    %5 = arith.addf %2, %4 : vector<64x16xf32>
    %c0_5 = arith.constant 0 : index
    %c0_6 = arith.constant 0 : index
    %6 = vector.load %arg6[%c0_5, %c0_6] : memref<64x16xf32, #tpu.memory_space<vmem>>, vector<64x16xf32>
    %7 = arith.addf %5, %6 : vector<64x16xf32>
    %c0_7 = arith.constant 0 : index
    %c0_8 = arith.constant 0 : index
    %8 = vector.load %arg7[%c0_7, %c0_8] : memref<64x16xf32, #tpu.memory_space<vmem>>, vector<64x16xf32>
    tpu.vector_store %arg7[%c0_7, %c0_8], %7 {strides = array<i32>} : memref<64x16xf32, #tpu.memory_space<vmem>>, vector<64x16xf32>,
    return
  }
  func.func @transform_0(%arg0: i32, %arg1: i32, %arg2: i32) -> (i32, i32) {
    %c0_i32 = arith.constant 0 : i32
    return %arg0, %arg2 : i32, i32
  }
  func.func @transform_1(%arg0: i32, %arg1: i32, %arg2: i32) -> (i32, i32) {
    %c0_i32 = arith.constant 0 : i32
    return %arg2, %arg1 : i32, i32
  }
  func.func @transform_2(%arg0: i32, %arg1: i32, %arg2: i32) -> (i32, i32) {
    %c0_i32 = arith.constant 0 : i32
    %c0_i32_0 = arith.constant 0 : i32
    return %c0_i32, %arg1 : i32, i32
  }
  func.func @transform_3(%arg0: i32, %arg1: i32, %arg2: i32) -> (i32, i32) {
    %c0_i32 = arith.constant 0 : i32
    return %arg0, %arg1 : i32, i32
  }
  func.func @transform_4(%arg0: i32, %arg1: i32, %arg2: i32) -> (i32, i32) {
    %c0_i32 = arith.constant 0 : i32
    return %arg0, %arg1 : i32, i32
  }
}

module attributes {stable_mosaic.version = 11 : i64} {
  func.func @_mm_kernel(%arg0: i32, %arg1: i32, %arg2: i32, %arg3: memref<64x16xf32, #tpu.memory_space<vmem>>, %arg4: memref<16x16xbf16, #tpu.memory_space<vmem>>, %arg5: memref<1x16xf32, #tpu.memory_space<vmem>>, %arg6: memref<64x16xf32, #tpu.memory_space<vmem>>, %arg7: memref<64x16xf32, #tpu.memory_space<vmem>>) attributes {dimension_semantics = [#tpu.dimension_semantics<parallel>, #tpu.dimension_semantics<parallel>, #tpu.dimension_semantics<arbitrary>], iteration_bounds = array<i64: 2, 1, 1>, scalar_prefetch = 0 : i64, scratch_operands = 0 : i64, tpu.core_type = #tpu.core_type<tc>, window_params = [{transform_indices = @transform_0, window_bounds = array<i64: 64, 16>}, {transform_indices = @transform_1, window_bounds = array<i64: 16, 16>}, {transform_indices = @transform_2, window_bounds = array<i64: 1, 16>}, {transform_indices = @transform_3, window_bounds = array<i64: 64, 16>}, {transform_indices = @transform_4, window_bounds = array<i64: 64, 16>}]} {
    %c0 = arith.constant 0 : index
    %c0_0 = arith.constant 0 : index
    %0 = vector.load %arg3[%c0, %c0_0] : memref<64x16xf32, #tpu.memory_space<vmem>>, vector<64x16xf32>
    %1 = arith.truncf %0 : vector<64x16xf32> to vector<64x16xbf16>
    %c0_1 = arith.constant 0 : index
    %c0_2 = arith.constant 0 : index
    %2 = vector.load %arg4[%c0_1, %c0_2] : memref<16x16xbf16, #tpu.memory_space<vmem>>, vector<16x16xbf16>
    %cst = arith.constant dense<0.000000e+00> : vector<64x16xf32>
    %3 = tpu.matmul %1, %2, %cst {dimension_numbers = #tpu.dot_dimension_numbers<[1], [0], [0], [1], [0, 0, 1, 1], [], []>} : vector<64x16xbf16>, vector<16x16xbf16>, vector<64x16xf32> -> vector<64x16xf32>
    %c0_3 = arith.constant 0 : index
    %c0_4 = arith.constant 0 : index
    %4 = vector.load %arg5[%c0_3, %c0_4] : memref<1x16xf32, #tpu.memory_space<vmem>>, vector<1x16xf32>
    %5 = vector.broadcast %4 : vector<1x16xf32> to vector<64x16xf32>
    %6 = arith.addf %3, %5 : vector<64x16xf32>
    %c0_5 = arith.constant 0 : index
    %c0_6 = arith.constant 0 : index
    %7 = vector.load %arg6[%c0_5, %c0_6] : memref<64x16xf32, #tpu.memory_space<vmem>>, vector<64x16xf32>
    %8 = arith.addf %6, %7 : vector<64x16xf32>
    %c0_7 = arith.constant 0 : index
    %c0_8 = arith.constant 0 : index
    %9 = vector.load %arg7[%c0_7, %c0_8] : memref<64x16xf32, #tpu.memory_space<vmem>>, vector<64x16xf32>
    tpu.vector_store %arg7[%c0_7, %c0_8], %8 {strides = array<i32>} : memref<64x16xf32, #tpu.memory_space<vmem>>, vector<64x16xf32>,
    return
  }
  func.func @transform_0(%arg0: i32, %arg1: i32, %arg2: i32) -> (i32, i32) {
    %c0_i32 = arith.constant 0 : i32
    return %arg0, %arg2 : i32, i32
  }
  func.func @transform_1(%arg0: i32, %arg1: i32, %arg2: i32) -> (i32, i32) {
    %c0_i32 = arith.constant 0 : i32
    return %arg2, %arg1 : i32, i32
  }
  func.func @transform_2(%arg0: i32, %arg1: i32, %arg2: i32) -> (i32, i32) {
    %c0_i32 = arith.constant 0 : i32
    %c0_i32_0 = arith.constant 0 : i32
    return %c0_i32, %arg1 : i32, i32
  }
  func.func @transform_3(%arg0: i32, %arg1: i32, %arg2: i32) -> (i32, i32) {
    %c0_i32 = arith.constant 0 : i32
    return %arg0, %arg1 : i32, i32
  }
  func.func @transform_4(%arg0: i32, %arg1: i32, %arg2: i32) -> (i32, i32) {
    %c0_i32 = arith.constant 0 : i32
    return %arg0, %arg1 : i32, i32
  }
}

module attributes {stable_mosaic.version = 11 : i64} {
  func.func @_conv3x3_kernel(%arg0: i32, %arg1: memref<1x8x8x16xf32, #tpu.memory_space<vmem>>, %arg2: memref<144x64xbf16, #tpu.memory_space<vmem>>, %arg3: memref<1x64xf32, #tpu.memory_space<vmem>>, %arg4: memref<1x8x8x64xbf16, #tpu.memory_space<vmem>>, %arg5: memref<1x1x64xf32, #tpu.memory_space<vmem>>, %arg6: memref<1x1x64xf32, #tpu.memory_space<vmem>>, %arg7: memref<8x8x144xbf16, #tpu.memory_space<vmem>>) attributes {dimension_semantics = [#tpu.dimension_semantics<parallel>], iteration_bounds = array<i64: 2>, scalar_prefetch = 0 : i64, scratch_operands = 1 : i64, tpu.core_type = #tpu.core_type<tc>, window_params = [{transform_indices = @transform_0, window_bounds = array<i64: 1, 8, 8, 16>}, {pipeline_mode = #tpu.pipeline_mode<synchronous>, transform_indices = @transform_1, window_bounds = array<i64: 144, 64>}, {pipeline_mode = #tpu.pipeline_mode<synchronous>, transform_indices = @transform_2, window_bounds = array<i64: 1, 64>}, {transform_indices = @transform_3, window_bounds = array<i64: 1, 8, 8, 64>}, {transform_indices = @transform_4, window_bounds = array<i64: 1, 1, 64>}, {transform_indices = @transform_5, window_bounds = array<i64: 1, 1, 64>}]} {
    %c0 = arith.constant 0 : index
    %c0_0 = arith.constant 0 : index
    %c0_1 = arith.constant 0 : index
    %c0_2 = arith.constant 0 : index
    %0 = vector.load %arg1[%c0, %c0_0, %c0_1, %c0_2] : memref<1x8x8x16xf32, #tpu.memory_space<vmem>>, vector<1x8x8x16xf32>
    %1 = vector.shape_cast %0 : vector<1x8x8x16xf32> to vector<8x8x16xf32>
    %cst = arith.constant 0.000000e+00 : bf16
    %2 = vector.broadcast %cst : bf16 to vector<8x8x144xbf16>
    %c0_3 = arith.constant 0 : index
    %c0_4 = arith.constant 0 : index
    %c0_5 = arith.constant 0 : index
    %3 = vector.load %arg7[%c0_3, %c0_4, %c0_5] : memref<8x8x144xbf16, #tpu.memory_space<vmem>>, vector<8x8x144xbf16>
    tpu.vector_store %arg7[%c0_3, %c0_4, %c0_5], %2 {strides = array<i32>} : memref<8x8x144xbf16, #tpu.memory_space<vmem>>, vector<8x8x144xbf16>,
    %4 = vector.extract_strided_slice %1 {offsets = [0, 0, 0], sizes = [7, 7, 16], strides = [1, 1, 1]} : vector<8x8x16xf32> to vector<7x7x16xf32>
    %5 = arith.truncf %4 : vector<7x7x16xf32> to vector<7x7x16xbf16>
    %c1 = arith.constant 1 : index
    %c1_6 = arith.constant 1 : index
    %c0_7 = arith.constant 0 : index
    %6 = vector.load %arg7[%c1, %c1_6, %c0_7] : memref<8x8x144xbf16, #tpu.memory_space<vmem>>, vector<7x7x16xbf16>
    tpu.vector_store %arg7[%c1, %c1_6, %c0_7], %5 {strides = array<i32>} : memref<8x8x144xbf16, #tpu.memory_space<vmem>>, vector<7x7x16xbf16>,
    %7 = vector.extract_strided_slice %1 {offsets = [0, 0, 0], sizes = [7, 8, 16], strides = [1, 1, 1]} : vector<8x8x16xf32> to vector<7x8x16xf32>
    %8 = arith.truncf %7 : vector<7x8x16xf32> to vector<7x8x16xbf16>
    %c1_8 = arith.constant 1 : index
    %c0_9 = arith.constant 0 : index
    %c16 = arith.constant 16 : index
    %9 = vector.load %arg7[%c1_8, %c0_9, %c16] : memref<8x8x144xbf16, #tpu.memory_space<vmem>>, vector<7x8x16xbf16>
    tpu.vector_store %arg7[%c1_8, %c0_9, %c16], %8 {strides = array<i32>} : memref<8x8x144xbf16, #tpu.memory_space<vmem>>, vector<7x8x16xbf16>,
    %10 = vector.extract_strided_slice %1 {offsets = [0, 1, 0], sizes = [7, 7, 16], strides = [1, 1, 1]} : vector<8x8x16xf32> to vector<7x7x16xf32>
    %11 = arith.truncf %10 : vector<7x7x16xf32> to vector<7x7x16xbf16>
    %c1_10 = arith.constant 1 : index
    %c0_11 = arith.constant 0 : index
    %c32 = arith.constant 32 : index
    %12 = vector.load %arg7[%c1_10, %c0_11, %c32] : memref<8x8x144xbf16, #tpu.memory_space<vmem>>, vector<7x7x16xbf16>
    tpu.vector_store %arg7[%c1_10, %c0_11, %c32], %11 {strides = array<i32>} : memref<8x8x144xbf16, #tpu.memory_space<vmem>>, vector<7x7x16xbf16>,
    %13 = vector.extract_strided_slice %1 {offsets = [0, 0, 0], sizes = [8, 7, 16], strides = [1, 1, 1]} : vector<8x8x16xf32> to vector<8x7x16xf32>
    %14 = arith.truncf %13 : vector<8x7x16xf32> to vector<8x7x16xbf16>
    %c0_12 = arith.constant 0 : index
    %c1_13 = arith.constant 1 : index
    %c48 = arith.constant 48 : index
    %15 = vector.load %arg7[%c0_12, %c1_13, %c48] : memref<8x8x144xbf16, #tpu.memory_space<vmem>>, vector<8x7x16xbf16>
    tpu.vector_store %arg7[%c0_12, %c1_13, %c48], %14 {strides = array<i32>} : memref<8x8x144xbf16, #tpu.memory_space<vmem>>, vector<8x7x16xbf16>,
    %16 = arith.truncf %1 : vector<8x8x16xf32> to vector<8x8x16xbf16>
    %c0_14 = arith.constant 0 : index
    %c0_15 = arith.constant 0 : index
    %c64 = arith.constant 64 : index
    %17 = vector.load %arg7[%c0_14, %c0_15, %c64] : memref<8x8x144xbf16, #tpu.memory_space<vmem>>, vector<8x8x16xbf16>
    tpu.vector_store %arg7[%c0_14, %c0_15, %c64], %16 {strides = array<i32>} : memref<8x8x144xbf16, #tpu.memory_space<vmem>>, vector<8x8x16xbf16>,
    %18 = vector.extract_strided_slice %1 {offsets = [0, 1, 0], sizes = [8, 7, 16], strides = [1, 1, 1]} : vector<8x8x16xf32> to vector<8x7x16xf32>
    %19 = arith.truncf %18 : vector<8x7x16xf32> to vector<8x7x16xbf16>
    %c0_16 = arith.constant 0 : index
    %c0_17 = arith.constant 0 : index
    %c80 = arith.constant 80 : index
    %20 = vector.load %arg7[%c0_16, %c0_17, %c80] : memref<8x8x144xbf16, #tpu.memory_space<vmem>>, vector<8x7x16xbf16>
    tpu.vector_store %arg7[%c0_16, %c0_17, %c80], %19 {strides = array<i32>} : memref<8x8x144xbf16, #tpu.memory_space<vmem>>, vector<8x7x16xbf16>,
    %21 = vector.extract_strided_slice %1 {offsets = [1, 0, 0], sizes = [7, 7, 16], strides = [1, 1, 1]} : vector<8x8x16xf32> to vector<7x7x16xf32>
    %22 = arith.truncf %21 : vector<7x7x16xf32> to vector<7x7x16xbf16>
    %c0_18 = arith.constant 0 : index
    %c1_19 = arith.constant 1 : index
    %c96 = arith.constant 96 : index
    %23 = vector.load %arg7[%c0_18, %c1_19, %c96] : memref<8x8x144xbf16, #tpu.memory_space<vmem>>, vector<7x7x16xbf16>
    tpu.vector_store %arg7[%c0_18, %c1_19, %c96], %22 {strides = array<i32>} : memref<8x8x144xbf16, #tpu.memory_space<vmem>>, vector<7x7x16xbf16>,
    %24 = vector.extract_strided_slice %1 {offsets = [1, 0, 0], sizes = [7, 8, 16], strides = [1, 1, 1]} : vector<8x8x16xf32> to vector<7x8x16xf32>
    %25 = arith.truncf %24 : vector<7x8x16xf32> to vector<7x8x16xbf16>
    %c0_20 = arith.constant 0 : index
    %c0_21 = arith.constant 0 : index
    %c112 = arith.constant 112 : index
    %26 = vector.load %arg7[%c0_20, %c0_21, %c112] : memref<8x8x144xbf16, #tpu.memory_space<vmem>>, vector<7x8x16xbf16>
    tpu.vector_store %arg7[%c0_20, %c0_21, %c112], %25 {strides = array<i32>} : memref<8x8x144xbf16, #tpu.memory_space<vmem>>, vector<7x8x16xbf16>,
    %27 = vector.extract_strided_slice %1 {offsets = [1, 1, 0], sizes = [7, 7, 16], strides = [1, 1, 1]} : vector<8x8x16xf32> to vector<7x7x16xf32>
    %28 = arith.truncf %27 : vector<7x7x16xf32> to vector<7x7x16xbf16>
    %c0_22 = arith.constant 0 : index
    %c0_23 = arith.constant 0 : index
    %c128 = arith.constant 128 : index
    %29 = vector.load %arg7[%c0_22, %c0_23, %c128] : memref<8x8x144xbf16, #tpu.memory_space<vmem>>, vector<7x7x16xbf16>
    tpu.vector_store %arg7[%c0_22, %c0_23, %c128], %28 {strides = array<i32>} : memref<8x8x144xbf16, #tpu.memory_space<vmem>>, vector<7x7x16xbf16>,
    %c0_24 = arith.constant 0 : index
    %c0_25 = arith.constant 0 : index
    %c0_26 = arith.constant 0 : index
    %30 = vector.load %arg7[%c0_24, %c0_25, %c0_26] : memref<8x8x144xbf16, #tpu.memory_space<vmem>>, vector<8x8x144xbf16>
    %31 = vector.shape_cast %30 : vector<8x8x144xbf16> to vector<64x144xbf16>
    %c0_27 = arith.constant 0 : index
    %c0_28 = arith.constant 0 : index
    %32 = vector.load %arg2[%c0_27, %c0_28] : memref<144x64xbf16, #tpu.memory_space<vmem>>, vector<144x64xbf16>
    %cst_29 = arith.constant dense<0.000000e+00> : vector<64x64xf32>
    %33 = tpu.matmul %31, %32, %cst_29 {dimension_numbers = #tpu.dot_dimension_numbers<[1], [0], [0], [1], [0, 0, 1, 1], [], []>} : vector<64x144xbf16>, vector<144x64xbf16>, vector<64x64xf32> -> vector<64x64xf32>
    %c0_30 = arith.constant 0 : index
    %c0_31 = arith.constant 0 : index
    %34 = vector.load %arg3[%c0_30, %c0_31] : memref<1x64xf32, #tpu.memory_space<vmem>>, vector<1x64xf32>
    %35 = vector.broadcast %34 : vector<1x64xf32> to vector<64x64xf32>
    %36 = arith.addf %33, %35 : vector<64x64xf32>
    %cst_32 = arith.constant dense<0.000000e+00> : vector<64xf32>
    %37 = vector.multi_reduction <add>, %36, %cst_32 [0] : vector<64x64xf32> to vector<64xf32>
    %38 = vector.shape_cast %37 : vector<64xf32> to vector<1x64xf32>
    %c0_33 = arith.constant 0 : index
    %c0_34 = arith.constant 0 : index
    %c0_35 = arith.constant 0 : index
    %39 = vector.load %arg5[%c0_33, %c0_34, %c0_35] : memref<1x1x64xf32, #tpu.memory_space<vmem>>, vector<1x1x64xf32>
    %40 = vector.shape_cast %39 : vector<1x1x64xf32> to vector<1x64xf32>
    %41 = vector.shape_cast %38 : vector<1x64xf32> to vector<1x1x64xf32>
    tpu.vector_store %arg5[%c0_33, %c0_34, %c0_35], %41 {strides = array<i32>} : memref<1x1x64xf32, #tpu.memory_space<vmem>>, vector<1x1x64xf32>,
    %42 = arith.mulf %36, %36 : vector<64x64xf32>
    %cst_36 = arith.constant dense<0.000000e+00> : vector<64xf32>
    %43 = vector.multi_reduction <add>, %42, %cst_36 [0] : vector<64x64xf32> to vector<64xf32>
    %44 = vector.shape_cast %43 : vector<64xf32> to vector<1x64xf32>
    %c0_37 = arith.constant 0 : index
    %c0_38 = arith.constant 0 : index
    %c0_39 = arith.constant 0 : index
    %45 = vector.load %arg6[%c0_37, %c0_38, %c0_39] : memref<1x1x64xf32, #tpu.memory_space<vmem>>, vector<1x1x64xf32>
    %46 = vector.shape_cast %45 : vector<1x1x64xf32> to vector<1x64xf32>
    %47 = vector.shape_cast %44 : vector<1x64xf32> to vector<1x1x64xf32>
    tpu.vector_store %arg6[%c0_37, %c0_38, %c0_39], %47 {strides = array<i32>} : memref<1x1x64xf32, #tpu.memory_space<vmem>>, vector<1x1x64xf32>,
    %48 = vector.shape_cast %36 : vector<64x64xf32> to vector<8x8x64xf32>
    %49 = arith.truncf %48 : vector<8x8x64xf32> to vector<8x8x64xbf16>
    %c0_40 = arith.constant 0 : index
    %c0_41 = arith.constant 0 : index
    %c0_42 = arith.constant 0 : index
    %c0_43 = arith.constant 0 : index
    %50 = vector.load %arg4[%c0_40, %c0_41, %c0_42, %c0_43] : memref<1x8x8x64xbf16, #tpu.memory_space<vmem>>, vector<1x8x8x64xbf16>
    %51 = vector.shape_cast %50 : vector<1x8x8x64xbf16> to vector<8x8x64xbf16>
    %52 = vector.shape_cast %49 : vector<8x8x64xbf16> to vector<1x8x8x64xbf16>
    tpu.vector_store %arg4[%c0_40, %c0_41, %c0_42, %c0_43], %52 {strides = array<i32>} : memref<1x8x8x64xbf16, #tpu.memory_space<vmem>>, vector<1x8x8x64xbf16>,
    return
  }
  func.func @transform_0(%arg0: i32) -> (i32, i32, i32, i32) {
    %c0_i32 = arith.constant 0 : i32
    %c0_i32_0 = arith.constant 0 : i32
    %c0_i32_1 = arith.constant 0 : i32
    %c0_i32_2 = arith.constant 0 : i32
    return %arg0, %c0_i32, %c0_i32_0, %c0_i32_1 : i32, i32, i32, i32
  }
  func.func @transform_1(%arg0: i32) -> (i32, i32) {
    %c0_i32 = arith.constant 0 : i32
    %c0_i32_0 = arith.constant 0 : i32
    %c0_i32_1 = arith.constant 0 : i32
    return %c0_i32, %c0_i32_0 : i32, i32
  }
  func.func @transform_2(%arg0: i32) -> (i32, i32) {
    %c0_i32 = arith.constant 0 : i32
    %c0_i32_0 = arith.constant 0 : i32
    %c0_i32_1 = arith.constant 0 : i32
    return %c0_i32, %c0_i32_0 : i32, i32
  }
  func.func @transform_3(%arg0: i32) -> (i32, i32, i32, i32) {
    %c0_i32 = arith.constant 0 : i32
    %c0_i32_0 = arith.constant 0 : i32
    %c0_i32_1 = arith.constant 0 : i32
    %c0_i32_2 = arith.constant 0 : i32
    return %arg0, %c0_i32, %c0_i32_0, %c0_i32_1 : i32, i32, i32, i32
  }
  func.func @transform_4(%arg0: i32) -> (i32, i32, i32) {
    %c0_i32 = arith.constant 0 : i32
    %c0_i32_0 = arith.constant 0 : i32
    %c0_i32_1 = arith.constant 0 : i32
    return %arg0, %c0_i32, %c0_i32_0 : i32, i32, i32
  }
  func.func @transform_5(%arg0: i32) -> (i32, i32, i32) {
    %c0_i32 = arith.constant 0 : i32
    %c0_i32_0 = arith.constant 0 : i32
    %c0_i32_1 = arith.constant 0 : i32
    return %arg0, %c0_i32, %c0_i32_0 : i32, i32, i32
  }
}

module attributes {stable_mosaic.version = 11 : i64} {
  func.func @_mm_kernel(%arg0: i32, %arg1: i32, %arg2: i32, %arg3: memref<64x64xbf16, #tpu.memory_space<vmem>>, %arg4: memref<64x16xbf16, #tpu.memory_space<vmem>>, %arg5: memref<1x16xf32, #tpu.memory_space<vmem>>, %arg6: memref<1x64xf32, #tpu.memory_space<vmem>>, %arg7: memref<1x64xf32, #tpu.memory_space<vmem>>, %arg8: memref<64x16xf32, #tpu.memory_space<vmem>>) attributes {dimension_semantics = [#tpu.dimension_semantics<parallel>, #tpu.dimension_semantics<parallel>, #tpu.dimension_semantics<arbitrary>], iteration_bounds = array<i64: 2, 1, 1>, scalar_prefetch = 0 : i64, scratch_operands = 0 : i64, tpu.core_type = #tpu.core_type<tc>, window_params = [{transform_indices = @transform_0, window_bounds = array<i64: 64, 64>}, {transform_indices = @transform_1, window_bounds = array<i64: 64, 16>}, {transform_indices = @transform_2, window_bounds = array<i64: 1, 16>}, {transform_indices = @transform_3, window_bounds = array<i64: 1, 64>}, {transform_indices = @transform_4, window_bounds = array<i64: 1, 64>}, {transform_indices = @transform_5, window_bounds = array<i64: 64, 16>}]} {
    %c0 = arith.constant 0 : index
    %c0_0 = arith.constant 0 : index
    %0 = vector.load %arg3[%c0, %c0_0] : memref<64x64xbf16, #tpu.memory_space<vmem>>, vector<64x64xbf16>
    %1 = arith.extf %0 : vector<64x64xbf16> to vector<64x64xf32>
    %c0_1 = arith.constant 0 : index
    %c0_2 = arith.constant 0 : index
    %2 = vector.load %arg6[%c0_1, %c0_2] : memref<1x64xf32, #tpu.memory_space<vmem>>, vector<1x64xf32>
    %3 = vector.broadcast %2 : vector<1x64xf32> to vector<64x64xf32>
    %4 = arith.mulf %1, %3 : vector<64x64xf32>
    %c0_3 = arith.constant 0 : index
    %c0_4 = arith.constant 0 : index
    %5 = vector.load %arg7[%c0_3, %c0_4] : memref<1x64xf32, #tpu.memory_space<vmem>>, vector<1x64xf32>
    %6 = vector.broadcast %5 : vector<1x64xf32> to vector<64x64xf32>
    %7 = arith.addf %4, %6 : vector<64x64xf32>
    %cst = arith.constant 0.000000e+00 : f32
    %8 = vector.broadcast %cst : f32 to vector<64x64xf32>
    %9 = arith.maximumf %7, %8 : vector<64x64xf32>
    %10 = arith.truncf %9 : vector<64x64xf32> to vector<64x64xbf16>
    %c0_5 = arith.constant 0 : index
    %c0_6 = arith.constant 0 : index
    %11 = vector.load %arg4[%c0_5, %c0_6] : memref<64x16xbf16, #tpu.memory_space<vmem>>, vector<64x16xbf16>
    %cst_7 = arith.constant dense<0.000000e+00> : vector<64x16xf32>
    %12 = tpu.matmul %10, %11, %cst_7 {dimension_numbers = #tpu.dot_dimension_numbers<[1], [0], [0], [1], [0, 0, 1, 1], [], []>} : vector<64x64xbf16>, vector<64x16xbf16>, vector<64x16xf32> -> vector<64x16xf32>
    %c0_8 = arith.constant 0 : index
    %c0_9 = arith.constant 0 : index
    %13 = vector.load %arg5[%c0_8, %c0_9] : memref<1x16xf32, #tpu.memory_space<vmem>>, vector<1x16xf32>
    %14 = vector.broadcast %13 : vector<1x16xf32> to vector<64x16xf32>
    %15 = arith.addf %12, %14 : vector<64x16xf32>
    %c0_10 = arith.constant 0 : index
    %c0_11 = arith.constant 0 : index
    %16 = vector.load %arg8[%c0_10, %c0_11] : memref<64x16xf32, #tpu.memory_space<vmem>>, vector<64x16xf32>
    tpu.vector_store %arg8[%c0_10, %c0_11], %15 {strides = array<i32>} : memref<64x16xf32, #tpu.memory_space<vmem>>, vector<64x16xf32>,
    return
  }
  func.func @transform_0(%arg0: i32, %arg1: i32, %arg2: i32) -> (i32, i32) {
    %c0_i32 = arith.constant 0 : i32
    return %arg0, %arg2 : i32, i32
  }
  func.func @transform_1(%arg0: i32, %arg1: i32, %arg2: i32) -> (i32, i32) {
    %c0_i32 = arith.constant 0 : i32
    return %arg2, %arg1 : i32, i32
  }
  func.func @transform_2(%arg0: i32, %arg1: i32, %arg2: i32) -> (i32, i32) {
    %c0_i32 = arith.constant 0 : i32
    %c0_i32_0 = arith.constant 0 : i32
    return %c0_i32, %arg1 : i32, i32
  }
  func.func @transform_3(%arg0: i32, %arg1: i32, %arg2: i32) -> (i32, i32) {
    %c0_i32 = arith.constant 0 : i32
    %c0_i32_0 = arith.constant 0 : i32
    return %c0_i32, %arg2 : i32, i32
  }
  func.func @transform_4(%arg0: i32, %arg1: i32, %arg2: i32) -> (i32, i32) {
    %c0_i32 = arith.constant 0 : i32
    %c0_i32_0 = arith.constant 0 : i32
    return %c0_i32, %arg2 : i32, i32
  }
  func.func @transform_5(%arg0: i32, %arg1: i32, %arg2: i32) -> (i32, i32) {
    %c0_i32 = arith.constant 0 : i32
    return %arg0, %arg1 : i32, i32
  }
}

</mosaic_0001>

<bundles_post_ra>
// kernel: cfb_fwd.17
= control target key start
LH: loop header
LB: loop body
LE: loop exit
PB: predicated region body
PF: predicated region fallthrough
CT: control target
= control target key end

     0   :  { %s711_s15 = smov 0   ;;  %s713_s16 = smov 0   ;;  %s775_s0 = inlined_call_operand.vmem [shape: bf16[128,16], index: 0, kind: input, shape index: {}]   ;;  %s776_s1 = inlined_call_operand.vmem [shape: bf16[16,16], index: 1, kind: input, shape index: {}]   ;;  %s777_s2 = inlined_call_operand.vmem [shape: f32[1,16], index: 2, kind: input, shape index: {}]   ;;  %s778_s3 = inlined_call_operand.vmem [shape: f32[128,16], index: 3, kind: input, shape index: {}]   ;;  %s779_s4 = inlined_call_operand.vmem [shape: f32[128,16], index: 4, kind: output, shape index: {}]  }
   0x1   :  { %s715_s17 = smov 0  }
   0x2 LB: > { %s33_s18 = sadd.s32 1, %s680_s16  ;;  %p597_p0 = scmp.ge.s32.totalorder %s684_s17, 1  ;;  %s684_s17 = sphi %s715_s17, %s14_s17   ;;  %s680_s16 = sphi %s713_s16, %s781_s16   ;;  %s676_s15 = sphi %s711_s15, %s780_s15  }
   0x3   : > { %p35_p1 = scmp.ge.s32.totalorder %s33_s18, 2  ;;  %p229_p2 = scmp.lt.s32.totalorder %s684_s17, 3 }
   0x5   : > { %s783_s18 = smov (%p35_p1, %s33_s18), 0  ;;  %p230_p3 = pnand %p597_p0, %p229_p2 }
   0x6   : > { %v657_v0 = vld [vmem:[%s776_s1] sm:$0xff] (!%p230_p3)   ;;  %s598_s21 = sshll.u32 (!%p230_p3), %s676_s15, 3  ;;  %vm363_vm0 = vcmask (!%p230_p3), 130048  }
   0x7   : > { %233 = sbr.rel (%p230_p3) target bundleno = 239 (0xef), region = 36  ;;  %p281_p4 = scmp.lt.s32.totalorder (!%p230_p3), %s598_s21, 15  ;;  %621 = vmatprep.subr.bf16.mxu0 (!%p230_p3), %v657_v0  ;;  %631 = vmatprep.subr.bf16.mxu1 (!%p230_p3), %v657_v0  ;;  %v604_v5 = vld [vmem:[%s777_s2] ss:$0 sm:$0xff] (!%p230_p3) }
   0x8   : > { %622 = vmatpush3.bf16.msra.mxu0 (!%p230_p3), %v657_v0  ;;  %632 = vmatpush3.bf16.msra.mxu1 (!%p230_p3), %v657_v0 }
   0xe   : > { %s785_s21 = smov (!%p281_p4, %s598_s21), 15 }
   0xf   : > { %s599_s22 = sshll.u32 %s785_s21, 2  ;;  %s601_s26 = sshll.u32 %s785_s21, 3 }
  0x10   : > { %s287_s25 = scalar_lea.vmem %s775_s0, %s599_s22  ;;  %s308_s29 = scalar_lea.vmem %s778_s3, %s601_s26 }
  0x11   : > { %v658_v1 = vld [vmem:[%s287_s25] sm:$0xff]   ;;  %v659_v2 = vld [vmem:[%s287_s25 + $0x10] sm:$0xff]   ;;  %v660_v3 = vld [vmem:[%s287_s25 + $0x8] sm:$0xff]   ;;  %s748_s8 = scalar_lea.vmem %s779_s4, %s601_s26 }
  0x12   : > { %623 = vmatprep.mubr.msk.bf16.mxu0 %vm363_vm0, %v658_v1  ;;  %627 = vmatprep.mubr.msk.bf16.mxu1 %vm363_vm0, %v659_v2  ;;  %v661_v4 = vld [vmem:[%s287_s25 + $0x18] sm:$0xff]   ;;  %v443_v7 = vld [vmem:[%s308_s29 + $0x10] sm:$0xff]  ;;  %v441_v12 = vld [vmem:[%s308_s29] sm:$0xff] }
  0x13   : > { %624 = vmatmul.mubr.msk.bf16.vlgmr.msra.gmra.mrb[0].mxu0 %vm363_vm0, %v660_v3  ;;  %628 = vmatmul.mubr.msk.bf16.vlgmr.msra.gmra.mrb[0].mxu1 %vm363_vm0, %v661_v4  ;;  %v447_v10 = vld [vmem:[%s308_s29 + $0x30] sm:$0xff]  ;;  %v445_v16 = vld [vmem:[%s308_s29 + $0x20] sm:$0xff]  ;;  %v444_v18 = vld [vmem:[%s308_s29 + $0x18] sm:$0xff] }
  0x14   : > { %v448_v23 = vld [vmem:[%s308_s29 + $0x38] sm:$0xff]  ;;  %v442_v25 = vld [vmem:[%s308_s29 + $0x8] sm:$0xff] }
  0x15   : > { %v446_v31 = vld [vmem:[%s308_s29 + $0x28] sm:$0xff] }
  0xe6   : > { %v625_v6 = vpop.f32.mrb[0].mxu0  ;;  %v629_v9 = vpop.f32.mrb[0].mxu1 }
  0xe7   : > { %v419_v8 = vadd.f32 %v625_v6, %v604_v5  ;;  %v410_v11 = vpop.f32.mrb[1].mxu0  ;;  %v435_v13 = vadd.f32 %v629_v9, %v604_v5  ;;  %v426_v15 = vpop.f32.mrb[1].mxu1 }
  0xe8   : > { %v411_v14 = vadd.f32 %v604_v5, %v410_v11  ;;  %v626_v17 = vpop.f32.mrb[2].mxu0  ;;  %v427_v20 = vadd.f32 %v604_v5, %v426_v15  ;;  %v630_v22 = vpop.f32.mrb[2].mxu1 }
  0xe9   : > { %v451_v19 = vadd.f32 %v443_v7, %v419_v8  ;;  %v422_v21 = vadd.f32 %v626_v17, %v604_v5  ;;  %v413_v24 = vpop.f32.mrb[3].mxu0  ;;  %v455_v26 = vadd.f32 %v447_v10, %v435_v13  ;;  %v438_v28 = vadd.f32 %v630_v22, %v604_v5  ;;  %v429_v30 = vpop.f32.mrb[3].mxu1 }
  0xea   : > { %v449_v27 = vadd.f32 %v441_v12, %v411_v14  ;;  %v414_v29 = vadd.f32 %v604_v5, %v413_v24  ;;  %v453_v32 = vadd.f32 %v445_v16, %v427_v20  ;;  %v430_v34 = vadd.f32 %v604_v5, %v429_v30 }
  0xeb   : > { %459 = vst.msk [vmem:[%s748_s8 + $0x10] sm:$0xff] %vm363_vm0, %v451_v19  ;;  %v452_v33 = vadd.f32 %v444_v18, %v422_v21  ;;  %463 = vst.msk [vmem:[%s748_s8 + $0x30] sm:$0xff] %vm363_vm0, %v455_v26  ;;  %v456_v35 = vadd.f32 %v448_v23, %v438_v28 }
  0xec   : > { %457 = vst.msk [vmem:[%s748_s8] sm:$0xff] %vm363_vm0, %v449_v27  ;;  %v450_v36 = vadd.f32 %v442_v25, %v414_v29  ;;  %461 = vst.msk [vmem:[%s748_s8 + $0x20] sm:$0xff] %vm363_vm0, %v453_v32  ;;  %v454_v37 = vadd.f32 %v446_v31, %v430_v34 }
  0xed   : > { %460 = vst.msk [vmem:[%s748_s8 + $0x18] sm:$0xff] %vm363_vm0, %v452_v33  ;;  %464 = vst.msk [vmem:[%s748_s8 + $0x38] sm:$0xff] %vm363_vm0, %v456_v35 }
  0xee   : > { %458 = vst.msk [vmem:[%s748_s8 + $0x8] sm:$0xff] %vm363_vm0, %v450_v36  ;;  %462 = vst.msk [vmem:[%s748_s8 + $0x28] sm:$0xff] %vm363_vm0, %v454_v37 }
  0xef PF: > { %s14_s17 = sadd.s32 1, %s684_s17   ;;  %s780_s15 = smov %s680_s16 }
  0xf0   : > { %p11_p5 = scmp.ge.s32.totalorder %s14_s17, 4   ;;  %s781_s16 = smov %s783_s18 }
  0xf2   :  { %13 = sbr.rel (!%p11_p5) target bundleno = 2 (0x2), region = 75 }

// kernel: cfb_fwd.15
= control target key start
LH: loop header
LB: loop body
LE: loop exit
PB: predicated region body
PF: predicated region fallthrough
CT: control target
= control target key end

     0   :  { %s927_s18 = smov 0   ;;  %s929_s19 = smov 0   ;;  %s1068_s0 = inlined_call_operand.vmem [shape: f32[128,16], index: 0, kind: input, shape index: {}]   ;;  %s1069_s1 = inlined_call_operand.vmem [shape: bf16[16,48], index: 1, kind: input, shape index: {}]   ;;  %s1070_s2 = inlined_call_operand.vmem [shape: f32[1,48], index: 2, kind: input, shape index: {}]   ;;  %s1071_s3 = inlined_call_operand.vmem [shape: f32[1,16], index: 3, kind: input, shape index: {}]   ;;  %s1072_s4 = inlined_call_operand.vmem [shape: f32[1,16], index: 4, kind: input, shape index: {}]   ;;  %s1073_s5 = inlined_call_operand.vmem [shape: bf16[128,48], index: 5, kind: output, shape index: {}]  }
   0x1   :  { %s931_s20 = smov 0  }
   0x2 LB: > { %s34_s21 = sadd.s32 1, %s891_s19  ;;  %p768_p0 = scmp.ge.s32.totalorder %s895_s20, 1  ;;  %s895_s20 = sphi %s931_s20, %s15_s20   ;;  %s891_s19 = sphi %s929_s19, %s1075_s19   ;;  %s887_s18 = sphi %s927_s18, %s1074_s18  }
   0x3   : > { %p36_p1 = scmp.ge.s32.totalorder %s34_s21, 2  ;;  %p238_p2 = scmp.lt.s32.totalorder %s895_s20, 3 }
   0x5   : > { %s1077_s21 = smov (%p36_p1, %s34_s21), 0  ;;  %p239_p3 = pnand %p768_p0, %p238_p2 }
   0x6   : > { %s769_s22 = sshll.u32 (!%p239_p3), %s887_s18, 3  ;;  %vm322_vm0 = vcmask (!%p239_p3), 130048   ;;  %v840_v56 = vld [vmem:[%s1069_s1] sm:$0xff] (!%p239_p3)  }
   0x7   : > { %242 = sbr.rel (%p239_p3) target bundleno = 584 (0x248), region = 40  ;;  %p284_p4 = scmp.lt.s32.totalorder (!%p239_p3), %s769_s22, 15  ;;  %804 = vmatprep.subr.bf16.mxu0 (!%p239_p3), %v840_v56  ;;  %814 = vmatprep.subr.bf16.mxu1 (!%p239_p3), %v840_v56 }
   0x8   : > { %805 = vmatpush3.bf16.msra.mxu0 (!%p239_p3), %v840_v56  ;;  %815 = vmatpush3.bf16.msra.mxu1 (!%p239_p3), %v840_v56 }
   0xe   : > { %s1079_s22 = smov (!%p284_p4, %s769_s22), 15 }
   0xf   : > { %s770_s23 = sshll.u32 %s1079_s22, 3  ;;  %s772_s10 = sshll.u32 %s1079_s22, 2 }
  0x10   : > { %s290_s26 = scalar_lea.vmem %s1068_s0, %s770_s23  ;;  %s311_s13 = scalar_lea.vmem %s1073_s5, %s772_s10 }
  0x11   : > { %v314_v0 = vld [vmem:[%s290_s26] sm:$0xff]  ;;  %v315_v2 = vld [vmem:[%s290_s26 + $0x8] sm:$0xff]  ;;  %v316_v8 = vld [vmem:[%s290_s26 + $0x10] sm:$0xff] }
  0x12   : > { %v318_v1 = vld [vmem:[%s290_s26 + $0x20] sm:$0xff]  ;;  %v323_v3 = vsel %vm322_vm0, %v314_v0, 0.0  ;;  %v319_v5 = vld [vmem:[%s290_s26 + $0x28] sm:$0xff]  ;;  %v326_v6 = vsel %vm322_vm0, %v315_v2, 0.0  ;;  %v317_v9 = vld [vmem:[%s290_s26 + $0x18] sm:$0xff]  ;;  %v329_v10 = vsel %vm322_vm0, %v316_v8, 0.0 }
  0x13   : > { %v335_v4 = vsel %vm322_vm0, %v318_v1, 0.0  ;;  %324 = vadd.xlane.f32.xlu0 %v323_v3  ;;  %v338_v7 = vsel %vm322_vm0, %v319_v5, 0.0  ;;  %v332_v11 = vsel %vm322_vm0, %v317_v9, 0.0  ;;  %v320_v12 = vld [vmem:[%s290_s26 + $0x30] sm:$0xff]  ;;  %v321_v13 = vld [vmem:[%s290_s26 + $0x38] sm:$0xff] }
  0x14   : > { %336 = vadd.xlane.f32.xlu1 %v335_v4  ;;  %v341_v14 = vsel %vm322_vm0, %v320_v12, 0.0  ;;  %v344_v15 = vsel %vm322_vm0, %v321_v13, 0.0 }
  0x17   : > { %327 = vadd.xlane.f32.xlu0 %v326_v6 }
  0x18   : > { %339 = vadd.xlane.f32.xlu1 %v338_v7 }
  0x1b   : > { %330 = vadd.xlane.f32.xlu0 %v329_v10 }
  0x1c   : > { %333 = vadd.xlane.f32.xlu1 %v332_v11 }
  0x1f   : > { %342 = vadd.xlane.f32.xlu0 %v341_v14 }
  0x20   : > { %345 = vadd.xlane.f32.xlu1 %v344_v15 }
  0xa0   : > { %v325_v16 = vpop.xlane.xlu0 %324 }
  0xa1   : > { %v337_v17 = vpop.xlane.xlu1 %336  ;;  %v348_v18 = vmul.f32 0.0625, %v325_v16 }
  0xa2   : > { %v352_v19 = vmul.f32 0.0625, %v337_v17 }
  0xa3   : > { %v959_v20 = vsub.f32 %v314_v0, %v348_v18 }
  0xa4   : > { %v961_v21 = vsub.f32 %v318_v1, %v352_v19  ;;  %v328_v22 = vpop.xlane.xlu0 %327 }
  0xa5   : > { %v340_v23 = vpop.xlane.xlu1 %339  ;;  %v349_v24 = vmul.f32 0.0625, %v328_v22  ;;  %v364_v26 = vmul.f32 %v959_v20, %v959_v20 }
  0xa6   : > { %v353_v25 = vmul.f32 0.0625, %v340_v23  ;;  %v368_v27 = vmul.f32 %v961_v21, %v961_v21 }
  0xa7   : > { %v967_v28 = vsub.f32 %v315_v2, %v349_v24  ;;  %v372_v30 = vsel %vm322_vm0, %v364_v26, 0.0 }
  0xa8   : > { %v969_v29 = vsub.f32 %v319_v5, %v353_v25  ;;  %373 = vadd.xlane.f32.xlu0 %v372_v30  ;;  %v331_v31 = vpop.xlane.xlu0 %330  ;;  %v384_v33 = vsel %vm322_vm0, %v368_v27, 0.0 }
  0xa9   : > { %v334_v32 = vpop.xlane.xlu1 %333  ;;  %v350_v34 = vmul.f32 0.0625, %v331_v31  ;;  %v365_v36 = vmul.f32 %v967_v28, %v967_v28 }
  0xaa   : > { %v351_v35 = vmul.f32 0.0625, %v334_v32  ;;  %v369_v37 = vmul.f32 %v969_v29, %v969_v29 }
  0xab   : > { %v977_v38 = vsub.f32 %v316_v8, %v350_v34  ;;  %v375_v40 = vsel %vm322_vm0, %v365_v36, 0.0 }
  0xac   : > { %v979_v39 = vsub.f32 %v317_v9, %v351_v35  ;;  %385 = vadd.xlane.f32.xlu0 %v384_v33  ;;  %376 = vadd.xlane.f32.xlu1 %v375_v40  ;;  %v343_v41 = vpop.xlane.xlu0 %342  ;;  %v387_v43 = vsel %vm322_vm0, %v369_v37, 0.0 }
  0xad   : > { %v346_v42 = vpop.xlane.xlu1 %345  ;;  %v354_v44 = vmul.f32 0.0625, %v343_v41  ;;  %v366_v46 = vmul.f32 %v977_v38, %v977_v38 }
  0xae   : > { %v355_v45 = vmul.f32 0.0625, %v346_v42  ;;  %v367_v47 = vmul.f32 %v979_v39, %v979_v39 }
  0xaf   : > { %v987_v48 = vsub.f32 %v320_v12, %v354_v44  ;;  %v378_v50 = vsel %vm322_vm0, %v366_v46, 0.0 }
  0xb0   : > { %v989_v49 = vsub.f32 %v321_v13, %v355_v45  ;;  %388 = vadd.xlane.f32.xlu1 %v387_v43  ;;  %379 = vadd.xlane.f32.xlu0 %v378_v50  ;;  %v381_v51 = vsel %vm322_vm0, %v367_v47, 0.0 }
  0xb1   : > { %v370_v52 = vmul.f32 %v987_v48, %v987_v48 }
  0xb2   : > { %v371_v53 = vmul.f32 %v989_v49, %v989_v49 }
  0xb3   : > { %v390_v54 = vsel %vm322_vm0, %v370_v52, 0.0 }
  0xb4   : > { %382 = vadd.xlane.f32.xlu1 %v381_v51  ;;  %391 = vadd.xlane.f32.xlu0 %v390_v54  ;;  %v393_v55 = vsel %vm322_vm0, %v371_v53, 0.0 }
  0xb8   : > { %394 = vadd.xlane.f32.xlu1 %v393_v55 }
 0x135   : > { %v374_v57 = vpop.xlane.xlu0 %373 }
 0x136   : > { %v396_v58 = vmul.f32 0.0625, %v374_v57 }
 0x138   : > { %841 = vrsqrt.f32 %v396_v58  ;;  %vm406_vm1 = vcmp.eq.f32.partialorder %v396_v58, inf  ;;  %v409_v9 = vand.u32 2147483648, %v396_v58  ;;  %vm408_vm2 = vcmp.eq.f32.partialorder %v396_v58, 0.0 }
 0x139   : > { %v377_v59 = vpop.xlane.xlu1 %376  ;;  %v386_v60 = vpop.xlane.xlu0 %385 }
 0x13a   : > { %v397_v61 = vmul.f32 0.0625, %v377_v59  ;;  %v400_v62 = vmul.f32 0.0625, %v386_v60 }
 0x13c   : > { %843 = vrsqrt.f32 %v397_v61  ;;  %vm413_vm3 = vcmp.eq.f32.partialorder %v397_v61, inf  ;;  %vm415_vm4 = vcmp.eq.f32.partialorder %v397_v61, 0.0  ;;  %v416_v18 = vand.u32 2147483648, %v397_v61 }
 0x13d   : > { %845 = vrsqrt.f32 %v400_v62  ;;  %v389_v63 = vpop.xlane.xlu1 %388  ;;  %v380_v0 = vpop.xlane.xlu0 %379  ;;  %vm434_vm5 = vcmp.eq.f32.partialorder %v400_v62, inf  ;;  %v437_v23 = vand.u32 2147483648, %v400_v62  ;;  %vm436_vm6 = vcmp.eq.f32.partialorder %v400_v62, 0.0 }
 0x13e   : > { %v401_v1 = vmul.f32 0.0625, %v389_v63  ;;  %v398_v2 = vmul.f32 0.0625, %v380_v0 }
 0x140   : > { %847 = vrsqrt.f32 %v401_v1  ;;  %vm441_vm7 = vcmp.eq.f32.partialorder %v401_v1, inf  ;;  %vm443_vm8 = vcmp.eq.f32.partialorder %v401_v1, 0.0  ;;  %v444_v33 = vand.u32 2147483648, %v401_v1 }
 0x141   : > { %849 = vrsqrt.f32 %v398_v2  ;;  %v383_v3 = vpop.xlane.xlu1 %382  ;;  %v392_v4 = vpop.xlane.xlu0 %391  ;;  %vm420_vm9 = vcmp.eq.f32.partialorder %v398_v2, inf  ;;  %v423_v37 = vand.u32 2147483648, %v398_v2  ;;  %vm422_vm10 = vcmp.eq.f32.partialorder %v398_v2, 0.0 }
 0x142   : > { %v842_v5 = vpop.eup %841  ;;  %v1002_v6 = vmul.f32 0.0625, %v383_v3  ;;  %v1004_v7 = vmul.f32 0.0625, %v392_v4 }
 0x143   : > { %v405_v8 = vmul.f32 %v842_v5, %v396_v58 }
 0x144   : > { %851 = vrsqrt.f32 %v1002_v6  ;;  %vm427_vm11 = vcmp.eq.f32.partialorder %v1002_v6, inf  ;;  %vm429_vm12 = vcmp.eq.f32.partialorder %v1002_v6, 0.0  ;;  %v430_v50 = vand.u32 2147483648, %v1002_v6 }
 0x145   : > { %v407_v10 = vsel %vm406_vm1, %v396_v58, %v405_v8  ;;  %853 = vrsqrt.f32 %v1004_v7  ;;  %v395_v11 = vpop.xlane.xlu1 %394  ;;  %vm448_vm13 = vcmp.eq.f32.partialorder %v1004_v7, inf  ;;  %v451_v53 = vand.u32 2147483648, %v1004_v7 }
 0x146   : > { %v844_v12 = vpop.eup %843  ;;  %v1008_v13 = vmul.f32 0.0625, %v395_v11  ;;  %v410_v14 = vsel %vm408_vm2, %v409_v9, %v407_v10  ;;  %vm450_vm14 = vcmp.eq.f32.partialorder %v1004_v7, 0.0  ;;  %vm642_vm2 = vcmask 388096  }
 0x147   : > { %v846_v15 = vpop.eup %845  ;;  %v412_v16 = vmul.f32 %v844_v12, %v397_v61  ;;  %v460_v17 = vadd.f32 1e-05, %v410_v14 }
 0x148   : > { %v433_v19 = vmul.f32 %v846_v15, %v400_v62  ;;  %855 = vrsqrt.f32 %v1008_v13  ;;  %vm455_vm15 = vcmp.eq.f32.partialorder %v1008_v13, inf  ;;  %vm457_vm1 = vcmp.eq.f32.partialorder %v1008_v13, 0.0 }
 0x149   : > { %v414_v22 = vsel %vm413_vm3, %v397_v61, %v412_v16  ;;  %857 = vrcp.f32 %v460_v17 }
 0x14a   : > { %v848_v24 = vpop.eup %847  ;;  %v435_v25 = vsel %vm434_vm5, %v400_v62, %v433_v19  ;;  %v417_v26 = vsel %vm415_vm4, %v416_v18, %v414_v22  ;;  %v458_v62 = vand.u32 2147483648, %v1008_v13 }
 0x14b   : > { %v850_v27 = vpop.eup %849  ;;  %v440_v30 = vmul.f32 %v848_v24, %v401_v1  ;;  %v461_v31 = vadd.f32 1e-05, %v417_v26  ;;  %v438_v32 = vsel %vm436_vm6, %v437_v23, %v435_v25 }
 0x14c   : > { %v419_v34 = vmul.f32 %v850_v27, %v398_v2  ;;  %v464_v35 = vadd.f32 1e-05, %v438_v32 }
 0x14d   : > { %v442_v36 = vsel %vm441_vm7, %v401_v1, %v440_v30  ;;  %859 = vrcp.f32 %v461_v31  ;;  %v773_v1 = vld [vmem:[%s1071_s3] ss:$0 sm:$0xff] }
 0x14e   : > { %v852_v40 = vpop.eup %851  ;;  %v421_v41 = vsel %vm420_vm9, %v398_v2, %v419_v34  ;;  %v445_v42 = vsel %vm443_vm8, %v444_v33, %v442_v36  ;;  %861 = vrcp.f32 %v464_v35 }
 0x14f   : > { %v854_v43 = vpop.eup %853  ;;  %v424_v44 = vsel %vm422_vm10, %v423_v37, %v421_v41  ;;  %v426_v45 = vmul.f32 %v852_v40, %v1002_v6  ;;  %v465_v46 = vadd.f32 1e-05, %v445_v42 }
 0x150   : > { %v462_v47 = vadd.f32 1e-05, %v424_v44  ;;  %v447_v51 = vmul.f32 %v854_v43, %v1004_v7 }
 0x151   : > { %v428_v52 = vsel %vm427_vm11, %v1002_v6, %v426_v45  ;;  %863 = vrcp.f32 %v465_v46 }
 0x152   : > { %v856_v54 = vpop.eup %855  ;;  %865 = vrcp.f32 %v462_v47  ;;  %v431_v55 = vsel %vm429_vm12, %v430_v50, %v428_v52  ;;  %v449_v56 = vsel %vm448_vm13, %v1004_v7, %v447_v51 }
 0x153   : > { %v858_v57 = vpop.eup %857  ;;  %v463_v58 = vadd.f32 1e-05, %v431_v55  ;;  %v452_v59 = vsel %vm450_vm14, %v451_v53, %v449_v56  ;;  %v454_v60 = vmul.f32 %v856_v54, %v1008_v13 }
 0x154   : > { %v466_v61 = vadd.f32 1e-05, %v452_v59  ;;  %v469_v63 = vmul.f32 %v858_v57, %v959_v20  ;;  %v774_v20 = vld [vmem:[%s1072_s4] ss:$0 sm:$0xff] }
 0x155   : > { %867 = vrcp.f32 %v463_v58  ;;  %v456_v0 = vsel %vm455_vm15, %v1008_v13, %v454_v60 }
 0x156   : > { %869 = vrcp.f32 %v466_v61  ;;  %v459_v2 = vsel %vm457_vm1, %v458_v62, %v456_v0  ;;  %v491_v7 = vmul.f32 %v773_v1, %v469_v63 }
 0x157   : > { %v860_v3 = vpop.eup %859  ;;  %v467_v4 = vadd.f32 1e-05, %v459_v2 }
 0x158   : > { %v862_v5 = vpop.eup %861  ;;  %v471_v6 = vmul.f32 %v860_v3, %v967_v28  ;;  %v506_v12 = vadd.f32 %v774_v20, %v491_v7 }
 0x159   : > { %871 = vrcp.f32 %v467_v4  ;;  %v477_v8 = vmul.f32 %v862_v5, %v961_v21 }
 0x15a   : > { %v492_v9 = vmul.f32 %v773_v1, %v471_v6 }
 0x15b   : > { %v864_v10 = vpop.eup %863  ;;  %v495_v15 = vmul.f32 %v773_v1, %v477_v8 }
 0x15c   : > { %v866_v11 = vpop.eup %865  ;;  %v507_v13 = vadd.f32 %v774_v20, %v492_v9  ;;  %v479_v14 = vmul.f32 %v864_v10, %v969_v29 }
 0x15d   : > { %v473_v16 = vmul.f32 %v866_v11, %v977_v38  ;;  %v510_v22 = vadd.f32 %v774_v20, %v495_v15 }
 0x15e   : > { %v514_v17 = vpack.c.bf16 %v507_v13, %v506_v12  ;;  %v496_v28 = vmul.f32 %v773_v1, %v479_v14 }
 0x15f   : > { %v868_v18 = vpop.eup %867  ;;  %v493_v24 = vmul.f32 %v773_v1, %v473_v16 }
 0x160   : > { %v870_v19 = vpop.eup %869  ;;  %806 = vmatprep.mubr.msk.bf16.mxu0 %vm322_vm0, %v514_v17  ;;  %v511_v23 = vadd.f32 %v774_v20, %v496_v28  ;;  %v475_v21 = vmul.f32 %v868_v18, %v979_v39 }
 0x161   : > { %v481_v25 = vmul.f32 %v870_v19, %v987_v48  ;;  %v508_v38 = vadd.f32 %v774_v20, %v493_v24  ;;  %v775_v48 = vld [vmem:[%s1070_s2] ss:$0 sm:$0xff] }
 0x162   : > { %v516_v26 = vpack.c.bf16 %v511_v23, %v510_v22  ;;  %v494_v27 = vmul.f32 %v773_v1, %v475_v21 }
 0x163   : > { %v872_v29 = vpop.eup %871  ;;  %v497_v32 = vmul.f32 %v773_v1, %v481_v25 }
 0x164   : > { %810 = vmatprep.mubr.msk.bf16.mxu1 %vm322_vm0, %v516_v26  ;;  %v509_v30 = vadd.f32 %v774_v20, %v494_v27  ;;  %v483_v31 = vmul.f32 %v872_v29, %v989_v49 }
 0x165   : > { %v512_v35 = vadd.f32 %v774_v20, %v497_v32 }
 0x166   : > { %v515_v33 = vpack.c.bf16 %v509_v30, %v508_v38  ;;  %v498_v34 = vmul.f32 %v773_v1, %v483_v31 }
 0x168   : > { %807 = vmatmul.mubr.msk.bf16.vlgmr.msra.gmra.mrb[0].mxu0 %vm322_vm0, %v515_v33  ;;  %v513_v39 = vadd.f32 %v774_v20, %v498_v34 }
 0x16a   : > { %v517_v36 = vpack.c.bf16 %v513_v39, %v512_v35 }
 0x16c   : > { %811 = vmatmul.mubr.msk.bf16.vlgmr.msra.gmra.mrb[0].mxu1 %vm322_vm0, %v517_v36 }
 0x23b   : > { %v808_v37 = vpop.f32.mrb[0].mxu0 }
 0x23c   : > { %v588_v40 = vadd.f32 %v808_v37, %v775_v48  ;;  %v579_v41 = vpop.f32.mrb[1].mxu0 }
 0x23d   : > { %v580_v49 = vadd.f32 %v775_v48, %v579_v41  ;;  %v809_v42 = vpop.f32.mrb[2].mxu0 }
 0x23e   : > { %v793_v43 = vpack.c.bf16 %v588_v40, %v588_v40  ;;  %v591_v44 = vadd.f32 %v809_v42, %v775_v48  ;;  %v582_v45 = vpop.f32.mrb[3].mxu0 }
 0x23f   : > { %v791_v46 = vpack.c.bf16 %v580_v49, %v580_v49  ;;  %v583_v47 = vadd.f32 %v775_v48, %v582_v45  ;;  %v812_v50 = vpop.f32.mrb[0].mxu1 }
 0x240   : > { %645 = vst.msk [vmem:[%s311_s13 + $0x8] sm:$0xf] %vm642_vm2, %v793_v43  ;;  %v794_v51 = vpack.c.bf16 %v591_v44, %v591_v44  ;;  %v604_v52 = vadd.f32 %v812_v50, %v775_v48  ;;  %v595_v53 = vpop.f32.mrb[1].mxu1 }
 0x241   : > { %643 = vst.msk [vmem:[%s311_s13] sm:$0xf] %vm642_vm2, %v791_v46  ;;  %v792_v54 = vpack.c.bf16 %v583_v47, %v583_v47  ;;  %v596_v55 = vadd.f32 %v775_v48, %v595_v53  ;;  %v813_v56 = vpop.f32.mrb[2].mxu1 }
 0x242   : > { %646 = vst.msk [vmem:[%s311_s13 + $0xc] sm:$0xf] %vm642_vm2, %v794_v51  ;;  %v797_v57 = vpack.c.bf16 %v604_v52, %v604_v52  ;;  %v607_v58 = vadd.f32 %v813_v56, %v775_v48  ;;  %v598_v59 = vpop.f32.mrb[3].mxu1 }
 0x243   : > { %644 = vst.msk [vmem:[%s311_s13 + $0x4] sm:$0xf] %vm642_vm2, %v792_v54  ;;  %v795_v60 = vpack.c.bf16 %v596_v55, %v596_v55  ;;  %v599_v61 = vadd.f32 %v775_v48, %v598_v59 }
 0x244   : > { %649 = vst.msk [vmem:[%s311_s13 + $0x18] sm:$0xf] %vm642_vm2, %v797_v57  ;;  %v798_v62 = vpack.c.bf16 %v607_v58, %v607_v58 }
 0x245   : > { %647 = vst.msk [vmem:[%s311_s13 + $0x10] sm:$0xf] %vm642_vm2, %v795_v60  ;;  %v796_v63 = vpack.c.bf16 %v599_v61, %v599_v61 }
 0x246   : > { %650 = vst.msk [vmem:[%s311_s13 + $0x1c] sm:$0xf] %vm642_vm2, %v798_v62 }
 0x247   : > { %648 = vst.msk [vmem:[%s311_s13 + $0x14] sm:$0xf] %vm642_vm2, %v796_v63 }
 0x248 PF: > { %s15_s20 = sadd.s32 1, %s895_s20   ;;  %s1074_s18 = smov %s891_s19 }
 0x249   : > { %p12_p5 = scmp.ge.s32.totalorder %s15_s20, 4   ;;  %s1075_s19 = smov %s1077_s21 }
 0x24b   :  { %14 = sbr.rel (!%p12_p5) target bundleno = 2 (0x2), region = 76 }

// kernel: cfb_fwd.18
= control target key start
LH: loop header
LB: loop body
LE: loop exit
PB: predicated region body
PF: predicated region fallthrough
CT: control target
= control target key end

     0   :  { %s927_s18 = smov 0   ;;  %s929_s19 = smov 0   ;;  %s1068_s0 = inlined_call_operand.vmem [shape: f32[128,16], index: 0, kind: input, shape index: {}]   ;;  %s1069_s1 = inlined_call_operand.vmem [shape: bf16[16,16], index: 1, kind: input, shape index: {}]   ;;  %s1070_s2 = inlined_call_operand.vmem [shape: f32[1,16], index: 2, kind: input, shape index: {}]   ;;  %s1071_s3 = inlined_call_operand.vmem [shape: f32[1,16], index: 3, kind: input, shape index: {}]   ;;  %s1072_s4 = inlined_call_operand.vmem [shape: f32[1,16], index: 4, kind: input, shape index: {}]   ;;  %s1073_s5 = inlined_call_operand.vmem [shape: bf16[128,16], index: 5, kind: output, shape index: {}]  }
   0x1   :  { %s931_s20 = smov 0  }
   0x2 LB: > { %s34_s21 = sadd.s32 1, %s891_s19  ;;  %p768_p0 = scmp.ge.s32.totalorder %s895_s20, 1  ;;  %s895_s20 = sphi %s931_s20, %s15_s20   ;;  %s891_s19 = sphi %s929_s19, %s1075_s19   ;;  %s887_s18 = sphi %s927_s18, %s1074_s18  }
   0x3   : > { %p36_p1 = scmp.ge.s32.totalorder %s34_s21, 2  ;;  %p238_p2 = scmp.lt.s32.totalorder %s895_s20, 3 }
   0x5   : > { %s1077_s21 = smov (%p36_p1, %s34_s21), 0  ;;  %p239_p3 = pnand %p768_p0, %p238_p2 }
   0x6   : > { %s769_s22 = sshll.u32 (!%p239_p3), %s887_s18, 3  ;;  %vm322_vm0 = vcmask (!%p239_p3), 130048   ;;  %v840_v56 = vld [vmem:[%s1069_s1] sm:$0xff] (!%p239_p3)  }
   0x7   : > { %242 = sbr.rel (%p239_p3) target bundleno = 584 (0x248), region = 40  ;;  %p284_p4 = scmp.lt.s32.totalorder (!%p239_p3), %s769_s22, 15  ;;  %804 = vmatprep.subr.bf16.mxu0 (!%p239_p3), %v840_v56  ;;  %814 = vmatprep.subr.bf16.mxu1 (!%p239_p3), %v840_v56 }
   0x8   : > { %805 = vmatpush3.bf16.msra.mxu0 (!%p239_p3), %v840_v56  ;;  %815 = vmatpush3.bf16.msra.mxu1 (!%p239_p3), %v840_v56 }
   0xe   : > { %s1079_s22 = smov (!%p284_p4, %s769_s22), 15 }
   0xf   : > { %s770_s23 = sshll.u32 %s1079_s22, 3  ;;  %s772_s10 = sshll.u32 %s1079_s22, 2 }
  0x10   : > { %s290_s26 = scalar_lea.vmem %s1068_s0, %s770_s23  ;;  %s311_s13 = scalar_lea.vmem %s1073_s5, %s772_s10 }
  0x11   : > { %v314_v0 = vld [vmem:[%s290_s26] sm:$0xff]  ;;  %v315_v2 = vld [vmem:[%s290_s26 + $0x8] sm:$0xff]  ;;  %v316_v8 = vld [vmem:[%s290_s26 + $0x10] sm:$0xff] }
  0x12   : > { %v318_v1 = vld [vmem:[%s290_s26 + $0x20] sm:$0xff]  ;;  %v323_v3 = vsel %vm322_vm0, %v314_v0, 0.0  ;;  %v319_v5 = vld [vmem:[%s290_s26 + $0x28] sm:$0xff]  ;;  %v326_v6 = vsel %vm322_vm0, %v315_v2, 0.0  ;;  %v317_v9 = vld [vmem:[%s290_s26 + $0x18] sm:$0xff]  ;;  %v329_v10 = vsel %vm322_vm0, %v316_v8, 0.0 }
  0x13   : > { %v335_v4 = vsel %vm322_vm0, %v318_v1, 0.0  ;;  %324 = vadd.xlane.f32.xlu0 %v323_v3  ;;  %v338_v7 = vsel %vm322_vm0, %v319_v5, 0.0  ;;  %v332_v11 = vsel %vm322_vm0, %v317_v9, 0.0  ;;  %v320_v12 = vld [vmem:[%s290_s26 + $0x30] sm:$0xff]  ;;  %v321_v13 = vld [vmem:[%s290_s26 + $0x38] sm:$0xff] }
  0x14   : > { %336 = vadd.xlane.f32.xlu1 %v335_v4  ;;  %v341_v14 = vsel %vm322_vm0, %v320_v12, 0.0  ;;  %v344_v15 = vsel %vm322_vm0, %v321_v13, 0.0 }
  0x17   : > { %327 = vadd.xlane.f32.xlu0 %v326_v6 }
  0x18   : > { %339 = vadd.xlane.f32.xlu1 %v338_v7 }
  0x1b   : > { %330 = vadd.xlane.f32.xlu0 %v329_v10 }
  0x1c   : > { %333 = vadd.xlane.f32.xlu1 %v332_v11 }
  0x1f   : > { %342 = vadd.xlane.f32.xlu0 %v341_v14 }
  0x20   : > { %345 = vadd.xlane.f32.xlu1 %v344_v15 }
  0xa0   : > { %v325_v16 = vpop.xlane.xlu0 %324 }
  0xa1   : > { %v337_v17 = vpop.xlane.xlu1 %336  ;;  %v348_v18 = vmul.f32 0.0625, %v325_v16 }
  0xa2   : > { %v352_v19 = vmul.f32 0.0625, %v337_v17 }
  0xa3   : > { %v959_v20 = vsub.f32 %v314_v0, %v348_v18 }
  0xa4   : > { %v961_v21 = vsub.f32 %v318_v1, %v352_v19  ;;  %v328_v22 = vpop.xlane.xlu0 %327 }
  0xa5   : > { %v340_v23 = vpop.xlane.xlu1 %339  ;;  %v349_v24 = vmul.f32 0.0625, %v328_v22  ;;  %v364_v26 = vmul.f32 %v959_v20, %v959_v20 }
  0xa6   : > { %v353_v25 = vmul.f32 0.0625, %v340_v23  ;;  %v368_v27 = vmul.f32 %v961_v21, %v961_v21 }
  0xa7   : > { %v967_v28 = vsub.f32 %v315_v2, %v349_v24  ;;  %v372_v30 = vsel %vm322_vm0, %v364_v26, 0.0 }
  0xa8   : > { %v969_v29 = vsub.f32 %v319_v5, %v353_v25  ;;  %373 = vadd.xlane.f32.xlu0 %v372_v30  ;;  %v331_v31 = vpop.xlane.xlu0 %330  ;;  %v384_v33 = vsel %vm322_vm0, %v368_v27, 0.0 }
  0xa9   : > { %v334_v32 = vpop.xlane.xlu1 %333  ;;  %v350_v34 = vmul.f32 0.0625, %v331_v31  ;;  %v365_v36 = vmul.f32 %v967_v28, %v967_v28 }
  0xaa   : > { %v351_v35 = vmul.f32 0.0625, %v334_v32  ;;  %v369_v37 = vmul.f32 %v969_v29, %v969_v29 }
  0xab   : > { %v977_v38 = vsub.f32 %v316_v8, %v350_v34  ;;  %v375_v40 = vsel %vm322_vm0, %v365_v36, 0.0 }
  0xac   : > { %v979_v39 = vsub.f32 %v317_v9, %v351_v35  ;;  %385 = vadd.xlane.f32.xlu0 %v384_v33  ;;  %376 = vadd.xlane.f32.xlu1 %v375_v40  ;;  %v343_v41 = vpop.xlane.xlu0 %342  ;;  %v387_v43 = vsel %vm322_vm0, %v369_v37, 0.0 }
  0xad   : > { %v346_v42 = vpop.xlane.xlu1 %345  ;;  %v354_v44 = vmul.f32 0.0625, %v343_v41  ;;  %v366_v46 = vmul.f32 %v977_v38, %v977_v38 }
  0xae   : > { %v355_v45 = vmul.f32 0.0625, %v346_v42  ;;  %v367_v47 = vmul.f32 %v979_v39, %v979_v39 }
  0xaf   : > { %v987_v48 = vsub.f32 %v320_v12, %v354_v44  ;;  %v378_v50 = vsel %vm322_vm0, %v366_v46, 0.0 }
  0xb0   : > { %v989_v49 = vsub.f32 %v321_v13, %v355_v45  ;;  %388 = vadd.xlane.f32.xlu1 %v387_v43  ;;  %379 = vadd.xlane.f32.xlu0 %v378_v50  ;;  %v381_v51 = vsel %vm322_vm0, %v367_v47, 0.0 }
  0xb1   : > { %v370_v52 = vmul.f32 %v987_v48, %v987_v48 }
  0xb2   : > { %v371_v53 = vmul.f32 %v989_v49, %v989_v49 }
  0xb3   : > { %v390_v54 = vsel %vm322_vm0, %v370_v52, 0.0 }
  0xb4   : > { %382 = vadd.xlane.f32.xlu1 %v381_v51  ;;  %391 = vadd.xlane.f32.xlu0 %v390_v54  ;;  %v393_v55 = vsel %vm322_vm0, %v371_v53, 0.0 }
  0xb8   : > { %394 = vadd.xlane.f32.xlu1 %v393_v55 }
 0x135   : > { %v374_v57 = vpop.xlane.xlu0 %373 }
 0x136   : > { %v396_v58 = vmul.f32 0.0625, %v374_v57 }
 0x138   : > { %841 = vrsqrt.f32 %v396_v58  ;;  %vm406_vm1 = vcmp.eq.f32.partialorder %v396_v58, inf  ;;  %v409_v9 = vand.u32 2147483648, %v396_v58  ;;  %vm408_vm2 = vcmp.eq.f32.partialorder %v396_v58, 0.0 }
 0x139   : > { %v377_v59 = vpop.xlane.xlu1 %376  ;;  %v386_v60 = vpop.xlane.xlu0 %385 }
 0x13a   : > { %v397_v61 = vmul.f32 0.0625, %v377_v59  ;;  %v400_v62 = vmul.f32 0.0625, %v386_v60 }
 0x13c   : > { %843 = vrsqrt.f32 %v397_v61  ;;  %vm413_vm3 = vcmp.eq.f32.partialorder %v397_v61, inf  ;;  %vm415_vm4 = vcmp.eq.f32.partialorder %v397_v61, 0.0  ;;  %v416_v18 = vand.u32 2147483648, %v397_v61 }
 0x13d   : > { %845 = vrsqrt.f32 %v400_v62  ;;  %v389_v63 = vpop.xlane.xlu1 %388  ;;  %v380_v0 = vpop.xlane.xlu0 %379  ;;  %vm434_vm5 = vcmp.eq.f32.partialorder %v400_v62, inf  ;;  %v437_v23 = vand.u32 2147483648, %v400_v62  ;;  %vm436_vm6 = vcmp.eq.f32.partialorder %v400_v62, 0.0 }
 0x13e   : > { %v401_v1 = vmul.f32 0.0625, %v389_v63  ;;  %v398_v2 = vmul.f32 0.0625, %v380_v0 }
 0x140   : > { %847 = vrsqrt.f32 %v401_v1  ;;  %vm441_vm7 = vcmp.eq.f32.partialorder %v401_v1, inf  ;;  %vm443_vm8 = vcmp.eq.f32.partialorder %v401_v1, 0.0  ;;  %v444_v33 = vand.u32 2147483648, %v401_v1 }
 0x141   : > { %849 = vrsqrt.f32 %v398_v2  ;;  %v383_v3 = vpop.xlane.xlu1 %382  ;;  %v392_v4 = vpop.xlane.xlu0 %391  ;;  %vm420_vm9 = vcmp.eq.f32.partialorder %v398_v2, inf  ;;  %v423_v37 = vand.u32 2147483648, %v398_v2  ;;  %vm422_vm10 = vcmp.eq.f32.partialorder %v398_v2, 0.0 }
 0x142   : > { %v842_v5 = vpop.eup %841  ;;  %v1002_v6 = vmul.f32 0.0625, %v383_v3  ;;  %v1004_v7 = vmul.f32 0.0625, %v392_v4 }
 0x143   : > { %v405_v8 = vmul.f32 %v842_v5, %v396_v58 }
 0x144   : > { %851 = vrsqrt.f32 %v1002_v6  ;;  %vm427_vm11 = vcmp.eq.f32.partialorder %v1002_v6, inf  ;;  %vm429_vm12 = vcmp.eq.f32.partialorder %v1002_v6, 0.0  ;;  %v430_v50 = vand.u32 2147483648, %v1002_v6 }
 0x145   : > { %v407_v10 = vsel %vm406_vm1, %v396_v58, %v405_v8  ;;  %853 = vrsqrt.f32 %v1004_v7  ;;  %v395_v11 = vpop.xlane.xlu1 %394  ;;  %vm448_vm13 = vcmp.eq.f32.partialorder %v1004_v7, inf  ;;  %v451_v53 = vand.u32 2147483648, %v1004_v7 }
 0x146   : > { %v844_v12 = vpop.eup %843  ;;  %v1008_v13 = vmul.f32 0.0625, %v395_v11  ;;  %v410_v14 = vsel %vm408_vm2, %v409_v9, %v407_v10  ;;  %vm450_vm14 = vcmp.eq.f32.partialorder %v1004_v7, 0.0  ;;  %vm642_vm2 = vcmask 125952  }
 0x147   : > { %v846_v15 = vpop.eup %845  ;;  %v412_v16 = vmul.f32 %v844_v12, %v397_v61  ;;  %v460_v17 = vadd.f32 1e-05, %v410_v14 }
 0x148   : > { %v433_v19 = vmul.f32 %v846_v15, %v400_v62  ;;  %855 = vrsqrt.f32 %v1008_v13  ;;  %vm455_vm15 = vcmp.eq.f32.partialorder %v1008_v13, inf  ;;  %vm457_vm1 = vcmp.eq.f32.partialorder %v1008_v13, 0.0 }
 0x149   : > { %v414_v22 = vsel %vm413_vm3, %v397_v61, %v412_v16  ;;  %857 = vrcp.f32 %v460_v17 }
 0x14a   : > { %v848_v24 = vpop.eup %847  ;;  %v435_v25 = vsel %vm434_vm5, %v400_v62, %v433_v19  ;;  %v417_v26 = vsel %vm415_vm4, %v416_v18, %v414_v22  ;;  %v458_v62 = vand.u32 2147483648, %v1008_v13 }
 0x14b   : > { %v850_v27 = vpop.eup %849  ;;  %v440_v30 = vmul.f32 %v848_v24, %v401_v1  ;;  %v461_v31 = vadd.f32 1e-05, %v417_v26  ;;  %v438_v32 = vsel %vm436_vm6, %v437_v23, %v435_v25 }
 0x14c   : > { %v419_v34 = vmul.f32 %v850_v27, %v398_v2  ;;  %v464_v35 = vadd.f32 1e-05, %v438_v32 }
 0x14d   : > { %v442_v36 = vsel %vm441_vm7, %v401_v1, %v440_v30  ;;  %859 = vrcp.f32 %v461_v31  ;;  %v773_v1 = vld [vmem:[%s1071_s3] ss:$0 sm:$0xff] }
 0x14e   : > { %v852_v40 = vpop.eup %851  ;;  %v421_v41 = vsel %vm420_vm9, %v398_v2, %v419_v34  ;;  %v445_v42 = vsel %vm443_vm8, %v444_v33, %v442_v36  ;;  %861 = vrcp.f32 %v464_v35 }
 0x14f   : > { %v854_v43 = vpop.eup %853  ;;  %v424_v44 = vsel %vm422_vm10, %v423_v37, %v421_v41  ;;  %v426_v45 = vmul.f32 %v852_v40, %v1002_v6  ;;  %v465_v46 = vadd.f32 1e-05, %v445_v42 }
 0x150   : > { %v462_v47 = vadd.f32 1e-05, %v424_v44  ;;  %v447_v51 = vmul.f32 %v854_v43, %v1004_v7 }
 0x151   : > { %v428_v52 = vsel %vm427_vm11, %v1002_v6, %v426_v45  ;;  %863 = vrcp.f32 %v465_v46 }
 0x152   : > { %v856_v54 = vpop.eup %855  ;;  %865 = vrcp.f32 %v462_v47  ;;  %v431_v55 = vsel %vm429_vm12, %v430_v50, %v428_v52  ;;  %v449_v56 = vsel %vm448_vm13, %v1004_v7, %v447_v51 }
 0x153   : > { %v858_v57 = vpop.eup %857  ;;  %v463_v58 = vadd.f32 1e-05, %v431_v55  ;;  %v452_v59 = vsel %vm450_vm14, %v451_v53, %v449_v56  ;;  %v454_v60 = vmul.f32 %v856_v54, %v1008_v13 }
 0x154   : > { %v466_v61 = vadd.f32 1e-05, %v452_v59  ;;  %v469_v63 = vmul.f32 %v858_v57, %v959_v20  ;;  %v774_v20 = vld [vmem:[%s1072_s4] ss:$0 sm:$0xff] }
 0x155   : > { %867 = vrcp.f32 %v463_v58  ;;  %v456_v0 = vsel %vm455_vm15, %v1008_v13, %v454_v60 }
 0x156   : > { %869 = vrcp.f32 %v466_v61  ;;  %v459_v2 = vsel %vm457_vm1, %v458_v62, %v456_v0  ;;  %v491_v7 = vmul.f32 %v773_v1, %v469_v63 }
 0x157   : > { %v860_v3 = vpop.eup %859  ;;  %v467_v4 = vadd.f32 1e-05, %v459_v2 }
 0x158   : > { %v862_v5 = vpop.eup %861  ;;  %v471_v6 = vmul.f32 %v860_v3, %v967_v28  ;;  %v506_v12 = vadd.f32 %v774_v20, %v491_v7 }
 0x159   : > { %871 = vrcp.f32 %v467_v4  ;;  %v477_v8 = vmul.f32 %v862_v5, %v961_v21 }
 0x15a   : > { %v492_v9 = vmul.f32 %v773_v1, %v471_v6 }
 0x15b   : > { %v864_v10 = vpop.eup %863  ;;  %v495_v15 = vmul.f32 %v773_v1, %v477_v8 }
 0x15c   : > { %v866_v11 = vpop.eup %865  ;;  %v507_v13 = vadd.f32 %v774_v20, %v492_v9  ;;  %v479_v14 = vmul.f32 %v864_v10, %v969_v29 }
 0x15d   : > { %v473_v16 = vmul.f32 %v866_v11, %v977_v38  ;;  %v510_v22 = vadd.f32 %v774_v20, %v495_v15 }
 0x15e   : > { %v514_v17 = vpack.c.bf16 %v507_v13, %v506_v12  ;;  %v496_v28 = vmul.f32 %v773_v1, %v479_v14 }
 0x15f   : > { %v868_v18 = vpop.eup %867  ;;  %v493_v24 = vmul.f32 %v773_v1, %v473_v16 }
 0x160   : > { %v870_v19 = vpop.eup %869  ;;  %806 = vmatprep.mubr.msk.bf16.mxu0 %vm322_vm0, %v514_v17  ;;  %v511_v23 = vadd.f32 %v774_v20, %v496_v28  ;;  %v475_v21 = vmul.f32 %v868_v18, %v979_v39 }
 0x161   : > { %v481_v25 = vmul.f32 %v870_v19, %v987_v48  ;;  %v508_v38 = vadd.f32 %v774_v20, %v493_v24  ;;  %v775_v48 = vld [vmem:[%s1070_s2] ss:$0 sm:$0xff] }
 0x162   : > { %v516_v26 = vpack.c.bf16 %v511_v23, %v510_v22  ;;  %v494_v27 = vmul.f32 %v773_v1, %v475_v21 }
 0x163   : > { %v872_v29 = vpop.eup %871  ;;  %v497_v32 = vmul.f32 %v773_v1, %v481_v25 }
 0x164   : > { %810 = vmatprep.mubr.msk.bf16.mxu1 %vm322_vm0, %v516_v26  ;;  %v509_v30 = vadd.f32 %v774_v20, %v494_v27  ;;  %v483_v31 = vmul.f32 %v872_v29, %v989_v49 }
 0x165   : > { %v512_v35 = vadd.f32 %v774_v20, %v497_v32 }
 0x166   : > { %v515_v33 = vpack.c.bf16 %v509_v30, %v508_v38  ;;  %v498_v34 = vmul.f32 %v773_v1, %v483_v31 }
 0x168   : > { %807 = vmatmul.mubr.msk.bf16.vlgmr.msra.gmra.mrb[0].mxu0 %vm322_vm0, %v515_v33  ;;  %v513_v39 = vadd.f32 %v774_v20, %v498_v34 }
 0x16a   : > { %v517_v36 = vpack.c.bf16 %v513_v39, %v512_v35 }
 0x16c   : > { %811 = vmatmul.mubr.msk.bf16.vlgmr.msra.gmra.mrb[0].mxu1 %vm322_vm0, %v517_v36 }
 0x23b   : > { %v808_v37 = vpop.f32.mrb[0].mxu0 }
 0x23c   : > { %v588_v40 = vadd.f32 %v808_v37, %v775_v48  ;;  %v579_v41 = vpop.f32.mrb[1].mxu0 }
 0x23d   : > { %v580_v49 = vadd.f32 %v775_v48, %v579_v41  ;;  %v809_v42 = vpop.f32.mrb[2].mxu0 }
 0x23e   : > { %v793_v43 = vpack.c.bf16 %v588_v40, %v588_v40  ;;  %v591_v44 = vadd.f32 %v809_v42, %v775_v48  ;;  %v582_v45 = vpop.f32.mrb[3].mxu0 }
 0x23f   : > { %v791_v46 = vpack.c.bf16 %v580_v49, %v580_v49  ;;  %v583_v47 = vadd.f32 %v775_v48, %v582_v45  ;;  %v812_v50 = vpop.f32.mrb[0].mxu1 }
 0x240   : > { %645 = vst.msk [vmem:[%s311_s13 + $0x8] sm:$0xf] %vm642_vm2, %v793_v43  ;;  %v794_v51 = vpack.c.bf16 %v591_v44, %v591_v44  ;;  %v604_v52 = vadd.f32 %v812_v50, %v775_v48  ;;  %v595_v53 = vpop.f32.mrb[1].mxu1 }
 0x241   : > { %643 = vst.msk [vmem:[%s311_s13] sm:$0xf] %vm642_vm2, %v791_v46  ;;  %v792_v54 = vpack.c.bf16 %v583_v47, %v583_v47  ;;  %v596_v55 = vadd.f32 %v775_v48, %v595_v53  ;;  %v813_v56 = vpop.f32.mrb[2].mxu1 }
 0x242   : > { %646 = vst.msk [vmem:[%s311_s13 + $0xc] sm:$0xf] %vm642_vm2, %v794_v51  ;;  %v797_v57 = vpack.c.bf16 %v604_v52, %v604_v52  ;;  %v607_v58 = vadd.f32 %v813_v56, %v775_v48  ;;  %v598_v59 = vpop.f32.mrb[3].mxu1 }
 0x243   : > { %644 = vst.msk [vmem:[%s311_s13 + $0x4] sm:$0xf] %vm642_vm2, %v792_v54  ;;  %v795_v60 = vpack.c.bf16 %v596_v55, %v596_v55  ;;  %v599_v61 = vadd.f32 %v775_v48, %v598_v59 }
 0x244   : > { %649 = vst.msk [vmem:[%s311_s13 + $0x18] sm:$0xf] %vm642_vm2, %v797_v57  ;;  %v798_v62 = vpack.c.bf16 %v607_v58, %v607_v58 }
 0x245   : > { %647 = vst.msk [vmem:[%s311_s13 + $0x10] sm:$0xf] %vm642_vm2, %v795_v60  ;;  %v796_v63 = vpack.c.bf16 %v599_v61, %v599_v61 }
 0x246   : > { %650 = vst.msk [vmem:[%s311_s13 + $0x1c] sm:$0xf] %vm642_vm2, %v798_v62 }
 0x247   : > { %648 = vst.msk [vmem:[%s311_s13 + $0x14] sm:$0xf] %vm642_vm2, %v796_v63 }
 0x248 PF: > { %s15_s20 = sadd.s32 1, %s895_s20   ;;  %s1074_s18 = smov %s891_s19 }
 0x249   : > { %p12_p5 = scmp.ge.s32.totalorder %s15_s20, 4   ;;  %s1075_s19 = smov %s1077_s21 }
 0x24b   :  { %14 = sbr.rel (!%p12_p5) target bundleno = 2 (0x2), region = 76 }

// kernel: cfb_fwd.16
= control target key start
LH: loop header
LB: loop body
LE: loop exit
PB: predicated region body
PF: predicated region fallthrough
CT: control target
= control target key end

     0   :  { %s1144_s6 = smov 0   ;;  %s1146_s7 = smov 0   ;;  %s1310_s0 = inlined_call_operand.vmem [shape: bf16[2,8,8,48], index: 0, kind: input, shape index: {}]   ;;  %s1311_s1 = inlined_call_operand.vmem [shape: bf16[2,8,8,16], index: 1, kind: output, shape index: {}]  }
   0x1   :  { %s1148_s8 = smov 0   ;;  %s1150_s9 = smov 0  }
   0x2   :  { %s1152_s10 = smov 0  }
   0x3 LB: > { %s20_s11 = sadd.s32 1, %s1115_s8  ;;  %s23_s12 = sadd.s32 1, %s1119_s9  ;;  %s1123_s10 = sphi %s1152_s10, %s11_s10   ;;  %s1119_s9 = sphi %s1150_s9, %s1315_s9   ;;  %s1115_s8 = sphi %s1148_s8, %s1314_s8   ;;  %s1111_s7 = sphi %s1146_s7, %s1313_s7   ;;  %s1107_s6 = sphi %s1144_s6, %s1312_s6  }
   0x4   : > { %p21_p0 = scmp.ge.s32.totalorder %s20_s11, 2  ;;  %p917_p1 = scmp.ge.s32.totalorder %s1123_s10, 1 }
   0x5   : > { %p108_p2 = scmp.lt.s32.totalorder %s1123_s10, 5 }
   0x6   : > { %s1317_s11 = smov (%p21_p0, %s20_s11), 0  ;;  %s1319_s12 = smov (!%p21_p0, %s23_s12), %s1119_s9 }
   0x7   : > { %p109_p3 = pnand %p917_p1, %p108_p2  ;;  %p25_p4 = scmp.ge.s32.totalorder %s1319_s12, 2 }
   0x8   : > { %s918_s13 = sshll.u32 (!%p109_p3), %s1107_s6, 2  ;;  %p137_p5 = scmp.lt.s32.totalorder (!%p109_p3), %s1111_s7, 1  ;;  %v170_v0 = vlaneseq (!%p109_p3)  ;;  %v1125_v1 = vmov (!%p109_p3), 1983009808   ;;  %v1126_v5 = vmov (!%p109_p3), 0.0   ;;  %vm1127_vm0 = vmmov (!%p109_p3), 0  }
   0x9   : > { %s1321_s12 = smov (%p25_p4, %s1319_s12), 0  ;;  %112 = sbr.rel (%p109_p3) target bundleno = 1318 (0x526), region = 24 }
   0xa   : > { %p139_p6 = scmp.lt.s32.totalorder (!%p109_p3), %s918_s13, 7  ;;  %v168_v2 = vunpack.c.l.s4 (!%p109_p3), %v1125_v1  ;;  %v171_v4 = vshrl.u32 (!%p109_p3), %v170_v0, 7  ;;  %954 = vmatprep.subr.bf16.mxu0 (!%p109_p3), %v1126_v5  ;;  %960 = vmatprep.subr.bf16.mxu1 (!%p109_p3), %v1126_v5  ;;  %s1128_s20 = smov (!%p109_p3), 112   ;;  %vm184_vm1 = vcmask (!%p109_p3), 64512   ;;  %vm234_vm2 = vcmask (!%p109_p3), 130048  }
   0xb   : > { %956 = vmatprep.mubr.msk.bf16.mxu0 (!%p109_p3), %vm1127_vm0, %v1126_v5  ;;  %962 = vmatprep.mubr.msk.bf16.mxu1 (!%p109_p3), %vm1127_vm0, %v1126_v5  ;;  %s1129_s21 = smov (!%p109_p3), 96   ;;  %s1130_s22 = smov (!%p109_p3), 104   ;;  %vm458_vm3 = vcmask (!%p109_p3), 123904   ;;  %vm818_vm4 = vcmask (!%p109_p3), 125954  }
   0xc   : > { %v169_v3 = vunpack.c.0.s8 (!%p109_p3), %v168_v2  ;;  %s1131_s23 = smov (!%p109_p3), 120   ;;  %s1132_s24 = smov (!%p109_p3), 88  }
   0xd   : > { %s1133_s25 = smov (!%p109_p3), 8  }
   0xe   : > { %v1188_v6 = vsub.s32 (!%p109_p3), %v169_v3, %v171_v4 }
  0x10   : > { %s1323_s7 = smov (!%p137_p5, %s1111_s7), 1  ;;  %s1325_s13 = smov (!%p139_p6, %s918_s13), 7 }
  0x11   : > { %s919_s14 = sshll.u32 %s1323_s7, 3 }
  0x12   : > { %s1176_s15 = sadd.s32 %s919_s14, %s1325_s13 }
  0x13   : > { %s920_s16 = sshll.u32 %s1176_s15, 2 }
  0x14   : > { %s144_s19 = scalar_lea.vmem %s1310_s0, %s920_s16  ;;  %s154_s28 = scalar_lea.vmem %s1311_s1, %s920_s16 }
  0x15   : > { %v157_v7 = vld [vmem:[%s144_s19] sm:$0xf]  ;;  %v158_v8 = vld [vmem:[%s144_s19 + $0x4] sm:$0xf]  ;;  %v159_v9 = vld [vmem:[%s144_s19 + $0x8] sm:$0xf] }
  0x16   : > { %v160_v10 = vld [vmem:[%s144_s19 + $0xc] sm:$0xf]  ;;  %v165_v11 = vcombine.low %v157_v7, %v158_v8  ;;  %v469_v27 = vrot.slane %v157_v7, %v1188_v6  ;;  %v477_v28 = vrot.slane %v158_v8, %v1188_v6  ;;  %v485_v29 = vrot.slane %v159_v9, %v1188_v6 }
  0x17   : > { %v166_v12 = vcombine.low %v159_v9, %v160_v10  ;;  %v493_v30 = vrot.slane %v160_v10, %v1188_v6 }
  0x18   : > { %v173_v13 = vrot.slane %v165_v11, %v1188_v6  ;;  %v928_v31 = vcombine.high %v469_v27, %v477_v28 }
  0x19   : > { %v180_v14 = vrot.slane %v166_v12, %v1188_v6  ;;  %v929_v32 = vcombine.high %v485_v29, %v493_v30 }
  0x1a   : > { %v503_v33 = vrot.slane %v928_v31, %v1188_v6 }
  0x1b   : > { %v1192_v15 = vcombine.low %v173_v13, %v180_v14  ;;  %v510_v34 = vrot.slane %v929_v32, %v1188_v6 }
  0x1d   : > { %182 = vrot.lane.b32.xlu0 %v1192_v15, %s1128_s20  ;;  %254 = vrot.lane.b32.xlu1 %v1192_v15, %s1129_s21  ;;  %v1216_v35 = vcombine.low %v503_v33, %v510_v34 }
  0x21   : > { %308 = vrot.lane.b32.xlu1 %v1192_v15, %s1130_s22 }
  0x8f   : > { %v183_v16 = vpop.permute.xlu0 %182  ;;  %v255_v18 = vpop.permute.xlu1 %254 }
  0x90   : > { %v189_v17 = vsel %vm184_vm1, %v183_v16, 0  ;;  %961 = vmatpush3.bf16.msra.mxu1 %v255_v18 }
  0x91   : > { %955 = vmatpush3.bf16.xpose.msra.mxu0 %v189_v17  ;;  %966 = vmatprep.subr.bf16.mxu1 %v1126_v5 }
  0x92   : > { %972 = vmatprep.subr.bf16.mxu0 %v1126_v5 }
  0x93   : > { %v309_v36 = vpop.permute.xlu1 %308 }
  0x94   : > { %v314_v47 = vsel %vm184_vm1, %v309_v36, 0 }
  0x98   : > { %957 = vmatmul.mubr.msk.bf16.vlgmr.msra.gmra.mrb[0].mxu0 %vm184_vm1, %v1192_v15 }
  0x99   : > { %974 = vmatprep.mubr.msk.bf16.mxu0 %vm1127_vm0, %v1126_v5 }
 0x16b   : > { %v225_v19 = vpop.f32.mrb[0].mxu0 }
 0x16c   : > { %v232_v20 = vmul.f32 0.35355338, %v225_v19  ;;  %v958_v21 = vpop.f32.mrb[1].mxu0 }
 0x16d   : > { %v228_v22 = vpop.f32.mrb[2].mxu0 }
 0x16e   : > { %v233_v23 = vmul.f32 0.35355338, %v228_v22  ;;  %v959_v24 = vpop.f32.mrb[3].mxu0  ;;  %v235_v25 = vsel %vm234_vm2, %v232_v20, -inf }
 0x16f   : > { %236 = vmax.xlane.f32.xlu0 %v235_v25 }
 0x170   : > { %v238_v26 = vsel %vm234_vm2, %v233_v23, -inf }
 0x171   : > { %239 = vmax.xlane.f32.xlu1 %v238_v26 }
 0x182   : > { %306 = vrot.lane.b32.xlu1 %v1192_v15, %s1131_s23 }
 0x185   : > { %634 = vrot.lane.b32.xlu0 %v1216_v35, %s1131_s23 }
 0x186   : > { %512 = vrot.lane.b32.xlu1 %v1216_v35, %s1128_s20 }
 0x18a   : > { %636 = vrot.lane.b32.xlu1 %v1216_v35, %s1130_s22 }
 0x1fc   : > { %v237_v37 = vpop.xlane.xlu0 %236 }
 0x1fd   : > { %v241_v38 = vsub.f32 %v232_v20, %v237_v37 }
 0x1fe   : > { %v240_v39 = vpop.xlane.xlu1 %239 }
 0x1ff   : > { %v243_v40 = vmul.f32 1.442695, %v241_v38  ;;  %v242_v41 = vsub.f32 %v233_v23, %v240_v39 }
 0x200   : > { %v635_v52 = vpop.permute.xlu0 %634 }
 0x201   : > { %v245_v42 = vmul.f32 1.442695, %v242_v41  ;;  %1053 = vpow2.f32 %v243_v40 }
 0x202   : > { %v307_v46 = vpop.permute.xlu1 %306 }
 0x203   : > { %1055 = vpow2.f32 %v245_v42 }
 0x206   : > { %v513_v48 = vpop.permute.xlu1 %512 }
 0x207   : > { %v518_v49 = vsel %vm184_vm1, %v513_v48, 0 }
 0x20a   : > { %v637_v50 = vpop.permute.xlu1 %636 }
 0x20b   : > { %v1223_v43 = vpop.eup %1053  ;;  %v642_v51 = vsel %vm184_vm1, %v637_v50, 0 }
 0x20d   : > { %v1225_v44 = vpop.eup %1055 }
 0x20e   : > { %v253_v45 = vpack.c.bf16 %v1225_v44, %v1223_v43 }
 0x210   : > { %963 = vmatmul.mubr.msk.bf16.vlgmr.msra.gmra.mrb[0].mxu1 %vm234_vm2, %v253_v45 }
 0x211   : > { %967 = vmatpush3.bf16.xpose.msra.mxu1 %v314_v47  ;;  %968 = vmatprep.mubr.msk.bf16.mxu1 %vm1127_vm0, %v1126_v5 }
 0x212   : > { %978 = vmatprep.subr.bf16.mxu1 %v1126_v5 }
 0x218   : > { %969 = vmatmul.mubr.msk.bf16.vlgmr.msra.gmra.mrb[4].mxu1 %vm184_vm1, %v307_v46 }
 0x219   : > { %979 = vmatpush3.bf16.xpose.msra.mxu1 %v518_v49  ;;  %980 = vmatprep.mubr.msk.bf16.mxu1 %vm1127_vm0, %v1126_v5 }
 0x21a   : > { %990 = vmatprep.subr.bf16.mxu1 %v1126_v5 }
 0x220   : > { %981 = vmatmul.mubr.msk.bf16.vlgmr.msra.gmra.mrb[8].mxu1 %vm184_vm1, %v1216_v35 }
 0x221   : > { %991 = vmatpush3.bf16.xpose.msra.mxu1 %v642_v51  ;;  %992 = vmatprep.mubr.msk.bf16.mxu1 %vm1127_vm0, %v1126_v5 }
 0x228   : > { %993 = vmatmul.mubr.msk.bf16.vlgmr.msra.gmra.mrb[12].mxu1 %vm184_vm1, %v635_v52 }
 0x2e3   : > { %v1245_v53 = vpop.f32.mrb[0].mxu1 }
 0x2e4   : > { %v964_v54 = vpop.f32.mrb[1].mxu1 }
 0x2e5   : > { %v1247_v55 = vpop.f32.mrb[2].mxu1 }
 0x2e6   : > { %v965_v56 = vpop.f32.mrb[3].mxu1 }
 0x2eb   : > { %v350_v57 = vpop.f32.mrb[4].mxu1 }
 0x2ec   : > { %v357_v58 = vmul.f32 0.35355338, %v350_v57  ;;  %v970_v59 = vpop.f32.mrb[5].mxu1 }
 0x2ed   : > { %v353_v60 = vpop.f32.mrb[6].mxu1  ;;  %v250_v59 = vsel %vm234_vm2, %v1225_v44, 0.0 }
 0x2ee   : > { %v358_v61 = vmul.f32 0.35355338, %v353_v60  ;;  %v971_v62 = vpop.f32.mrb[7].mxu1  ;;  %v359_v63 = vsel %vm234_vm2, %v357_v58, -inf }
 0x2ef   : > { %360 = vmax.xlane.f32.xlu1 %v359_v63 }
 0x2f0   : > { %v362_v0 = vsel %vm234_vm2, %v358_v61, -inf }
 0x2f1   : > { %363 = vmax.xlane.f32.xlu0 %v362_v0 }
 0x2f3   : > { %v554_v1 = vpop.f32.mrb[8].mxu1 }
 0x2f4   : > { %v982_v2 = vpop.f32.mrb[9].mxu1  ;;  %v561_v11 = vmul.f32 0.35355338, %v554_v1 }
 0x2f5   : > { %v557_v3 = vpop.f32.mrb[10].mxu1 }
 0x2f6   : > { %v983_v4 = vpop.f32.mrb[11].mxu1  ;;  %v563_v12 = vsel %vm234_vm2, %v561_v11, -inf  ;;  %v562_v13 = vmul.f32 0.35355338, %v557_v3 }
 0x2f8   : > { %v566_v16 = vsel %vm234_vm2, %v562_v13, -inf }
 0x2fb   : > { %v678_v7 = vpop.f32.mrb[12].mxu1 }
 0x2fc   : > { %v994_v8 = vpop.f32.mrb[13].mxu1  ;;  %v685_v14 = vmul.f32 0.35355338, %v678_v7 }
 0x2fd   : > { %v681_v9 = vpop.f32.mrb[14].mxu1 }
 0x2fe   : > { %v995_v10 = vpop.f32.mrb[15].mxu1  ;;  %v687_v17 = vsel %vm234_vm2, %v685_v14, -inf  ;;  %v686_v18 = vmul.f32 0.35355338, %v681_v9 }
 0x300   : > { %582 = vrot.lane.b32.xlu1 %v1216_v35, %s1129_s21  ;;  %v690_v19 = vsel %vm234_vm2, %v686_v18, -inf }
 0x307   : > { %378 = vrot.lane.b32.xlu0 %v1192_v15, %s1132_s24 }
 0x324   : > { %564 = vmax.xlane.f32.xlu1 %v563_v12 }
 0x328   : > { %567 = vmax.xlane.f32.xlu1 %v566_v16 }
 0x32c   : > { %688 = vmax.xlane.f32.xlu1 %v687_v17 }
 0x330   : > { %691 = vmax.xlane.f32.xlu1 %v690_v19 }
 0x341   : > { %706 = vrot.lane.b32.xlu1 %v1216_v35, %s1132_s24 }
 0x37c   : > { %v361_v20 = vpop.xlane.xlu1 %360 }
 0x37d   : > { %v365_v15 = vsub.f32 %v357_v58, %v361_v20  ;;  %v247_v58 = vsel %vm234_vm2, %v1223_v43, 0.0 }
 0x37e   : > { %v364_v21 = vpop.xlane.xlu0 %363 }
 0x37f   : > { %v367_v22 = vmul.f32 1.442695, %v365_v15  ;;  %v366_v23 = vsub.f32 %v358_v61, %v364_v21 }
 0x380   : > { %v583_v29 = vpop.permute.xlu1 %582 }
 0x381   : > { %v369_v24 = vmul.f32 1.442695, %v366_v23  ;;  %1057 = vpow2.f32 %v367_v22 }
 0x382   : > { %v379_v25 = vpop.permute.xlu0 %378 }
 0x383   : > { %1059 = vpow2.f32 %v369_v24  ;;  %973 = vmatpush3.bf16.msra.mxu0 %v379_v25 }
 0x384   : > { %984 = vmatprep.subr.bf16.mxu0 %v1126_v5 }
 0x38b   : > { %v1058_v26 = vpop.eup %1057 }
 0x38c   : > { %v371_v51 = vsel %vm234_vm2, %v1058_v26, 0.0 }
 0x38d   : > { %v1060_v27 = vpop.eup %1059 }
 0x38e   : > { %v377_v28 = vpack.c.bf16 %v1060_v27, %v1058_v26  ;;  %v374_v56 = vsel %vm234_vm2, %v1060_v27, 0.0 }
 0x390   : > { %975 = vmatmul.mubr.msk.bf16.vlgmr.msra.gmra.mrb[4].mxu0 %vm234_vm2, %v377_v28 }
 0x391   : > { %985 = vmatpush3.bf16.msra.mxu0 %v583_v29  ;;  %986 = vmatprep.mubr.msk.bf16.mxu0 %vm1127_vm0, %v1126_v5 }
 0x392   : > { %996 = vmatprep.subr.bf16.mxu0 %v1126_v5 }
 0x3b1   : > { %v565_v30 = vpop.xlane.xlu1 %564 }
 0x3b2   : > { %v569_v31 = vsub.f32 %v561_v11, %v565_v30 }
 0x3b4   : > { %v571_v32 = vmul.f32 1.442695, %v569_v31 }
 0x3b5   : > { %v568_v33 = vpop.xlane.xlu1 %567 }
 0x3b6   : > { %v570_v34 = vsub.f32 %v562_v13, %v568_v33  ;;  %1061 = vpow2.f32 %v571_v32 }
 0x3b8   : > { %v573_v35 = vmul.f32 1.442695, %v570_v34 }
 0x3b9   : > { %v689_v36 = vpop.xlane.xlu1 %688 }
 0x3ba   : > { %1063 = vpow2.f32 %v573_v35  ;;  %v693_v37 = vsub.f32 %v685_v14, %v689_v36 }
 0x3bc   : > { %v695_v38 = vmul.f32 1.442695, %v693_v37 }
 0x3bd   : > { %v692_v39 = vpop.xlane.xlu1 %691 }
 0x3be   : > { %1065 = vpow2.f32 %v695_v38  ;;  %v694_v40 = vsub.f32 %v686_v18, %v692_v39 }
 0x3c0   : > { %v697_v41 = vmul.f32 1.442695, %v694_v40  ;;  %v1062_v42 = vpop.eup %1061 }
 0x3c1   : > { %v707_v46 = vpop.permute.xlu1 %706  ;;  %v575_v57 = vsel %vm234_vm2, %v1062_v42, 0.0 }
 0x3c2   : > { %1067 = vpow2.f32 %v697_v41 }
 0x3c4   : > { %v1064_v45 = vpop.eup %1063 }
 0x3c5   : > { %v581_v47 = vpack.c.bf16 %v1064_v45, %v1062_v42 }
 0x3c7   : > { %987 = vmatmul.mubr.msk.bf16.vlgmr.msra.gmra.mrb[8].mxu0 %vm234_vm2, %v581_v47 }
 0x3c8   : > { %v1066_v48 = vpop.eup %1065  ;;  %997 = vmatpush3.bf16.msra.mxu0 %v707_v46  ;;  %998 = vmatprep.mubr.msk.bf16.mxu0 %vm1127_vm0, %v1126_v5  ;;  %v578_v5 = vsel %vm234_vm2, %v1064_v45, 0.0 }
 0x3c9   : > { %v699_v49 = vsel %vm234_vm2, %v1066_v48, 0.0 }
 0x3ca   : > { %700 = vadd.xlane.f32.xlu0 %v699_v49 }
 0x3cc   : > { %v1068_v50 = vpop.eup %1067 }
 0x3cd   : > { %v702_v52 = vsel %vm234_vm2, %v1068_v50, 0.0  ;;  %v705_v54 = vpack.c.bf16 %v1068_v50, %v1066_v48 }
 0x3ce   : > { %372 = vadd.xlane.f32.xlu0 %v371_v51  ;;  %703 = vadd.xlane.f32.xlu1 %v702_v52 }
 0x3cf   : > { %999 = vmatmul.mubr.msk.bf16.vlgmr.msra.gmra.mrb[12].mxu0 %vm234_vm2, %v705_v54 }
 0x3d2   : > { %375 = vadd.xlane.f32.xlu0 %v374_v56  ;;  %576 = vadd.xlane.f32.xlu1 %v575_v57 }
 0x3d6   : > { %579 = vadd.xlane.f32.xlu0 %v578_v5  ;;  %248 = vadd.xlane.f32.xlu1 %v247_v58 }
 0x3da   : > { %251 = vadd.xlane.f32.xlu0 %v250_v59 }
 0x457   : > { %v701_v60 = vpop.xlane.xlu0 %700 }
 0x45b   : > { %v373_v61 = vpop.xlane.xlu0 %372  ;;  %v704_v62 = vpop.xlane.xlu1 %703 }
 0x45c   : > { %1069 = vrcp.f32 %v373_v61 }
 0x45f   : > { %v376_v63 = vpop.xlane.xlu0 %375  ;;  %v577_v0 = vpop.xlane.xlu1 %576 }
 0x460   : > { %1071 = vrcp.f32 %v376_v63 }
 0x463   : > { %v580_v1 = vpop.xlane.xlu0 %579  ;;  %v249_v2 = vpop.xlane.xlu1 %248 }
 0x464   : > { %v418_v3 = vpop.f32.mrb[4].mxu0  ;;  %1073 = vrcp.f32 %v249_v2 }
 0x465   : > { %v976_v4 = vpop.f32.mrb[5].mxu0 }
 0x466   : > { %v421_v7 = vpop.f32.mrb[6].mxu0  ;;  %v1070_v9 = vpop.eup %1069 }
 0x467   : > { %v977_v43 = vpop.f32.mrb[7].mxu0  ;;  %v252_v8 = vpop.xlane.xlu0 %251  ;;  %v427_v44 = vmul.f32 %v1070_v9, %v418_v3 }
 0x468   : > { %1075 = vrcp.f32 %v252_v8 }
 0x469   : > { %1077 = vrcp.f32 %v577_v0 }
 0x46a   : > { %v1072_v10 = vpop.eup %1071  ;;  %1079 = vrcp.f32 %v580_v1 }
 0x46b   : > { %v428_v11 = vmul.f32 %v1072_v10, %v421_v7  ;;  %1081 = vrcp.f32 %v701_v60 }
 0x46c   : > { %1083 = vrcp.f32 %v704_v62 }
 0x46d   : > { %v429_v12 = vpack.c.bf16 %v428_v11, %v427_v44 }
 0x46e   : > { %v1074_v13 = vpop.eup %1073 }
 0x46f   : > { %431 = vrot.lane.b32.xlu0 %v429_v12, %s1133_s25  ;;  %v303_v16 = vmul.f32 %v1074_v13, %v1245_v53 }
 0x472   : > { %v1076_v14 = vpop.eup %1075 }
 0x473   : > { %v304_v17 = vmul.f32 %v1076_v14, %v1247_v55  ;;  %v1078_v20 = vpop.eup %1077 }
 0x474   : > { %v1080_v21 = vpop.eup %1079 }
 0x475   : > { %v305_v18 = vpack.c.bf16 %v304_v17, %v303_v16  ;;  %v1082_v27 = vpop.eup %1081 }
 0x476   : > { %v1084_v55 = vpop.eup %1083 }
 0x49a   : > { %v622_v19 = vpop.f32.mrb[8].mxu0 }
 0x49b   : > { %v988_v15 = vpop.f32.mrb[9].mxu0  ;;  %v631_v23 = vmul.f32 %v1078_v20, %v622_v19 }
 0x49c   : > { %v625_v22 = vpop.f32.mrb[10].mxu0 }
 0x49d   : > { %v632_v24 = vmul.f32 %v1080_v21, %v625_v22  ;;  %v989_v25 = vpop.f32.mrb[11].mxu0 }
 0x49f   : > { %v633_v26 = vpack.c.bf16 %v632_v24, %v631_v23 }
 0x4a2   : > { %v746_v28 = vpop.f32.mrb[12].mxu0 }
 0x4a3   : > { %v755_v53 = vmul.f32 %v1082_v27, %v746_v28  ;;  %v1000_v29 = vpop.f32.mrb[13].mxu0 }
 0x4a4   : > { %v749_v30 = vpop.f32.mrb[14].mxu0 }
 0x4a5   : > { %v756_v31 = vmul.f32 %v1084_v55, %v749_v30  ;;  %v1001_v32 = vpop.f32.mrb[15].mxu0 }
 0x4a7   : > { %v757_v33 = vpack.c.bf16 %v756_v31, %v755_v53 }
 0x4a9   : > { %759 = vrot.lane.b32.xlu1 %v757_v33, %s1133_s25 }
 0x4e1   : > { %v432_v34 = vpop.permute.xlu0 %431 }
 0x4e2   : > { %v435_v35 = vsel %vm184_vm1, %v305_v18, %v432_v34 }
 0x4e3   : > { %v437_v36 = vcombine.high %v435_v35, %v435_v35  ;;  %v444_v37 = vrot.slane %v435_v35, %v1188_v6 }
 0x4e5   : > { %v451_v38 = vrot.slane %v437_v36, %v1188_v6  ;;  %v452_v39 = vcombine.high %v444_v37, %v444_v37  ;;  %459 = vst.msk [vmem:[%s154_s28] sm:$0x3] %vm458_vm3, %v444_v37 }
 0x4e7   : > { %v453_v40 = vcombine.high %v451_v38, %v451_v38  ;;  %460 = vst.msk [vmem:[%s154_s28 + $0x4] sm:$0x3] %vm458_vm3, %v452_v39  ;;  %461 = vst.msk [vmem:[%s154_s28 + $0x8] sm:$0x3] %vm458_vm3, %v451_v38 }
 0x4e9   : > { %462 = vst.msk [vmem:[%s154_s28 + $0xc] sm:$0x3] %vm458_vm3, %v453_v40 }
 0x51b   : > { %v760_v41 = vpop.permute.xlu1 %759 }
 0x51c   : > { %v763_v42 = vsel %vm184_vm1, %v633_v26, %v760_v41 }
 0x51d   : > { %v765_v45 = vcombine.high %v763_v42, %v763_v42  ;;  %v772_v46 = vrot.slane %v763_v42, %v1188_v6 }
 0x51f   : > { %v779_v47 = vrot.slane %v765_v45, %v1188_v6  ;;  %v782_v48 = vcombine.low %v772_v46, %v772_v46  ;;  %v934_v49 = vcombine.high %v772_v46, %v772_v46 }
 0x521   : > { %v789_v50 = vrot.slane %v782_v48, %v1188_v6  ;;  %v797_v51 = vrot.slane %v934_v49, %v1188_v6  ;;  %v798_v52 = vcombine.low %v779_v47, %v779_v47  ;;  %v935_v54 = vcombine.high %v779_v47, %v779_v47 }
 0x523   : > { %v805_v56 = vrot.slane %v798_v52, %v1188_v6  ;;  %v813_v57 = vrot.slane %v935_v54, %v1188_v6  ;;  %819 = vst.msk [vmem:[%s154_s28] sm:$0xc] %vm818_vm4, %v789_v50  ;;  %820 = vst.msk [vmem:[%s154_s28 + $0x4] sm:$0xc] %vm818_vm4, %v797_v51 }
 0x525   : > { %821 = vst.msk [vmem:[%s154_s28 + $0x8] sm:$0xc] %vm818_vm4, %v805_v56  ;;  %822 = vst.msk [vmem:[%s154_s28 + $0xc] sm:$0xc] %vm818_vm4, %v813_v57 }
 0x526 PF: > { %s11_s10 = sadd.s32 1, %s1123_s10   ;;  %s1312_s6 = smov %s1115_s8 }
 0x527   : > { %p8_p7 = scmp.ge.s32.totalorder %s11_s10, 6   ;;  %s1313_s7 = smov %s1119_s9 }
 0x528   : > { %s1314_s8 = smov %s1317_s11  ;;  %s1315_s9 = smov %s1321_s12 }
 0x529   :  { %10 = sbr.rel (!%p8_p7) target bundleno = 3 (0x3), region = 54 }

// kernel: cfb_fwd.20
= control target key start
LH: loop header
LB: loop body
LE: loop exit
PB: predicated region body
PF: predicated region fallthrough
CT: control target
= control target key end

     0   :  { %s804_s15 = smov 0   ;;  %s806_s16 = smov 0   ;;  %s895_s0 = inlined_call_operand.vmem [shape: bf16[128,128], index: 0, kind: input, shape index: {}]   ;;  %s896_s1 = inlined_call_operand.vmem [shape: bf16[128,16], index: 1, kind: input, shape index: {}]   ;;  %s897_s2 = inlined_call_operand.vmem [shape: f32[1,16], index: 2, kind: input, shape index: {}]   ;;  %s898_s3 = inlined_call_operand.vmem [shape: f32[128,16], index: 3, kind: input, shape index: {}]   ;;  %s899_s4 = inlined_call_operand.vmem [shape: f32[128,16], index: 4, kind: output, shape index: {}]  }
   0x1   :  { %s808_s17 = smov 0  }
   0x2 LB: > { %s33_s18 = sadd.s32 1, %s773_s16  ;;  %p645_p0 = scmp.ge.s32.totalorder %s777_s17, 1  ;;  %s777_s17 = sphi %s808_s17, %s14_s17   ;;  %s773_s16 = sphi %s806_s16, %s901_s16   ;;  %s769_s15 = sphi %s804_s15, %s900_s15  }
   0x3   : > { %p35_p1 = scmp.ge.s32.totalorder %s33_s18, 2  ;;  %p229_p2 = scmp.lt.s32.totalorder %s777_s17, 3 }
   0x5   : > { %s903_s18 = smov (%p35_p1, %s33_s18), 0  ;;  %p230_p3 = pnand %p645_p0, %p229_p2 }
   0x6   : > { %v743_v0 = vld [vmem:[%s896_s1] sm:$0xff] (!%p230_p3)   ;;  %s646_s21 = sshll.u32 (!%p230_p3), %s769_s15, 3  ;;  %v744_v1 = vld [vmem:[%s896_s1 + $0x8] sm:$0xff] (!%p230_p3)   ;;  %v745_v2 = vld [vmem:[%s896_s1 + $0x10] sm:$0xff] (!%p230_p3)   ;;  %vm504_vm0 = vcmask (!%p230_p3), 130048  }
   0x7   : > { %233 = sbr.rel (%p230_p3) target bundleno = 259 (0x103), region = 36  ;;  %p281_p4 = scmp.lt.s32.totalorder (!%p230_p3), %s646_s21, 15  ;;  %679 = vmatprep.subr.bf16.mxu0 (!%p230_p3), %v743_v0  ;;  %703 = vmatprep.subr.bf16.mxu1 (!%p230_p3), %v743_v0  ;;  %v746_v3 = vld [vmem:[%s896_s1 + $0x18] sm:$0xff] (!%p230_p3)   ;;  %v747_v6 = vld [vmem:[%s896_s1 + $0x20] sm:$0xff] (!%p230_p3)   ;;  %v748_v7 = vld [vmem:[%s896_s1 + $0x28] sm:$0xff] (!%p230_p3)  }
   0x8   : > { %680 = vmatpush3.bf16.msra.mxu0 (!%p230_p3), %v743_v0  ;;  %711 = vmatpush3.bf16.msra.mxu1 (!%p230_p3), %v743_v0  ;;  %v749_v8 = vld [vmem:[%s896_s1 + $0x30] sm:$0xff] (!%p230_p3)   ;;  %v750_v9 = vld [vmem:[%s896_s1 + $0x38] sm:$0xff] (!%p230_p3)   ;;  %v652_v12 = vld [vmem:[%s897_s2] ss:$0 sm:$0xff] (!%p230_p3) }
   0x9   : > { %681 = vmatprep.subr.bf16.mxu0 (!%p230_p3), %v744_v1  ;;  %704 = vmatprep.subr.bf16.mxu1 (!%p230_p3), %v744_v1 }
   0xc   : > { %682 = vmatpush3.bf16.msra.mxu0 (!%p230_p3), %v744_v1  ;;  %712 = vmatpush3.bf16.msra.mxu1 (!%p230_p3), %v744_v1 }
   0xd   : > { %683 = vmatprep.subr.bf16.mxu0 (!%p230_p3), %v745_v2  ;;  %705 = vmatprep.subr.bf16.mxu1 (!%p230_p3), %v745_v2 }
   0xe   : > { %s905_s21 = smov (!%p281_p4, %s646_s21), 15 }
   0xf   : > { %s647_s26 = sshll.u32 %s905_s21, 2  ;;  %s649_s14 = sshll.u32 %s905_s21, 3 }
  0x10   : > { %s837_s29 = scalar_lea.vmem %s895_s0, %s647_s26  ;;  %684 = vmatpush3.bf16.msra.mxu0 %v745_v2  ;;  %713 = vmatpush3.bf16.msra.mxu1 %v745_v2  ;;  %s308_s20 = scalar_lea.vmem %s898_s3, %s649_s14 }
  0x11   : > { %v751_v4 = vld [vmem:[%s837_s29] sm:$0xff]   ;;  %v752_v5 = vld [vmem:[%s837_s29 + $0x10] sm:$0xff]   ;;  %685 = vmatprep.subr.bf16.mxu0 %v746_v3  ;;  %706 = vmatprep.subr.bf16.mxu1 %v746_v3  ;;  %v753_v10 = vld [vmem:[%s837_s29 + $0x8] sm:$0xff]   ;;  %s868_s25 = scalar_lea.vmem %s899_s4, %s649_s14 }
  0x12   : > { %695 = vmatprep.mubr.bf16.mxu0 %v751_v4  ;;  %699 = vmatprep.mubr.bf16.mxu1 %v752_v5  ;;  %v754_v11 = vld [vmem:[%s837_s29 + $0x18] sm:$0xff]   ;;  %v490_v14 = vld [vmem:[%s308_s20 + $0x10] sm:$0xff]  ;;  %v488_v20 = vld [vmem:[%s308_s20] sm:$0xff] }
  0x13   : > { %v494_v16 = vld [vmem:[%s308_s20 + $0x30] sm:$0xff]  ;;  %v492_v22 = vld [vmem:[%s308_s20 + $0x20] sm:$0xff]  ;;  %v491_v26 = vld [vmem:[%s308_s20 + $0x18] sm:$0xff] }
  0x14   : > { %686 = vmatpush3.bf16.msra.mxu0 %v746_v3  ;;  %714 = vmatpush3.bf16.msra.mxu1 %v746_v3  ;;  %v495_v28 = vld [vmem:[%s308_s20 + $0x38] sm:$0xff]  ;;  %v489_v34 = vld [vmem:[%s308_s20 + $0x8] sm:$0xff] }
  0x15   : > { %687 = vmatprep.subr.bf16.mxu0 %v747_v6  ;;  %707 = vmatprep.subr.bf16.mxu1 %v747_v6  ;;  %v493_v36 = vld [vmem:[%s308_s20 + $0x28] sm:$0xff] }
  0x18   : > { %688 = vmatpush3.bf16.msra.mxu0 %v747_v6  ;;  %715 = vmatpush3.bf16.msra.mxu1 %v747_v6 }
  0x19   : > { %689 = vmatprep.subr.bf16.mxu0 %v748_v7  ;;  %708 = vmatprep.subr.bf16.mxu1 %v748_v7 }
  0x1c   : > { %690 = vmatpush3.bf16.msra.mxu0 %v748_v7  ;;  %716 = vmatpush3.bf16.msra.mxu1 %v748_v7 }
  0x1d   : > { %691 = vmatprep.subr.bf16.mxu0 %v749_v8  ;;  %709 = vmatprep.subr.bf16.mxu1 %v749_v8 }
  0x20   : > { %692 = vmatpush3.bf16.msra.mxu0 %v749_v8  ;;  %717 = vmatpush3.bf16.msra.mxu1 %v749_v8 }
  0x21   : > { %693 = vmatprep.subr.bf16.mxu0 %v750_v9  ;;  %710 = vmatprep.subr.bf16.mxu1 %v750_v9 }
  0x24   : > { %694 = vmatpush3.bf16.msra.mxu0 %v750_v9  ;;  %718 = vmatpush3.bf16.msra.mxu1 %v750_v9 }
  0x27   : > { %696 = vmatmul.mubr.bf16.vlgmr.msra.gmra.mrb[0].mxu0 %v753_v10  ;;  %700 = vmatmul.mubr.bf16.vlgmr.msra.gmra.mrb[0].mxu1 %v754_v11 }
  0xfa   : > { %v697_v13 = vpop.f32.mrb[0].mxu0  ;;  %v701_v15 = vpop.f32.mrb[0].mxu1 }
  0xfb   : > { %v466_v17 = vadd.f32 %v697_v13, %v652_v12  ;;  %v482_v18 = vadd.f32 %v701_v15, %v652_v12  ;;  %v457_v19 = vpop.f32.mrb[1].mxu0  ;;  %v473_v21 = vpop.f32.mrb[1].mxu1 }
  0xfc   : > { %v458_v23 = vadd.f32 %v652_v12, %v457_v19  ;;  %v474_v24 = vadd.f32 %v652_v12, %v473_v21  ;;  %v698_v25 = vpop.f32.mrb[2].mxu0  ;;  %v702_v27 = vpop.f32.mrb[2].mxu1 }
  0xfd   : > { %v498_v29 = vadd.f32 %v490_v14, %v466_v17  ;;  %v502_v30 = vadd.f32 %v494_v16, %v482_v18  ;;  %v469_v31 = vadd.f32 %v698_v25, %v652_v12  ;;  %v485_v32 = vadd.f32 %v702_v27, %v652_v12  ;;  %v460_v33 = vpop.f32.mrb[3].mxu0  ;;  %v476_v35 = vpop.f32.mrb[3].mxu1 }
  0xfe   : > { %v496_v37 = vadd.f32 %v488_v20, %v458_v23  ;;  %v500_v38 = vadd.f32 %v492_v22, %v474_v24  ;;  %v461_v39 = vadd.f32 %v652_v12, %v460_v33  ;;  %v477_v40 = vadd.f32 %v652_v12, %v476_v35 }
  0xff   : > { %507 = vst.msk [vmem:[%s868_s25 + $0x10] sm:$0xff] %vm504_vm0, %v498_v29  ;;  %511 = vst.msk [vmem:[%s868_s25 + $0x30] sm:$0xff] %vm504_vm0, %v502_v30  ;;  %v499_v41 = vadd.f32 %v491_v26, %v469_v31  ;;  %v503_v42 = vadd.f32 %v495_v28, %v485_v32 }
 0x100   : > { %505 = vst.msk [vmem:[%s868_s25] sm:$0xff] %vm504_vm0, %v496_v37  ;;  %509 = vst.msk [vmem:[%s868_s25 + $0x20] sm:$0xff] %vm504_vm0, %v500_v38  ;;  %v497_v43 = vadd.f32 %v489_v34, %v461_v39  ;;  %v501_v44 = vadd.f32 %v493_v36, %v477_v40 }
 0x101   : > { %508 = vst.msk [vmem:[%s868_s25 + $0x18] sm:$0xff] %vm504_vm0, %v499_v41  ;;  %512 = vst.msk [vmem:[%s868_s25 + $0x38] sm:$0xff] %vm504_vm0, %v503_v42 }
 0x102   : > { %506 = vst.msk [vmem:[%s868_s25 + $0x8] sm:$0xff] %vm504_vm0, %v497_v43  ;;  %510 = vst.msk [vmem:[%s868_s25 + $0x28] sm:$0xff] %vm504_vm0, %v501_v44 }
 0x103 PF: > { %s14_s17 = sadd.s32 1, %s777_s17   ;;  %s900_s15 = smov %s773_s16 }
 0x104   : > { %p11_p5 = scmp.ge.s32.totalorder %s14_s17, 4   ;;  %s901_s16 = smov %s903_s18 }
 0x106   :  { %13 = sbr.rel (!%p11_p5) target bundleno = 2 (0x2), region = 75 }

// kernel: cfb_fwd.27
= control target key start
LH: loop header
LB: loop body
LE: loop exit
PB: predicated region body
PF: predicated region fallthrough
CT: control target
= control target key end

     0   :  { %s687_s15 = smov 0   ;;  %s689_s16 = smov 0   ;;  %s751_s0 = inlined_call_operand.vmem [shape: f32[128,16], index: 0, kind: input, shape index: {}, may-alias: {0,3}]   ;;  %s752_s1 = inlined_call_operand.vmem [shape: bf16[16,16], index: 1, kind: input, shape index: {}]   ;;  %s753_s2 = inlined_call_operand.vmem [shape: f32[1,16], index: 2, kind: input, shape index: {}]   ;;  %s754_s3 = inlined_call_operand.vmem [shape: f32[128,16], index: 3, kind: input, shape index: {}, may-alias: {0,3}]   ;;  %s755_s4 = inlined_call_operand.vmem [shape: f32[128,16], index: 4, kind: output, shape index: {}]  }
   0x1   :  { %s691_s17 = smov 0  }
   0x2 LB: > { %s33_s18 = sadd.s32 1, %s656_s16  ;;  %p581_p0 = scmp.ge.s32.totalorder %s660_s17, 1  ;;  %s660_s17 = sphi %s691_s17, %s14_s17   ;;  %s656_s16 = sphi %s689_s16, %s757_s16   ;;  %s652_s15 = sphi %s687_s15, %s756_s15  }
   0x3   : > { %p35_p1 = scmp.ge.s32.totalorder %s33_s18, 2  ;;  %p229_p2 = scmp.lt.s32.totalorder %s660_s17, 3 }
   0x5   : > { %s759_s18 = smov (%p35_p1, %s33_s18), 0  ;;  %p230_p3 = pnand %p581_p0, %p229_p2 }
   0x6   : > { %v637_v0 = vld [vmem:[%s752_s1] sm:$0xff] (!%p230_p3)   ;;  %s582_s21 = sshll.u32 (!%p230_p3), %s652_s15, 3  ;;  %vm347_vm0 = vcmask (!%p230_p3), 130048  }
   0x7   : > { %233 = sbr.rel (%p230_p3) target bundleno = 242 (0xf2), region = 36  ;;  %p281_p4 = scmp.lt.s32.totalorder (!%p230_p3), %s582_s21, 15  ;;  %601 = vmatprep.subr.bf16.mxu0 (!%p230_p3), %v637_v0  ;;  %611 = vmatprep.subr.bf16.mxu1 (!%p230_p3), %v637_v0  ;;  %v588_v13 = vld [vmem:[%s753_s2] ss:$0 sm:$0xff] (!%p230_p3) }
   0x8   : > { %602 = vmatpush3.bf16.msra.mxu0 (!%p230_p3), %v637_v0  ;;  %612 = vmatpush3.bf16.msra.mxu1 (!%p230_p3), %v637_v0 }
   0xe   : > { %s761_s21 = smov (!%p281_p4, %s582_s21), 15 }
   0xf   : > { %s583_s22 = sshll.u32 %s761_s21, 3 }
  0x10   : > { %s287_s25 = scalar_lea.vmem %s751_s0, %s583_s22  ;;  %s308_s28 = scalar_lea.vmem %s754_s3, %s583_s22 }
  0x11   : > { %v320_v1 = vld [vmem:[%s287_s25] sm:$0xff]  ;;  %v321_v2 = vld [vmem:[%s287_s25 + $0x8] sm:$0xff]  ;;  %v322_v6 = vld [vmem:[%s287_s25 + $0x10] sm:$0xff]  ;;  %s724_s7 = scalar_lea.vmem %s755_s4, %s583_s22 }
  0x12   : > { %v324_v3 = vld [vmem:[%s287_s25 + $0x20] sm:$0xff]  ;;  %v328_v4 = vpack.c.bf16 %v321_v2, %v320_v1  ;;  %v325_v5 = vld [vmem:[%s287_s25 + $0x28] sm:$0xff]  ;;  %v323_v7 = vld [vmem:[%s287_s25 + $0x18] sm:$0xff] }
  0x13   : > { %v330_v8 = vpack.c.bf16 %v325_v5, %v324_v3  ;;  %v329_v9 = vpack.c.bf16 %v323_v7, %v322_v6  ;;  %v326_v10 = vld [vmem:[%s287_s25 + $0x30] sm:$0xff]  ;;  %v327_v11 = vld [vmem:[%s287_s25 + $0x38] sm:$0xff]  ;;  %v425_v20 = vld [vmem:[%s308_s28] sm:$0xff] }
  0x14   : > { %603 = vmatprep.mubr.msk.bf16.mxu0 %vm347_vm0, %v328_v4  ;;  %v331_v12 = vpack.c.bf16 %v327_v11, %v326_v10  ;;  %v427_v15 = vld [vmem:[%s308_s28 + $0x10] sm:$0xff]  ;;  %v429_v24 = vld [vmem:[%s308_s28 + $0x20] sm:$0xff]  ;;  %v428_v26 = vld [vmem:[%s308_s28 + $0x18] sm:$0xff] }
  0x15   : > { %607 = vmatprep.mubr.msk.bf16.mxu1 %vm347_vm0, %v330_v8  ;;  %604 = vmatmul.mubr.msk.bf16.vlgmr.msra.gmra.mrb[0].mxu0 %vm347_vm0, %v329_v9  ;;  %v431_v18 = vld [vmem:[%s308_s28 + $0x30] sm:$0xff]  ;;  %v432_v31 = vld [vmem:[%s308_s28 + $0x38] sm:$0xff]  ;;  %v426_v33 = vld [vmem:[%s308_s28 + $0x8] sm:$0xff] }
  0x16   : > { %608 = vmatmul.mubr.msk.bf16.vlgmr.msra.gmra.mrb[0].mxu1 %vm347_vm0, %v331_v12  ;;  %v430_v39 = vld [vmem:[%s308_s28 + $0x28] sm:$0xff] }
  0xe8   : > { %v605_v14 = vpop.f32.mrb[0].mxu0 }
  0xe9   : > { %v403_v16 = vadd.f32 %v605_v14, %v588_v13  ;;  %v609_v17 = vpop.f32.mrb[0].mxu1  ;;  %v394_v19 = vpop.f32.mrb[1].mxu0 }
  0xea   : > { %v419_v21 = vadd.f32 %v609_v17, %v588_v13  ;;  %v395_v22 = vadd.f32 %v588_v13, %v394_v19  ;;  %v410_v23 = vpop.f32.mrb[1].mxu1  ;;  %v606_v25 = vpop.f32.mrb[2].mxu0 }
  0xeb   : > { %v435_v27 = vadd.f32 %v427_v15, %v403_v16  ;;  %v411_v28 = vadd.f32 %v588_v13, %v410_v23  ;;  %v406_v29 = vadd.f32 %v606_v25, %v588_v13  ;;  %v610_v30 = vpop.f32.mrb[2].mxu1  ;;  %v397_v32 = vpop.f32.mrb[3].mxu0 }
  0xec   : > { %v439_v34 = vadd.f32 %v431_v18, %v419_v21  ;;  %v433_v35 = vadd.f32 %v425_v20, %v395_v22  ;;  %v422_v36 = vadd.f32 %v610_v30, %v588_v13  ;;  %v398_v37 = vadd.f32 %v588_v13, %v397_v32  ;;  %v413_v38 = vpop.f32.mrb[3].mxu1 }
  0xed   : > { %443 = vst.msk [vmem:[%s724_s7 + $0x10] sm:$0xff] %vm347_vm0, %v435_v27  ;;  %v437_v40 = vadd.f32 %v429_v24, %v411_v28  ;;  %v436_v41 = vadd.f32 %v428_v26, %v406_v29  ;;  %v414_v42 = vadd.f32 %v588_v13, %v413_v38 }
  0xee   : > { %447 = vst.msk [vmem:[%s724_s7 + $0x30] sm:$0xff] %vm347_vm0, %v439_v34  ;;  %441 = vst.msk [vmem:[%s724_s7] sm:$0xff] %vm347_vm0, %v433_v35  ;;  %v440_v43 = vadd.f32 %v432_v31, %v422_v36  ;;  %v434_v44 = vadd.f32 %v426_v33, %v398_v37 }
  0xef   : > { %445 = vst.msk [vmem:[%s724_s7 + $0x20] sm:$0xff] %vm347_vm0, %v437_v40  ;;  %444 = vst.msk [vmem:[%s724_s7 + $0x18] sm:$0xff] %vm347_vm0, %v436_v41  ;;  %v438_v45 = vadd.f32 %v430_v39, %v414_v42 }
  0xf0   : > { %448 = vst.msk [vmem:[%s724_s7 + $0x38] sm:$0xff] %vm347_vm0, %v440_v43  ;;  %442 = vst.msk [vmem:[%s724_s7 + $0x8] sm:$0xff] %vm347_vm0, %v434_v44 }
  0xf1   : > { %446 = vst.msk [vmem:[%s724_s7 + $0x28] sm:$0xff] %vm347_vm0, %v438_v45 }
  0xf2 PF: > { %s14_s17 = sadd.s32 1, %s660_s17   ;;  %s756_s15 = smov %s656_s16 }
  0xf3   : > { %p11_p5 = scmp.ge.s32.totalorder %s14_s17, 4   ;;  %s757_s16 = smov %s759_s18 }
  0xf5   :  { %13 = sbr.rel (!%p11_p5) target bundleno = 2 (0x2), region = 75 }

// kernel: cfb_fwd.19
= control target key start
LH: loop header
LB: loop body
LE: loop exit
PB: predicated region body
PF: predicated region fallthrough
CT: control target
= control target key end

     0   :  { %s1105_s12 = smov 0   ;;  %s1519_s0 = inlined_call_operand.vmem [shape: bf16[2,8,8,16], index: 0, kind: input, shape index: {}]   ;;  %s1520_s1 = inlined_call_operand.vmem [shape: bf16[144,128], index: 1, kind: input, shape index: {}]   ;;  %s1521_s2 = inlined_call_operand.vmem [shape: f32[1,128], index: 2, kind: input, shape index: {}]   ;;  %s1522_s3 = inlined_call_operand.vmem [shape: bf16[2,8,8,128], index: 3, kind: output, shape index: {}]  }
   0x1 LB: > { %s940_s13 = sadd.s32 4294967295, %s1075_s12   ;;  %p944_p0 = scmp.ge.s32.totalorder %s1075_s12, 1  ;;  %s1075_s12 = sphi %s1105_s12, %s13_s12  }
   0x2   : > { %p137_p1 = scmp.lt.s32.totalorder %s1075_s12, 3 }
   0x4   : > { %p138_p2 = pnand %p944_p0, %p137_p1 }
   0x5   : > { %p161_p3 = scmp.lt.s32.totalorder (!%p138_p2), %s940_s13, 1  ;;  %vm180_vm0 = vcmask (!%p138_p2), 1043456   ;;  %vm181_vm1 = vcmask (!%p138_p2), 130052   ;;  %v1077_v0 = vmov (!%p138_p2), 0   ;;  %vm248_vm3 = vcmask (!%p138_p2), 125952   ;;  %s1078_s18 = smov (!%p138_p2), 16  }
   0x6   : > { %141 = sbr.rel (%p138_p2) target bundleno = 478 (0x1de), region = 32  ;;  %vm182_vm2 = vmor (!%p138_p2), %vm181_vm1, %vm180_vm0  ;;  %764 = vmatprep.subr.bf16.mxu0 (!%p138_p2), %v1077_v0  ;;  %998 = vmatprep.subr.bf16.mxu1 (!%p138_p2), %v1077_v0  ;;  %vm358_vm4 = vsmask.f32 (!%p138_p2), 3328  ;;  %vm249_vm5 = vsmask.f32 (!%p138_p2), 7938  ;;  %s1079_s19 = smov (!%p138_p2), 32  }
   0x7   : > { %185 = vst.msk [vmem:[#allocation2 + $0x10] sm:$0xff] (!%p138_p2), %vm182_vm2, %v1077_v0  ;;  %183 = vst.msk [vmem:[#allocation2] sm:$0xff] (!%p138_p2), %vm182_vm2, %v1077_v0  ;;  %s1080_s20 = smov (!%p138_p2), 48   ;;  %s1081_s21 = smov (!%p138_p2), 64   ;;  %v1033_v47 = vld [vmem:[%s1520_s1 + $0x8] sm:$0xff] (!%p138_p2)   ;;  %vm300_vm8 = vcmask (!%p138_p2), 257152  }
   0x8   : > { %184 = vst.msk [vmem:[#allocation2 + $0x8] sm:$0xff] (!%p138_p2), %vm182_vm2, %v1077_v0  ;;  %186 = vst.msk [vmem:[#allocation2 + $0x18] sm:$0xff] (!%p138_p2), %vm182_vm2, %v1077_v0  ;;  %s1082_s28 = smov (!%p138_p2), 80   ;;  %s1083_s10 = smov (!%p138_p2), 96   ;;  %vm357_vm9 = vcmask (!%p138_p2), 388352   ;;  %vm412_vm11 = vcmask (!%p138_p2), 519552  }
   0x9   : > { %187 = vst.msk [vmem:[#allocation2 + $0x20] sm:$0xff] (!%p138_p2), %vm182_vm2, %v1077_v0  ;;  %188 = vst.msk [vmem:[#allocation2 + $0x28] sm:$0xff] (!%p138_p2), %vm182_vm2, %v1077_v0  ;;  %vm463_vm13 = vcmask (!%p138_p2), 650752   ;;  %vm500_vm14 = vcmask (!%p138_p2), 781952   ;;  %vm547_vm0 = vcmask (!%p138_p2), 913152  }
   0xa   : > { %189 = vst.msk [vmem:[#allocation2 + $0x30] sm:$0xff] (!%p138_p2), %vm182_vm2, %v1077_v0  ;;  %190 = vst.msk [vmem:[#allocation2 + $0x38] sm:$0xff] (!%p138_p2), %vm182_vm2, %v1077_v0  ;;  %vm591_vm2 = vcmask (!%p138_p2), 1044352  }
   0xb   : > { %vm1187_vm6 = vmand (!%p138_p2), %vm248_vm3, %vm358_vm4 }
   0xc   : > { %vm1198_vm7 = vmand (!%p138_p2), %vm248_vm3, %vm249_vm5  ;;  %vm751_vm3 = vcmask (!%p138_p2), 130048  }
   0xd   : > { %s1536_s13 = smov (!%p161_p3, %s940_s13), 1  ;;  %vm1403_vm10 = vmand %vm357_vm9, %vm358_vm4 }
   0xe   : > { %s973_s14 = sshll.u32 %s1536_s13, 5  ;;  %v613_v29 = vld [vmem:[#allocation2 + $0x14] sm:$0xf]  ;;  %v254_v48 = vld [vmem:[#allocation2 + $0x10] sm:$0xf]  ;;  %vm1420_vm12 = vmand %vm412_vm11, %vm249_vm5 }
   0xf   : > { %s1131_s17 = scalar_lea.vmem %s1519_s0, %s973_s14  ;;  %v616_v36 = vld [vmem:[#allocation2 + $0x1c] sm:$0xf]  ;;  %v251_v49 = vld [vmem:[#allocation2 + $0x8] sm:$0xf]  ;;  %v610_v54 = vld [vmem:[#allocation2 + $0xc] sm:$0xf]  ;;  %s1510_s23 = scalar_lea.vmem %s1522_s3, %s973_s14 }
  0x10   : > { %v1134_v1 = vld [vmem:[%s1131_s17 + $0x10] sm:$0xf]  ;;  %v1137_v2 = vld [vmem:[%s1131_s17] sm:$0xf]  ;;  %v1146_v5 = vld [vmem:[%s1131_s17 + $0x4] sm:$0xf] }
  0x11   : > { %287 = vrot.lane.b32.xlu1 %v1134_v1, %s1078_s18  ;;  %279 = vrot.lane.b32.xlu0 %v1137_v2, %s1078_s18  ;;  %v192_v3 = vshrl.u32 %v1137_v2, 16  ;;  %v195_v4 = vshll.u32 %v1137_v2, 16  ;;  %v1149_v6 = vld [vmem:[%s1131_s17 + $0xc] sm:$0xf]  ;;  %v199_v9 = vshrl.u32 %v1146_v5, 16  ;;  %v202_v10 = vshll.u32 %v1146_v5, 16  ;;  %vm1449_vm15 = vmand %vm500_vm14, %vm358_vm4 }
  0x12   : > { %v213_v7 = vshrl.u32 %v1149_v6, 16  ;;  %v216_v8 = vshll.u32 %v1149_v6, 16  ;;  %v220_v13 = vshrl.u32 %v1134_v1, 16  ;;  %v223_v14 = vshll.u32 %v1134_v1, 16  ;;  %v1158_v15 = vld [vmem:[%s1131_s17 + $0x14] sm:$0xf]  ;;  %vm1470_vm1 = vmand %vm547_vm0, %vm249_vm5 }
  0x13   : > { %v308_v11 = vrot.slane %v192_v3, 4  ;;  %v309_v12 = vrot.slane %v195_v4, 5  ;;  %v312_v18 = vrot.slane %v199_v9, 4  ;;  %v313_v19 = vrot.slane %v202_v10, 5  ;;  %v1169_v20 = vld [vmem:[%s1131_s17 + $0x8] sm:$0xf] }
  0x14   : > { %v320_v16 = vrot.slane %v213_v7, 4  ;;  %v321_v17 = vrot.slane %v216_v8, 5  ;;  %v324_v22 = vrot.slane %v220_v13, 4  ;;  %v325_v23 = vrot.slane %v223_v14, 5  ;;  %v619_v41 = vld [vmem:[#allocation2 + $0x24] sm:$0xf] }
  0x15   : > { %281 = vrot.lane.b32.xlu1 %v1146_v5, %s1078_s18  ;;  %285 = vrot.lane.b32.xlu0 %v1149_v6, %s1078_s18  ;;  %v310_v21 = vor.u32 %v309_v12, %v308_v11  ;;  %v227_v24 = vshrl.u32 %v1158_v15, 16  ;;  %v314_v26 = vor.u32 %v313_v19, %v312_v18  ;;  %v230_v27 = vshll.u32 %v1158_v15, 16  ;;  %v266_v57 = vld [vmem:[#allocation2 + $0x30] sm:$0xf]  ;;  %v263_v58 = vld [vmem:[#allocation2 + $0x28] sm:$0xf] }
  0x16   : > { %v322_v25 = vor.u32 %v321_v17, %v320_v16  ;;  %v206_v28 = vshrl.u32 %v1169_v20, 16  ;;  %v326_v31 = vor.u32 %v325_v23, %v324_v22  ;;  %v209_v33 = vshll.u32 %v1169_v20, 16  ;;  %v1214_v62 = vld [vmem:[%s1131_s17 + $0x18] sm:$0xf]  ;;  %v1229_v12 = vld [vmem:[%s1131_s17 + $0x1c] sm:$0xf] }
  0x17   : > { %v1174_v30 = vrot.slane %v310_v21, 4  ;;  %v328_v32 = vrot.slane %v227_v24, 4  ;;  %v1179_v35 = vrot.slane %v314_v26, 4  ;;  %v329_v37 = vrot.slane %v230_v27, 5  ;;  %v269_v18 = vld [vmem:[#allocation2 + $0x38] sm:$0xf] }
  0x18   : > { %v1177_v34 = vrot.slane %v322_v25, 4  ;;  %v316_v38 = vrot.slane %v206_v28, 4  ;;  %v1191_v40 = vrot.slane %v326_v31, 4  ;;  %v317_v42 = vrot.slane %v209_v33, 5  ;;  %v260_v19 = vld [vmem:[#allocation2 + $0x20] sm:$0xf] }
  0x19   : > { %289 = vrot.lane.b32.xlu1 %v1158_v15, %s1078_s18  ;;  %283 = vrot.lane.b32.xlu0 %v1169_v20, %s1078_s18  ;;  %v201_v43 = vrot.slane %v199_v9, 7  ;;  %v194_v44 = vrot.slane %v192_v3, 7  ;;  %v330_v46 = vor.u32 %v329_v37, %v328_v32  ;;  %v229_v50 = vrot.slane %v227_v24, 7  ;;  %v257_v3 = vld [vmem:[#allocation2 + $0x18] sm:$0xf] }
  0x1a   : > { %v614_v45 = vsel %vm1187_vm6, %v1177_v34, %v613_v29  ;;  %v222_v51 = vrot.slane %v220_v13, 7  ;;  %v617_v52 = vsel %vm1187_vm6, %v1191_v40, %v616_v36  ;;  %v318_v53 = vor.u32 %v317_v42, %v316_v38 }
  0x1b   : > { %615 = vst [vmem:[#allocation2 + $0x14] sm:$0xf] %v614_v45  ;;  %v1205_v55 = vor.u32 %v202_v10, %v201_v43  ;;  %v197_v56 = vor.u32 %v195_v4, %v194_v44  ;;  %618 = vst [vmem:[#allocation2 + $0x1c] sm:$0xf] %v617_v52  ;;  %v1207_v59 = vrot.slane %v330_v46, 4  ;;  %v1209_v60 = vor.u32 %v230_v27, %v229_v50  ;;  %v1035_v50 = vld [vmem:[%s1520_s1 + $0x18] sm:$0xff]  }
  0x1c   : > { %v1211_v61 = vor.u32 %v223_v14, %v222_v51  ;;  %v208_v63 = vrot.slane %v206_v28, 7  ;;  %v1220_v4 = vrot.slane %v318_v53, 4  ;;  %v234_v11 = vshrl.u32 %v1214_v62, 16  ;;  %v625_v43 = vld [vmem:[#allocation2 + $0x34] sm:$0xf]  ;;  %v1036_v51 = vld [vmem:[%s1520_s1 + $0x20] sm:$0xff]  }
  0x1d   : > { %342 = vrot.lane.b32.xlu1 %v1177_v34, %s1079_s19  ;;  %336 = vrot.lane.b32.xlu0 %v1174_v30, %s1079_s19  ;;  %v255_v9 = vsel %vm1198_vm7, %v1205_v55, %v254_v48  ;;  %v252_v10 = vsel %vm1198_vm7, %v197_v56, %v251_v49  ;;  %v620_v13 = vsel %vm1187_vm6, %v1207_v59, %v619_v41  ;;  %v237_v23 = vshll.u32 %v1214_v62, 16  ;;  %v622_v41 = vld [vmem:[#allocation2 + $0x2c] sm:$0xf]  ;;  %v1034_v48 = vld [vmem:[%s1520_s1 + $0x10] sm:$0xff]   ;;  %v607_v52 = vld [vmem:[#allocation2 + $0x4] sm:$0xf] }
  0x1e   : > { %256 = vst [vmem:[#allocation2 + $0x10] sm:$0xf] %v255_v9  ;;  %253 = vst [vmem:[#allocation2 + $0x8] sm:$0xf] %v252_v10  ;;  %v267_v14 = vsel %vm1198_vm7, %v1209_v60, %v266_v57  ;;  %v264_v16 = vsel %vm1198_vm7, %v1211_v61, %v263_v58  ;;  %v1240_v17 = vor.u32 %v209_v33, %v208_v63  ;;  %v236_v22 = vrot.slane %v234_v11, 7 }
  0x1f   : > { %621 = vst [vmem:[#allocation2 + $0x24] sm:$0xf] %v620_v13  ;;  %v611_v21 = vsel %vm1187_vm6, %v1220_v4, %v610_v54  ;;  %268 = vst [vmem:[#allocation2 + $0x30] sm:$0xf] %v267_v14  ;;  %v215_v24 = vrot.slane %v213_v7, 7  ;;  %v332_v26 = vrot.slane %v234_v11, 4  ;;  %v608_v53 = vsel %vm1187_vm6, %v1179_v35, %v607_v52 }
  0x20   : > { %265 = vst [vmem:[#allocation2 + $0x28] sm:$0xf] %v264_v16  ;;  %612 = vst [vmem:[#allocation2 + $0xc] sm:$0xf] %v611_v21  ;;  %v258_v25 = vsel %vm1198_vm7, %v1240_v17, %v257_v3  ;;  %v382_v27 = vshrl.u32 %v1229_v12, 16  ;;  %v385_v28 = vshll.u32 %v1229_v12, 16  ;;  %v1257_v29 = vor.u32 %v237_v23, %v236_v22 }
  0x21   : > { %338 = vrot.lane.b32.xlu1 %v1179_v35, %s1079_s19  ;;  %344 = vrot.lane.b32.xlu0 %v1191_v40, %s1079_s19  ;;  %259 = vst [vmem:[#allocation2 + $0x18] sm:$0xf] %v258_v25  ;;  %v1261_v7 = vor.u32 %v216_v8, %v215_v24  ;;  %v333_v31 = vrot.slane %v237_v23, 5  ;;  %609 = vst [vmem:[#allocation2 + $0x4] sm:$0xf] %v608_v53  ;;  %v1038_v54 = vld [vmem:[%s1520_s1 + $0x30] sm:$0xff]  }
  0x22   : > { %v472_v32 = vrot.slane %v382_v27, 4  ;;  %v473_v33 = vrot.slane %v385_v28, 5  ;;  %v270_v36 = vsel %vm1198_vm7, %v1257_v29, %v269_v18  ;;  %v384_v49 = vrot.slane %v382_v27, 7  ;;  %v414_v18 = vld [vmem:[#allocation2] sm:$0xf] }
  0x23   : > { %v261_v37 = vsel %vm1198_vm7, %v1261_v7, %v260_v19  ;;  %v334_v38 = vor.u32 %v333_v31, %v332_v26  ;;  %271 = vst [vmem:[#allocation2 + $0x38] sm:$0xf] %v270_v36 }
  0x24   : > { %262 = vst [vmem:[#allocation2 + $0x20] sm:$0xf] %v261_v37  ;;  %v474_v42 = vor.u32 %v473_v33, %v472_v32 }
  0x25   : > { %346 = vrot.lane.b32.xlu1 %v1207_v59, %s1079_s19  ;;  %340 = vrot.lane.b32.xlu0 %v1220_v4, %s1079_s19  ;;  %v1275_v8 = vrot.slane %v334_v38, 4 }
  0x26   : > { %v1277_v44 = vrot.slane %v474_v42, 4 }
  0x27   : > { %v623_v45 = vsel %vm1187_vm6, %v1275_v8, %v622_v41 }
  0x28   : > { %624 = vst [vmem:[#allocation2 + $0x2c] sm:$0xf] %v623_v45  ;;  %v626_v46 = vsel %vm1187_vm6, %v1277_v44, %v625_v43 }
  0x29   : > { %390 = vrot.lane.b32.xlu1 %v1205_v55, %s1080_s20  ;;  %388 = vrot.lane.b32.xlu0 %v197_v56, %s1080_s20  ;;  %627 = vst [vmem:[#allocation2 + $0x34] sm:$0xf] %v626_v46 }
  0x2d   : > { %398 = vrot.lane.b32.xlu1 %v1209_v60, %s1080_s20  ;;  %396 = vrot.lane.b32.xlu0 %v1211_v61, %s1080_s20 }
  0x31   : > { %439 = vrot.lane.b32.xlu1 %v1137_v2, %s1081_s21  ;;  %291 = vrot.lane.b32.xlu0 %v1214_v62, %s1078_s18  ;;  %v1032_v2 = vld [vmem:[%s1520_s1] sm:$0xff]   ;;  %s1084_s18 = smov 112  }
  0x32   : > { %765 = vmatpush1.bf16.msra.mxu0 %v1032_v2  ;;  %1007 = vmatpush1.bf16.msra.mxu1 %v1032_v2 }
  0x33   : > { %766 = vmatprep.subr.bf16.mxu0 %v1077_v0  ;;  %999 = vmatprep.subr.bf16.mxu1 %v1077_v0 }
  0x35   : > { %447 = vrot.lane.b32.xlu1 %v1134_v1, %s1081_s21  ;;  %441 = vrot.lane.b32.xlu0 %v1146_v5, %s1081_s21 }
  0x36   : > { %767 = vmatpush1.bf16.msra.mxu0 %v1033_v47  ;;  %1008 = vmatpush1.bf16.msra.mxu1 %v1033_v47 }
  0x37   : > { %768 = vmatprep.subr.bf16.mxu0 %v1077_v0  ;;  %1000 = vmatprep.subr.bf16.mxu1 %v1077_v0 }
  0x39   : > { %392 = vrot.lane.b32.xlu1 %v1240_v17, %s1080_s20  ;;  %449 = vrot.lane.b32.xlu0 %v1158_v15, %s1081_s21 }
  0x3a   : > { %769 = vmatpush1.bf16.msra.mxu0 %v1034_v48  ;;  %1009 = vmatpush1.bf16.msra.mxu1 %v1034_v48 }
  0x3b   : > { %770 = vmatprep.subr.bf16.mxu0 %v1077_v0  ;;  %1001 = vmatprep.subr.bf16.mxu1 %v1077_v0 }
  0x3d   : > { %400 = vrot.lane.b32.xlu1 %v1257_v29, %s1080_s20  ;;  %394 = vrot.lane.b32.xlu0 %v1261_v7, %s1080_s20 }
  0x3e   : > { %771 = vmatpush1.bf16.msra.mxu0 %v1035_v50  ;;  %1010 = vmatpush1.bf16.msra.mxu1 %v1035_v50 }
  0x3f   : > { %772 = vmatprep.subr.bf16.mxu0 %v1077_v0  ;;  %1002 = vmatprep.subr.bf16.mxu1 %v1077_v0 }
  0x41   : > { %443 = vrot.lane.b32.xlu1 %v1169_v20, %s1081_s21  ;;  %348 = vrot.lane.b32.xlu0 %v1275_v8, %s1079_s19 }
  0x42   : > { %773 = vmatpush1.bf16.msra.mxu0 %v1036_v51  ;;  %1011 = vmatpush1.bf16.msra.mxu1 %v1036_v51 }
  0x43   : > { %774 = vmatprep.subr.bf16.mxu0 %v1077_v0  ;;  %1003 = vmatprep.subr.bf16.mxu1 %v1077_v0 }
  0x45   : > { %451 = vrot.lane.b32.xlu1 %v1214_v62, %s1081_s21  ;;  %445 = vrot.lane.b32.xlu0 %v1149_v6, %s1081_s21 }
  0x49   : > { %478 = vrot.lane.b32.xlu1 %v1179_v35, %s1082_s28  ;;  %476 = vrot.lane.b32.xlu0 %v1174_v30, %s1082_s28  ;;  %v387_v30 = vor.u32 %v385_v28, %v384_v49  ;;  %v1039_v35 = vld [vmem:[%s1520_s1 + $0x38] sm:$0xff]  }
  0x4d   : > { %486 = vrot.lane.b32.xlu1 %v1207_v59, %s1082_s28  ;;  %484 = vrot.lane.b32.xlu0 %v1191_v40, %s1082_s28  ;;  %v1037_v40 = vld [vmem:[%s1520_s1 + $0x28] sm:$0xff]  }
  0x4e   : > { %775 = vmatpush1.bf16.msra.mxu0 %v1037_v40  ;;  %1012 = vmatpush1.bf16.msra.mxu1 %v1037_v40  ;;  %v949_v40 = vld [vmem:[%s1521_s2] ss:$0 sm:$0xff] }
  0x4f   : > { %776 = vmatprep.subr.bf16.mxu0 %v1077_v0  ;;  %1004 = vmatprep.subr.bf16.mxu1 %v1077_v0 }
  0x51   : > { %480 = vrot.lane.b32.xlu1 %v1220_v4, %s1082_s28  ;;  %402 = vrot.lane.b32.xlu0 %v387_v30, %s1080_s20 }
  0x52   : > { %777 = vmatpush1.bf16.msra.mxu0 %v1038_v54  ;;  %1013 = vmatpush1.bf16.msra.mxu1 %v1038_v54 }
  0x53   : > { %778 = vmatprep.subr.bf16.mxu0 %v1077_v0  ;;  %1005 = vmatprep.subr.bf16.mxu1 %v1077_v0 }
  0x55   : > { %488 = vrot.lane.b32.xlu1 %v1275_v8, %s1082_s28  ;;  %482 = vrot.lane.b32.xlu0 %v1177_v34, %s1082_s28  ;;  %v1040_v34 = vld [vmem:[%s1520_s1 + $0x40] sm:$0xff]  }
  0x56   : > { %779 = vmatpush1.bf16.msra.mxu0 %v1039_v35  ;;  %1014 = vmatpush1.bf16.msra.mxu1 %v1039_v35 }
  0x57   : > { %780 = vmatprep.subr.bf16.mxu0 %v1077_v0  ;;  %1006 = vmatprep.subr.bf16.mxu1 %v1077_v0 }
  0x59   : > { %528 = vrot.lane.b32.xlu1 %v1240_v17, %s1083_s10  ;;  %526 = vrot.lane.b32.xlu0 %v1205_v55, %s1083_s10 }
  0x5a   : > { %781 = vmatpush1.bf16.msra.mxu0 %v1040_v34  ;;  %1015 = vmatpush1.bf16.msra.mxu1 %v1040_v34 }
  0x5d   : > { %536 = vrot.lane.b32.xlu1 %v1257_v29, %s1083_s10  ;;  %534 = vrot.lane.b32.xlu0 %v1209_v60, %s1083_s10 }
  0x61   : > { %570 = vrot.lane.b32.xlu1 %v1146_v5, %s1084_s18  ;;  %453 = vrot.lane.b32.xlu0 %v1229_v12, %s1081_s21 }
  0x65   : > { %578 = vrot.lane.b32.xlu1 %v1158_v15, %s1084_s18  ;;  %572 = vrot.lane.b32.xlu0 %v1169_v20, %s1084_s18 }
  0x69   : > { %530 = vrot.lane.b32.xlu1 %v1261_v7, %s1083_s10  ;;  %580 = vrot.lane.b32.xlu0 %v1214_v62, %s1084_s18 }
  0x6d   : > { %538 = vrot.lane.b32.xlu1 %v387_v30, %s1083_s10  ;;  %532 = vrot.lane.b32.xlu0 %v1211_v61, %s1083_s10 }
  0x71   : > { %574 = vrot.lane.b32.xlu1 %v1149_v6, %s1084_s18  ;;  %490 = vrot.lane.b32.xlu0 %v1277_v44, %s1082_s28 }
  0x75   : > { %582 = vrot.lane.b32.xlu1 %v1229_v12, %s1084_s18  ;;  %576 = vrot.lane.b32.xlu0 %v1134_v1, %s1084_s18 }
  0x83   : > { %v288_v0 = vpop.permute.xlu1 %287  ;;  %v280_v5 = vpop.permute.xlu0 %279 }
  0x84   : > { %305 = vst.msk [vmem:[#allocation2 + $0x28] sm:$0xf] %vm300_vm8, %v288_v0  ;;  %301 = vst.msk [vmem:[#allocation2 + $0x8] sm:$0xf] %vm300_vm8, %v280_v5 }
  0x87   : > { %v282_v15 = vpop.permute.xlu1 %281  ;;  %v286_v20 = vpop.permute.xlu0 %285 }
  0x88   : > { %302 = vst.msk [vmem:[#allocation2 + $0x10] sm:$0xf] %vm300_vm8, %v282_v15  ;;  %304 = vst.msk [vmem:[#allocation2 + $0x20] sm:$0xf] %vm300_vm8, %v286_v20 }
  0x8b   : > { %v290_v6 = vpop.permute.xlu1 %289  ;;  %v284_v39 = vpop.permute.xlu0 %283  ;;  %v360_v58 = vld [vmem:[#allocation2 + $0x8] sm:$0xf] }
  0x8c   : > { %306 = vst.msk [vmem:[#allocation2 + $0x30] sm:$0xf] %vm300_vm8, %v290_v6  ;;  %303 = vst.msk [vmem:[#allocation2 + $0x18] sm:$0xf] %vm300_vm8, %v284_v39  ;;  %v372_v63 = vld [vmem:[#allocation2 + $0x28] sm:$0xf] }
  0x8f   : > { %v343_v55 = vpop.permute.xlu1 %342  ;;  %v369_v56 = vld [vmem:[#allocation2 + $0x20] sm:$0xf]  ;;  %v337_v57 = vpop.permute.xlu0 %336  ;;  %v363_v62 = vld [vmem:[#allocation2 + $0x10] sm:$0xf] }
  0x90   : > { %v370_v59 = vsel %vm1403_vm10, %v343_v55, %v369_v56  ;;  %v361_v60 = vsel %vm1403_vm10, %v337_v57, %v360_v58 }
  0x91   : > { %371 = vst [vmem:[#allocation2 + $0x20] sm:$0xf] %v370_v59  ;;  %362 = vst [vmem:[#allocation2 + $0x8] sm:$0xf] %v361_v60 }
  0x93   : > { %v339_v61 = vpop.permute.xlu1 %338  ;;  %v345_v3 = vpop.permute.xlu0 %344  ;;  %v375_v10 = vld [vmem:[#allocation2 + $0x30] sm:$0xf]  ;;  %v366_v12 = vld [vmem:[#allocation2 + $0x18] sm:$0xf] }
  0x94   : > { %v364_v4 = vsel %vm1403_vm10, %v339_v61, %v363_v62  ;;  %v373_v9 = vsel %vm1403_vm10, %v345_v3, %v372_v63 }
  0x95   : > { %365 = vst [vmem:[#allocation2 + $0x10] sm:$0xf] %v364_v4  ;;  %374 = vst [vmem:[#allocation2 + $0x28] sm:$0xf] %v373_v9 }
  0x97   : > { %v347_v11 = vpop.permute.xlu1 %346  ;;  %v341_v13 = vpop.permute.xlu0 %340 }
  0x98   : > { %v376_v14 = vsel %vm1403_vm10, %v347_v11, %v375_v10  ;;  %v367_v16 = vsel %vm1403_vm10, %v341_v13, %v366_v12  ;;  %v417_v21 = vld [vmem:[#allocation2 + $0x8] sm:$0xf]  ;;  %v426_v27 = vld [vmem:[#allocation2 + $0x20] sm:$0xf] }
  0x99   : > { %377 = vst [vmem:[#allocation2 + $0x30] sm:$0xf] %v376_v14  ;;  %368 = vst [vmem:[#allocation2 + $0x18] sm:$0xf] %v367_v16 }
  0x9b   : > { %v391_v19 = vpop.permute.xlu1 %390  ;;  %v389_v22 = vpop.permute.xlu0 %388 }
  0x9c   : > { %v418_v23 = vsel %vm1420_vm12, %v391_v19, %v417_v21  ;;  %v415_v24 = vsel %vm1420_vm12, %v389_v22, %v414_v18  ;;  %v429_v26 = vld [vmem:[#allocation2 + $0x28] sm:$0xf]  ;;  %v420_v37 = vld [vmem:[#allocation2 + $0x10] sm:$0xf] }
  0x9d   : > { %419 = vst [vmem:[#allocation2 + $0x8] sm:$0xf] %v418_v23  ;;  %416 = vst [vmem:[#allocation2] sm:$0xf] %v415_v24 }
  0x9f   : > { %v399_v25 = vpop.permute.xlu1 %398  ;;  %v397_v28 = vpop.permute.xlu0 %396 }
  0xa0   : > { %v430_v29 = vsel %vm1420_vm12, %v399_v25, %v429_v26  ;;  %v427_v7 = vsel %vm1420_vm12, %v397_v28, %v426_v27  ;;  %v432_v8 = vld [vmem:[#allocation2 + $0x30] sm:$0xf]  ;;  %v423_v44 = vld [vmem:[#allocation2 + $0x18] sm:$0xf] }
  0xa1   : > { %431 = vst [vmem:[#allocation2 + $0x28] sm:$0xf] %v430_v29  ;;  %428 = vst [vmem:[#allocation2 + $0x20] sm:$0xf] %v427_v7 }
  0xa3   : > { %v440_v31 = vpop.permute.xlu1 %439  ;;  %v292_v32 = vpop.permute.xlu0 %291 }
  0xa4   : > { %464 = vst.msk [vmem:[#allocation2] sm:$0xf] %vm463_vm13, %v440_v31 }
  0xa5   : > { %307 = vst.msk [vmem:[#allocation2 + $0x38] sm:$0xf] %vm300_vm8, %v292_v32 }
  0xa7   : > { %v448_v33 = vpop.permute.xlu1 %447  ;;  %v442_v36 = vpop.permute.xlu0 %441 }
  0xa8   : > { %468 = vst.msk [vmem:[#allocation2 + $0x20] sm:$0xf] %vm463_vm13, %v448_v33  ;;  %465 = vst.msk [vmem:[#allocation2 + $0x8] sm:$0xf] %vm463_vm13, %v442_v36 }
  0xab   : > { %v393_v38 = vpop.permute.xlu1 %392  ;;  %v450_v41 = vpop.permute.xlu0 %449  ;;  %v502_v54 = vld [vmem:[#allocation2] sm:$0xf] }
  0xac   : > { %v421_v42 = vsel %vm1420_vm12, %v393_v38, %v420_v37  ;;  %469 = vst.msk [vmem:[#allocation2 + $0x28] sm:$0xf] %vm463_vm13, %v450_v41  ;;  %v378_v48 = vld [vmem:[#allocation2 + $0x38] sm:$0xf] }
  0xad   : > { %422 = vst [vmem:[#allocation2 + $0x10] sm:$0xf] %v421_v42  ;;  %v1043_v42 = vld [vmem:[#allocation2 + $0x4] ss:$8 sps:$4 sm:$0xff]  }
  0xae   : > { %967 = vmatprep.mubr.msk.bf16.mxu0 %vm751_vm3, %v1043_v42 }
  0xaf   : > { %v401_v43 = vpop.permute.xlu1 %400  ;;  %v395_v45 = vpop.permute.xlu0 %394  ;;  %v505_v53 = vld [vmem:[#allocation2 + $0x8] sm:$0xf]  ;;  %v514_v20 = vld [vmem:[#allocation2 + $0x20] sm:$0xf] }
  0xb0   : > { %v433_v46 = vsel %vm1420_vm12, %v401_v43, %v432_v8  ;;  %v424_v2 = vsel %vm1420_vm12, %v395_v45, %v423_v44 }
  0xb1   : > { %434 = vst [vmem:[#allocation2 + $0x30] sm:$0xf] %v433_v46  ;;  %425 = vst [vmem:[#allocation2 + $0x18] sm:$0xf] %v424_v2 }
  0xb3   : > { %v444_v47 = vpop.permute.xlu1 %443  ;;  %v349_v49 = vpop.permute.xlu0 %348  ;;  %v517_v15 = vld [vmem:[#allocation2 + $0x28] sm:$0xf] }
  0xb4   : > { %466 = vst.msk [vmem:[#allocation2 + $0x10] sm:$0xf] %vm463_vm13, %v444_v47  ;;  %v379_v50 = vsel %vm1403_vm10, %v349_v49, %v378_v48  ;;  %v1046_v47 = vld [vmem:[#allocation2 + $0x24] ss:$8 sps:$4 sm:$0xff]  }
  0xb5   : > { %380 = vst [vmem:[#allocation2 + $0x38] sm:$0xf] %v379_v50  ;;  %969 = vmatprep.mubr.msk.bf16.mxu1 %vm751_vm3, %v1046_v47 }
  0xb7   : > { %v452_v30 = vpop.permute.xlu1 %451  ;;  %v446_v51 = vpop.permute.xlu0 %445 }
  0xb8   : > { %470 = vst.msk [vmem:[#allocation2 + $0x30] sm:$0xf] %vm463_vm13, %v452_v30  ;;  %467 = vst.msk [vmem:[#allocation2 + $0x18] sm:$0xf] %vm463_vm13, %v446_v51  ;;  %v1047_v30 = vld [vmem:[#allocation2 + $0x14] ss:$8 sps:$4 sm:$0xff]  }
  0xb9   : > { %v1049_v51 = vld [vmem:[#allocation2 + $0x34] ss:$8 sps:$4 sm:$0xff]  }
  0xbb   : > { %v479_v52 = vpop.permute.xlu1 %478  ;;  %v477_v35 = vpop.permute.xlu0 %476  ;;  %v508_v55 = vld [vmem:[#allocation2 + $0x10] sm:$0xf] }
  0xbc   : > { %v506_v34 = vsel %vm1449_vm15, %v479_v52, %v505_v53  ;;  %v503_v0 = vsel %vm1449_vm15, %v477_v35, %v502_v54  ;;  %v435_v57 = vld [vmem:[#allocation2 + $0x38] sm:$0xf] }
  0xbd   : > { %507 = vst [vmem:[#allocation2 + $0x8] sm:$0xf] %v506_v34  ;;  %504 = vst [vmem:[#allocation2] sm:$0xf] %v503_v0 }
  0xbf   : > { %v487_v5 = vpop.permute.xlu1 %486  ;;  %v485_v6 = vpop.permute.xlu0 %484  ;;  %v520_v61 = vld [vmem:[#allocation2 + $0x30] sm:$0xf]  ;;  %v511_v63 = vld [vmem:[#allocation2 + $0x18] sm:$0xf] }
  0xc0   : > { %v518_v39 = vsel %vm1449_vm15, %v487_v5, %v517_v15  ;;  %v515_v1 = vsel %vm1449_vm15, %v485_v6, %v514_v20 }
  0xc1   : > { %519 = vst [vmem:[#allocation2 + $0x28] sm:$0xf] %v518_v39  ;;  %516 = vst [vmem:[#allocation2 + $0x20] sm:$0xf] %v515_v1 }
  0xc3   : > { %v481_v56 = vpop.permute.xlu1 %480  ;;  %v403_v58 = vpop.permute.xlu0 %402 }
  0xc4   : > { %v509_v59 = vsel %vm1449_vm15, %v481_v56, %v508_v55  ;;  %v436_v60 = vsel %vm1420_vm12, %v403_v58, %v435_v57  ;;  %v552_v12 = vld [vmem:[#allocation2 + $0x8] sm:$0xf]  ;;  %v549_v13 = vld [vmem:[#allocation2] sm:$0xf] }
  0xc5   : > { %510 = vst [vmem:[#allocation2 + $0x10] sm:$0xf] %v509_v59  ;;  %437 = vst [vmem:[#allocation2 + $0x38] sm:$0xf] %v436_v60 }
  0xc7   : > { %v489_v62 = vpop.permute.xlu1 %488  ;;  %v483_v3 = vpop.permute.xlu0 %482 }
  0xc8   : > { %v521_v4 = vsel %vm1449_vm15, %v489_v62, %v520_v61  ;;  %v512_v9 = vsel %vm1449_vm15, %v483_v3, %v511_v63  ;;  %v564_v19 = vld [vmem:[#allocation2 + $0x28] sm:$0xf]  ;;  %v561_v21 = vld [vmem:[#allocation2 + $0x20] sm:$0xf] }
  0xc9   : > { %522 = vst [vmem:[#allocation2 + $0x30] sm:$0xf] %v521_v4  ;;  %513 = vst [vmem:[#allocation2 + $0x18] sm:$0xf] %v512_v9 }
  0xcb   : > { %v529_v11 = vpop.permute.xlu1 %528  ;;  %v527_v14 = vpop.permute.xlu0 %526 }
  0xcc   : > { %v553_v16 = vsel %vm1470_vm1, %v529_v11, %v552_v12  ;;  %v550_v17 = vsel %vm1470_vm1, %v527_v14, %v549_v13  ;;  %v555_v29 = vld [vmem:[#allocation2 + $0x10] sm:$0xf] }
  0xcd   : > { %554 = vst [vmem:[#allocation2 + $0x8] sm:$0xf] %v553_v16  ;;  %551 = vst [vmem:[#allocation2] sm:$0xf] %v550_v17 }
  0xcf   : > { %v537_v18 = vpop.permute.xlu1 %536  ;;  %v535_v22 = vpop.permute.xlu0 %534 }
  0xd0   : > { %v565_v23 = vsel %vm1470_vm1, %v537_v18, %v564_v19  ;;  %v562_v24 = vsel %vm1470_vm1, %v535_v22, %v561_v21  ;;  %v567_v33 = vld [vmem:[#allocation2 + $0x30] sm:$0xf]  ;;  %v558_v36 = vld [vmem:[#allocation2 + $0x18] sm:$0xf] }
  0xd1   : > { %566 = vst [vmem:[#allocation2 + $0x28] sm:$0xf] %v565_v23  ;;  %563 = vst [vmem:[#allocation2 + $0x20] sm:$0xf] %v562_v24 }
  0xd3   : > { %v571_v25 = vpop.permute.xlu1 %570  ;;  %v454_v26 = vpop.permute.xlu0 %453 }
  0xd4   : > { %592 = vst.msk [vmem:[#allocation2] sm:$0xf] %vm591_vm2, %v571_v25 }
  0xd5   : > { %471 = vst.msk [vmem:[#allocation2 + $0x38] sm:$0xf] %vm463_vm13, %v454_v26 }
  0xd7   : > { %v579_v27 = vpop.permute.xlu1 %578  ;;  %v573_v28 = vpop.permute.xlu0 %572 }
  0xd8   : > { %596 = vst.msk [vmem:[#allocation2 + $0x20] sm:$0xf] %vm591_vm2, %v579_v27  ;;  %593 = vst.msk [vmem:[#allocation2 + $0x8] sm:$0xf] %vm591_vm2, %v573_v28 }
  0xdb   : > { %v531_v7 = vpop.permute.xlu1 %530  ;;  %v581_v31 = vpop.permute.xlu0 %580 }
  0xdc   : > { %v556_v32 = vsel %vm1470_vm1, %v531_v7, %v555_v29  ;;  %597 = vst.msk [vmem:[#allocation2 + $0x28] sm:$0xf] %vm591_vm2, %v581_v31  ;;  %v523_v44 = vld [vmem:[#allocation2 + $0x38] sm:$0xf] }
  0xdd   : > { %557 = vst [vmem:[#allocation2 + $0x10] sm:$0xf] %v556_v32 }
  0xdf   : > { %v539_v37 = vpop.permute.xlu1 %538  ;;  %v533_v38 = vpop.permute.xlu0 %532  ;;  %v1041_v41 = vld [vmem:[#allocation2] ss:$8 sps:$4 sm:$0xff]  }
  0xe0   : > { %v568_v8 = vsel %vm1470_vm1, %v539_v37, %v567_v33  ;;  %v559_v43 = vsel %vm1470_vm1, %v533_v38, %v558_v36  ;;  %797 = vmatmul.mubr.bf16.vlgmr.msra.gmra.mrb[0].mxu0 %v1041_v41 }
  0xe1   : > { %569 = vst [vmem:[#allocation2 + $0x30] sm:$0xf] %v568_v8  ;;  %560 = vst [vmem:[#allocation2 + $0x18] sm:$0xf] %v559_v43  ;;  %968 = vmatprep.mubr.msk.bf16.mxu0 %vm751_vm3, %v1047_v30 }
  0xe3   : > { %v575_v45 = vpop.permute.xlu1 %574  ;;  %v491_v46 = vpop.permute.xlu0 %490  ;;  %v1044_v2 = vld [vmem:[#allocation2 + $0x20] ss:$8 sps:$4 sm:$0xff]  }
  0xe4   : > { %594 = vst.msk [vmem:[#allocation2 + $0x10] sm:$0xf] %vm591_vm2, %v575_v45  ;;  %v524_v48 = vsel %vm1449_vm15, %v491_v46, %v523_v44  ;;  %813 = vmatmul.mubr.bf16.vlgmr.msra.gmra.mrb[0].mxu1 %v1044_v2 }
  0xe5   : > { %525 = vst [vmem:[#allocation2 + $0x38] sm:$0xf] %v524_v48  ;;  %970 = vmatprep.mubr.msk.bf16.mxu1 %vm751_vm3, %v1049_v51 }
  0xe7   : > { %v583_v49 = vpop.permute.xlu1 %582  ;;  %v577_v50 = vpop.permute.xlu0 %576 }
  0xe8   : > { %598 = vst.msk [vmem:[#allocation2 + $0x30] sm:$0xf] %vm591_vm2, %v583_v49  ;;  %595 = vst.msk [vmem:[#allocation2 + $0x18] sm:$0xf] %vm591_vm2, %v577_v50 }
  0xef   : > { %v1051_v52 = vld [vmem:[#allocation2 + $0x10] ss:$8 sps:$4 sm:$0xff]  }
  0xf0   : > { %v1052_v53 = vld [vmem:[#allocation2 + $0x30] ss:$8 sps:$4 sm:$0xff]   ;;  %805 = vmatmul.mubr.bf16.gmra.mrb[4].mxu0 %v1051_v52 }
  0xf1   : > { %821 = vmatmul.mubr.bf16.gmra.mrb[4].mxu1 %v1052_v53 }
 0x1b3   : > { %v798_v54 = vpop.f32.mrb[0].mxu0 }
 0x1b4   : > { %v799_v35 = vadd.f32 %v949_v40, %v798_v54  ;;  %v800_v34 = vpop.f32.mrb[1].mxu0 }
 0x1b5   : > { %v801_v0 = vpop.f32.mrb[2].mxu0 }
 0x1b6   : > { %v837_v5 = vmul.f32 0.70710677, %v799_v35  ;;  %v802_v15 = vadd.f32 %v949_v40, %v801_v0  ;;  %v803_v20 = vpop.f32.mrb[3].mxu0  ;;  %v829_v11 = vmul.f32 0.5, %v799_v35 }
 0x1b7   : > { %v814_v6 = vpop.f32.mrb[0].mxu1 }
 0x1b8   : > { %1053 = verf.f32 %v837_v5  ;;  %v838_v39 = vmul.f32 0.70710677, %v802_v15  ;;  %v815_v1 = vadd.f32 %v949_v40, %v814_v6  ;;  %v816_v55 = vpop.f32.mrb[1].mxu1  ;;  %v830_v12 = vmul.f32 0.5, %v802_v15 }
 0x1b9   : > { %v817_v56 = vpop.f32.mrb[2].mxu1 }
 0x1ba   : > { %1055 = verf.f32 %v838_v39  ;;  %v841_v57 = vmul.f32 0.70710677, %v815_v1  ;;  %v818_v58 = vadd.f32 %v949_v40, %v817_v56  ;;  %v819_v59 = vpop.f32.mrb[3].mxu1  ;;  %v833_v7 = vmul.f32 0.5, %v815_v1 }
 0x1bc   : > { %1057 = verf.f32 %v841_v57  ;;  %v842_v60 = vmul.f32 0.70710677, %v818_v58  ;;  %v834_v36 = vmul.f32 0.5, %v818_v58 }
 0x1be   : > { %1059 = verf.f32 %v842_v60 }
 0x1c2   : > { %v1054_v61 = vpop.eup %1053 }
 0x1c3   : > { %v853_v62 = vadd.f32 1.0, %v1054_v61  ;;  %v806_v63 = vpop.f32.mrb[4].mxu0 }
 0x1c4   : > { %v1056_v3 = vpop.eup %1055  ;;  %v807_v4 = vadd.f32 %v949_v40, %v806_v63  ;;  %v822_v9 = vpop.f32.mrb[4].mxu1 }
 0x1c5   : > { %v808_v10 = vpop.f32.mrb[5].mxu0  ;;  %v854_v13 = vadd.f32 1.0, %v1056_v3  ;;  %v823_v14 = vadd.f32 %v949_v40, %v822_v9  ;;  %v824_v16 = vpop.f32.mrb[5].mxu1  ;;  %v861_v24 = vmul.f32 %v853_v62, %v829_v11 }
 0x1c6   : > { %v809_v17 = vpop.f32.mrb[6].mxu0  ;;  %v1058_v18 = vpop.eup %1057  ;;  %v839_v19 = vmul.f32 0.70710677, %v807_v4  ;;  %v831_v2 = vmul.f32 0.5, %v807_v4 }
 0x1c7   : > { %v810_v21 = vadd.f32 %v949_v40, %v809_v17  ;;  %v825_v22 = vpop.f32.mrb[6].mxu1  ;;  %v811_v23 = vpop.f32.mrb[7].mxu0  ;;  %v862_v25 = vmul.f32 %v854_v13, %v830_v12  ;;  %v857_v26 = vadd.f32 1.0, %v1058_v18  ;;  %v843_v27 = vmul.f32 0.70710677, %v823_v14 }
 0x1c8   : > { %v827_v28 = vpop.f32.mrb[7].mxu1  ;;  %v1060_v29 = vpop.eup %1059  ;;  %1061 = verf.f32 %v839_v19  ;;  %v826_v32 = vadd.f32 %v949_v40, %v825_v22  ;;  %v835_v30 = vmul.f32 0.5, %v823_v14 }
 0x1c9   : > { %v840_v31 = vmul.f32 0.70710677, %v810_v21  ;;  %v978_v33 = vpack.c.bf16 %v862_v25, %v861_v24  ;;  %v858_v37 = vadd.f32 1.0, %v1060_v29  ;;  %1063 = verf.f32 %v843_v27 }
 0x1ca   : > { %v844_v38 = vmul.f32 0.70710677, %v826_v32  ;;  %v865_v41 = vmul.f32 %v857_v26, %v833_v7  ;;  %v832_v48 = vmul.f32 0.5, %v810_v21  ;;  %v836_v53 = vmul.f32 0.5, %v826_v32 }
 0x1cb   : > { %1065 = verf.f32 %v840_v31  ;;  %979 = vst [vmem:[%s1510_s23] sm:$0xff] %v978_v33   ;;  %v866_v42 = vmul.f32 %v858_v37, %v834_v36 }
 0x1cc   : > { %1067 = verf.f32 %v844_v38 }
 0x1cd   : > { %v988_v8 = vpack.c.bf16 %v866_v42, %v865_v41 }
 0x1cf   : > { %996 = vst [vmem:[%s1510_s23 + $0x10] sm:$0xff] %v988_v8  }
 0x1d2   : > { %v1062_v43 = vpop.eup %1061 }
 0x1d3   : > { %v1064_v44 = vpop.eup %1063  ;;  %v855_v45 = vadd.f32 1.0, %v1062_v43 }
 0x1d4   : > { %v859_v47 = vadd.f32 1.0, %v1064_v44 }
 0x1d5   : > { %v1066_v46 = vpop.eup %1065  ;;  %v863_v51 = vmul.f32 %v855_v45, %v831_v2 }
 0x1d6   : > { %v856_v49 = vadd.f32 1.0, %v1066_v46  ;;  %v1068_v50 = vpop.eup %1067  ;;  %v867_v54 = vmul.f32 %v859_v47, %v835_v30 }
 0x1d7   : > { %v860_v40 = vadd.f32 1.0, %v1068_v50 }
 0x1d8   : > { %v864_v52 = vmul.f32 %v856_v49, %v832_v48 }
 0x1d9   : > { %v868_v34 = vmul.f32 %v860_v40, %v836_v53 }
 0x1da   : > { %v983_v35 = vpack.c.bf16 %v864_v52, %v863_v51 }
 0x1db   : > { %v993_v0 = vpack.c.bf16 %v868_v34, %v867_v54 }
 0x1dc   : > { %995 = vst [vmem:[%s1510_s23 + $0x8] sm:$0xff] %v983_v35  }
 0x1dd   : > { %997 = vst [vmem:[%s1510_s23 + $0x18] sm:$0xff] %v993_v0  }
 0x1de PF: > { %s13_s12 = sadd.s32 1, %s1075_s12  }
 0x1df   : > { %p10_p4 = scmp.ge.s32.totalorder %s13_s12, 4  }
 0x1e1   :  { %12 = sbr.rel (!%p10_p4) target bundleno = 1 (0x1), region = 63 }

// kernel: cfb_fwd.29
= control target key start
LH: loop header
LB: loop body
LE: loop exit
PB: predicated region body
PF: predicated region fallthrough
CT: control target
= control target key end

     0   :  { %s820_s18 = smov 0   ;;  %s822_s19 = smov 0   ;;  %s890_s0 = inlined_call_operand.vmem [shape: bf16[128,64], index: 0, kind: input, shape index: {}]   ;;  %s891_s1 = inlined_call_operand.vmem [shape: bf16[64,16], index: 1, kind: input, shape index: {}]   ;;  %s892_s2 = inlined_call_operand.vmem [shape: f32[1,16], index: 2, kind: input, shape index: {}]   ;;  %s893_s3 = inlined_call_operand.vmem [shape: f32[1,64], index: 3, kind: input, shape index: {}]   ;;  %s894_s4 = inlined_call_operand.vmem [shape: f32[1,64], index: 4, kind: input, shape index: {}]   ;;  %s895_s5 = inlined_call_operand.vmem [shape: f32[128,16], index: 5, kind: output, shape index: {}]  }
   0x1   :  { %s824_s20 = smov 0  }
   0x2 LB: > { %s34_s21 = sadd.s32 1, %s784_s19  ;;  %p669_p0 = scmp.ge.s32.totalorder %s788_s20, 1  ;;  %s788_s20 = sphi %s824_s20, %s15_s20   ;;  %s784_s19 = sphi %s822_s19, %s897_s19   ;;  %s780_s18 = sphi %s820_s18, %s896_s18  }
   0x3   : > { %p36_p1 = scmp.ge.s32.totalorder %s34_s21, 2  ;;  %p254_p2 = scmp.lt.s32.totalorder %s788_s20, 3 }
   0x5   : > { %s899_s21 = smov (%p36_p1, %s34_s21), 0  ;;  %p255_p3 = pnand %p669_p0, %p254_p2 }
   0x6   : > { %v762_v0 = vld [vmem:[%s891_s1] sm:$0xff] (!%p255_p3)   ;;  %s670_s24 = sshll.u32 (!%p255_p3), %s780_s18, 3  ;;  %v763_v1 = vld [vmem:[%s891_s1 + $0x8] sm:$0xff] (!%p255_p3)   ;;  %v764_v2 = vld [vmem:[%s891_s1 + $0x10] sm:$0xff] (!%p255_p3)   ;;  %vm439_vm0 = vcmask (!%p255_p3), 523264   ;;  %vm517_vm1 = vcmask (!%p255_p3), 130048  }
   0x7   : > { %258 = sbr.rel (%p255_p3) target bundleno = 247 (0xf7), region = 40  ;;  %p306_p4 = scmp.lt.s32.totalorder (!%p255_p3), %s670_s24, 15  ;;  %714 = vmatprep.subr.bf16.mxu0 (!%p255_p3), %v762_v0  ;;  %730 = vmatprep.subr.bf16.mxu1 (!%p255_p3), %v762_v0  ;;  %v674_v3 = vld [vmem:[%s893_s3] ss:$0 sm:$0xff] (!%p255_p3)  ;;  %v765_v7 = vld [vmem:[%s891_s1 + $0x18] sm:$0xff] (!%p255_p3)  }
   0x8   : > { %715 = vmatpush3.bf16.msra.mxu0 (!%p255_p3), %v762_v0  ;;  %734 = vmatpush3.bf16.msra.mxu1 (!%p255_p3), %v762_v0  ;;  %v675_v13 = vld [vmem:[%s894_s4] ss:$0 sm:$0xff] (!%p255_p3) }
   0x9   : > { %716 = vmatprep.subr.bf16.mxu0 (!%p255_p3), %v763_v1  ;;  %731 = vmatprep.subr.bf16.mxu1 (!%p255_p3), %v763_v1  ;;  %v676_v46 = vld [vmem:[%s892_s2] ss:$0 sm:$0xff] (!%p255_p3) }
   0xc   : > { %717 = vmatpush3.bf16.msra.mxu0 (!%p255_p3), %v763_v1  ;;  %735 = vmatpush3.bf16.msra.mxu1 (!%p255_p3), %v763_v1 }
   0xd   : > { %718 = vmatprep.subr.bf16.mxu0 (!%p255_p3), %v764_v2  ;;  %732 = vmatprep.subr.bf16.mxu1 (!%p255_p3), %v764_v2 }
   0xe   : > { %s901_s24 = smov (!%p306_p4, %s670_s24), 15 }
   0xf   : > { %s671_s29 = sshll.u32 %s901_s24, 2  ;;  %s673_s14 = sshll.u32 %s901_s24, 3 }
  0x10   : > { %s312_s7 = scalar_lea.vmem %s890_s0, %s671_s29  ;;  %719 = vmatpush3.bf16.msra.mxu0 %v764_v2  ;;  %736 = vmatpush3.bf16.msra.mxu1 %v764_v2  ;;  %s339_s22 = scalar_lea.vmem %s895_s5, %s673_s14 }
  0x11   : > { %v688_v4 = vld [vmem:[%s312_s7] sm:$0xff]   ;;  %v704_v5 = vld [vmem:[%s312_s7 + $0x10] sm:$0xff]   ;;  %v703_v6 = vld [vmem:[%s312_s7 + $0x8] sm:$0xff]   ;;  %720 = vmatprep.subr.bf16.mxu0 %v765_v7  ;;  %733 = vmatprep.subr.bf16.mxu1 %v765_v7 }
  0x12   : > { %v689_v8 = vunpack.c.l.bf16 %v688_v4  ;;  %v690_v9 = vunpack.c.h.bf16 %v688_v4  ;;  %v697_v10 = vunpack.c.l.bf16 %v704_v5  ;;  %v698_v11 = vunpack.c.h.bf16 %v704_v5  ;;  %v705_v12 = vld [vmem:[%s312_s7 + $0x18] sm:$0xff]  }
  0x13   : > { %v693_v14 = vunpack.c.l.bf16 %v703_v6  ;;  %v694_v15 = vunpack.c.h.bf16 %v703_v6  ;;  %v701_v16 = vunpack.c.l.bf16 %v705_v12  ;;  %v702_v17 = vunpack.c.h.bf16 %v705_v12 }
  0x14   : > { %v365_v18 = vmul.f32 %v689_v8, %v674_v3  ;;  %v366_v19 = vmul.f32 %v690_v9, %v674_v3  ;;  %v369_v20 = vmul.f32 %v697_v10, %v674_v3  ;;  %v370_v21 = vmul.f32 %v698_v11, %v674_v3  ;;  %721 = vmatpush3.bf16.msra.mxu0 %v765_v7 }
  0x15   : > { %v367_v22 = vmul.f32 %v693_v14, %v674_v3  ;;  %v368_v23 = vmul.f32 %v694_v15, %v674_v3  ;;  %v371_v24 = vmul.f32 %v701_v16, %v674_v3  ;;  %v372_v31 = vmul.f32 %v702_v17, %v674_v3  ;;  %737 = vmatpush3.bf16.msra.mxu1 %v765_v7 }
  0x16   : > { %v380_v25 = vadd.f32 %v675_v13, %v365_v18  ;;  %v381_v26 = vadd.f32 %v675_v13, %v366_v19  ;;  %v384_v27 = vadd.f32 %v675_v13, %v369_v20  ;;  %v385_v28 = vadd.f32 %v675_v13, %v370_v21 }
  0x17   : > { %v382_v29 = vadd.f32 %v675_v13, %v367_v22  ;;  %v383_v30 = vadd.f32 %v675_v13, %v368_v23  ;;  %v386_v35 = vadd.f32 %v675_v13, %v371_v24  ;;  %v387_v39 = vadd.f32 %v675_v13, %v372_v31 }
  0x18   : > { %v388_v32 = vmax.f32 %v380_v25, 0.0  ;;  %v389_v33 = vmax.f32 %v381_v26, 0.0  ;;  %v392_v34 = vmax.f32 %v384_v27, 0.0  ;;  %v393_v36 = vmax.f32 %v385_v28, 0.0 }
  0x19   : > { %v390_v37 = vmax.f32 %v382_v29, 0.0  ;;  %v391_v38 = vmax.f32 %v383_v30, 0.0  ;;  %v394_v41 = vmax.f32 %v386_v35, 0.0  ;;  %v395_v44 = vmax.f32 %v387_v39, 0.0 }
  0x1a   : > { %v396_v40 = vpack.c.bf16 %v389_v33, %v388_v32  ;;  %v398_v42 = vpack.c.bf16 %v393_v36, %v392_v34 }
  0x1b   : > { %v397_v43 = vpack.c.bf16 %v391_v38, %v390_v37  ;;  %v399_v45 = vpack.c.bf16 %v395_v44, %v394_v41 }
  0x1c   : > { %722 = vmatprep.mubr.msk.bf16.mxu0 %vm439_vm0, %v396_v40  ;;  %726 = vmatprep.mubr.msk.bf16.mxu1 %vm439_vm0, %v398_v42 }
  0x1d   : > { %723 = vmatmul.mubr.msk.bf16.vlgmr.msra.gmra.mrb[0].mxu0 %vm439_vm0, %v397_v43  ;;  %727 = vmatmul.mubr.msk.bf16.vlgmr.msra.gmra.mrb[0].mxu1 %vm439_vm0, %v399_v45 }
  0xf0   : > { %v724_v47 = vpop.f32.mrb[0].mxu0  ;;  %v728_v50 = vpop.f32.mrb[0].mxu1 }
  0xf1   : > { %v495_v48 = vadd.f32 %v724_v47, %v676_v46  ;;  %v486_v49 = vpop.f32.mrb[1].mxu0  ;;  %v511_v53 = vadd.f32 %v728_v50, %v676_v46  ;;  %v502_v54 = vpop.f32.mrb[1].mxu1 }
  0xf2   : > { %v487_v51 = vadd.f32 %v676_v46, %v486_v49  ;;  %v725_v52 = vpop.f32.mrb[2].mxu0  ;;  %v503_v57 = vadd.f32 %v676_v46, %v502_v54  ;;  %v729_v58 = vpop.f32.mrb[2].mxu1 }
  0xf3   : > { %520 = vst.msk [vmem:[%s339_s22 + $0x10] sm:$0xff] %vm517_vm1, %v495_v48  ;;  %v498_v55 = vadd.f32 %v725_v52, %v676_v46  ;;  %v489_v56 = vpop.f32.mrb[3].mxu0  ;;  %524 = vst.msk [vmem:[%s339_s22 + $0x30] sm:$0xff] %vm517_vm1, %v511_v53  ;;  %v514_v60 = vadd.f32 %v729_v58, %v676_v46  ;;  %v505_v61 = vpop.f32.mrb[3].mxu1 }
  0xf4   : > { %518 = vst.msk [vmem:[%s339_s22] sm:$0xff] %vm517_vm1, %v487_v51  ;;  %v490_v59 = vadd.f32 %v676_v46, %v489_v56  ;;  %522 = vst.msk [vmem:[%s339_s22 + $0x20] sm:$0xff] %vm517_vm1, %v503_v57  ;;  %v506_v62 = vadd.f32 %v676_v46, %v505_v61 }
  0xf5   : > { %521 = vst.msk [vmem:[%s339_s22 + $0x18] sm:$0xff] %vm517_vm1, %v498_v55  ;;  %525 = vst.msk [vmem:[%s339_s22 + $0x38] sm:$0xff] %vm517_vm1, %v514_v60 }
  0xf6   : > { %519 = vst.msk [vmem:[%s339_s22 + $0x8] sm:$0xff] %vm517_vm1, %v490_v59  ;;  %523 = vst.msk [vmem:[%s339_s22 + $0x28] sm:$0xff] %vm517_vm1, %v506_v62 }
  0xf7 PF: > { %s15_s20 = sadd.s32 1, %s788_s20   ;;  %s896_s18 = smov %s784_s19 }
  0xf8   : > { %p12_p5 = scmp.ge.s32.totalorder %s15_s20, 4   ;;  %s897_s19 = smov %s899_s21 }
  0xfa   :  { %14 = sbr.rel (!%p12_p5) target bundleno = 2 (0x2), region = 82 }

// kernel: cfb_fwd.28
= control target key start
LH: loop header
LB: loop body
LE: loop exit
PB: predicated region body
PF: predicated region fallthrough
CT: control target
= control target key end

     0   :  { %s1252_s18 = smov 0   ;;  %s1717_s0 = inlined_call_operand.vmem [shape: f32[2,8,8,16], index: 0, kind: input, shape index: {}]   ;;  %s1718_s1 = inlined_call_operand.vmem [shape: bf16[144,64], index: 1, kind: input, shape index: {}]   ;;  %s1719_s2 = inlined_call_operand.vmem [shape: f32[1,64], index: 2, kind: input, shape index: {}]   ;;  %s1720_s3 = inlined_call_operand.vmem [shape: bf16[2,8,8,64], index: 3, kind: output, shape index: {0}]   ;;  %s1721_s4 = inlined_call_operand.vmem [shape: f32[2,1,64], index: 4, kind: output, shape index: {1}]   ;;  %s1722_s5 = inlined_call_operand.vmem [shape: f32[2,1,64], index: 5, kind: output, shape index: {2}]  }
   0x1 LB: > { %s1100_s19 = sadd.s32 4294967295, %s1212_s18   ;;  %p1104_p0 = scmp.ge.s32.totalorder %s1212_s18, 1  ;;  %s1212_s18 = sphi %s1252_s18, %s16_s18  }
   0x2   : > { %p192_p1 = scmp.lt.s32.totalorder %s1212_s18, 3 }
   0x4   : > { %p193_p2 = pnand %p1104_p0, %p192_p1 }
   0x5   : > { %p226_p3 = scmp.lt.s32.totalorder (!%p193_p2), %s1100_s19, 1  ;;  %vm251_vm0 = vcmask (!%p193_p2), 1043456   ;;  %vm252_vm1 = vcmask (!%p193_p2), 130052   ;;  %v1214_v0 = vmov (!%p193_p2), 0   ;;  %vm450_vm3 = vsmask.f32 (!%p193_p2), 3328 }
   0x6   : > { %196 = sbr.rel (%p193_p2) target bundleno = 480 (0x1e0), region = 32  ;;  %vm253_vm2 = vmor (!%p193_p2), %vm252_vm1, %vm251_vm0  ;;  %859 = vmatprep.subr.bf16.mxu0 (!%p193_p2), %v1214_v0  ;;  %1151 = vmatprep.subr.bf16.mxu1 (!%p193_p2), %v1214_v0  ;;  %vm347_vm4 = vcmask (!%p193_p2), 125952   ;;  %vm348_vm5 = vsmask.f32 (!%p193_p2), 7938  ;;  %s1215_s24 = smov (!%p193_p2), 16   ;;  %v1193_v35 = vld [vmem:[%s1718_s1 + $0x40] sm:$0xff] (!%p193_p2)  }
   0x7   : > { %255 = vst.msk [vmem:[#allocation2 + $0x8] sm:$0xff] (!%p193_p2), %vm253_vm2, %v1214_v0  ;;  %254 = vst.msk [vmem:[#allocation2] sm:$0xff] (!%p193_p2), %vm253_vm2, %v1214_v0  ;;  %s1216_s25 = smov (!%p193_p2), 32   ;;  %s1217_s26 = smov (!%p193_p2), 48   ;;  %vm392_vm8 = vcmask (!%p193_p2), 257152   ;;  %vm449_vm9 = vcmask (!%p193_p2), 388352  }
   0x8   : > { %256 = vst.msk [vmem:[#allocation2 + $0x10] sm:$0xff] (!%p193_p2), %vm253_vm2, %v1214_v0  ;;  %257 = vst.msk [vmem:[#allocation2 + $0x18] sm:$0xff] (!%p193_p2), %vm253_vm2, %v1214_v0  ;;  %s1218_s27 = smov (!%p193_p2), 64   ;;  %s1219_s11 = smov (!%p193_p2), 80   ;;  %vm508_vm11 = vcmask (!%p193_p2), 519552   ;;  %vm558_vm13 = vcmask (!%p193_p2), 650752  }
   0x9   : > { %258 = vst.msk [vmem:[#allocation2 + $0x20] sm:$0xff] (!%p193_p2), %vm253_vm2, %v1214_v0  ;;  %259 = vst.msk [vmem:[#allocation2 + $0x28] sm:$0xff] (!%p193_p2), %vm253_vm2, %v1214_v0  ;;  %vm595_vm14 = vcmask (!%p193_p2), 781952   ;;  %vm642_vm0 = vcmask (!%p193_p2), 913152  }
   0xa   : > { %260 = vst.msk [vmem:[#allocation2 + $0x30] sm:$0xff] (!%p193_p2), %vm253_vm2, %v1214_v0  ;;  %261 = vst.msk [vmem:[#allocation2 + $0x38] sm:$0xff] (!%p193_p2), %vm253_vm2, %v1214_v0  ;;  %vm686_vm2 = vcmask (!%p193_p2), 1044352  }
   0xb   : > { %vm1320_vm6 = vmand (!%p193_p2), %vm347_vm4, %vm450_vm3 }
   0xc   : > { %vm1330_vm7 = vmand (!%p193_p2), %vm347_vm4, %vm348_vm5  ;;  %vm924_vm4 = vcmask (!%p193_p2), 523264  }
   0xd   : > { %s1736_s19 = smov (!%p226_p3, %s1100_s19), 1  ;;  %vm1554_vm10 = vmand %vm449_vm9, %vm450_vm3 }
   0xe   : > { %s1141_s20 = sshll.u32 %s1736_s19, 6  ;;  %v705_v31 = vld [vmem:[#allocation2 + $0xc] sm:$0xf]  ;;  %v350_v39 = vld [vmem:[#allocation2 + $0x8] sm:$0xf]  ;;  %vm1569_vm12 = vmand %vm508_vm11, %vm348_vm5  ;;  %s1142_s28 = sshll.u32 %s1736_s19, 5 }
   0xf   : > { %s1276_s23 = scalar_lea.vmem %s1717_s0, %s1141_s20  ;;  %v708_v37 = vld [vmem:[#allocation2 + $0x14] sm:$0xf]  ;;  %v353_v46 = vld [vmem:[#allocation2 + $0x10] sm:$0xf]  ;;  %v711_v54 = vld [vmem:[#allocation2 + $0x1c] sm:$0xf]  ;;  %s1665_s6 = scalar_lea.vmem %s1720_s3, %s1142_s28 }
  0x10   : > { %v245_v1 = vld [vmem:[%s1276_s23 + $0x10] sm:$0xff]  ;;  %v243_v2 = vld [vmem:[%s1276_s23] sm:$0xff]  ;;  %v246_v3 = vld [vmem:[%s1276_s23 + $0x18] sm:$0xff]  ;;  %s238_s9 = scalar_lea.vmem %s1721_s4, %s1736_s19  ;;  %s241_s12 = scalar_lea.vmem %s1722_s5, %s1736_s19 }
  0x11   : > { %v1281_v4 = vpack.c.bf16 %v245_v1, %v245_v1  ;;  %v1283_v5 = vpack.c.bf16 %v243_v2, %v243_v2  ;;  %v244_v6 = vld [vmem:[%s1276_s23 + $0x8] sm:$0xff]  ;;  %v247_v7 = vld [vmem:[%s1276_s23 + $0x20] sm:$0xff]  ;;  %v1288_v9 = vpack.c.bf16 %v246_v3, %v246_v3  ;;  %v249_v51 = vld [vmem:[%s1276_s23 + $0x30] sm:$0xff] }
  0x12   : > { %v248_v8 = vld [vmem:[%s1276_s23 + $0x28] sm:$0xff]  ;;  %v1290_v10 = vpack.c.bf16 %v244_v6, %v244_v6  ;;  %v1292_v11 = vpack.c.bf16 %v247_v7, %v247_v7  ;;  %v356_v57 = vld [vmem:[#allocation2 + $0x18] sm:$0xf]  ;;  %v359_v62 = vld [vmem:[#allocation2 + $0x20] sm:$0xf] }
  0x13   : > { %v1294_v12 = vpack.c.bf16 %v248_v8, %v248_v8  ;;  %375 = vrot.lane.b32.xlu1 %v1281_v4, %s1215_s24  ;;  %371 = vrot.lane.b32.xlu0 %v1283_v5, %s1215_s24  ;;  %v291_v13 = vshrl.u32 %v1283_v5, 16  ;;  %v294_v14 = vshll.u32 %v1283_v5, 16  ;;  %v305_v15 = vshrl.u32 %v1281_v4, 16  ;;  %v250_v63 = vld [vmem:[%s1276_s23 + $0x38] sm:$0xff]  ;;  %v362_v7 = vld [vmem:[#allocation2 + $0x28] sm:$0xf]  ;;  %vm1596_vm15 = vmand %vm595_vm14, %vm450_vm3 }
  0x14   : > { %v308_v16 = vshll.u32 %v1281_v4, 16  ;;  %v298_v17 = vshrl.u32 %v1290_v10, 16  ;;  %v301_v18 = vshll.u32 %v1290_v10, 16  ;;  %v312_v19 = vshrl.u32 %v1288_v9, 16  ;;  %v714_v8 = vld [vmem:[#allocation2 + $0x24] sm:$0xf]  ;;  %vm1619_vm1 = vmand %vm642_vm0, %vm348_vm5 }
  0x15   : > { %v315_v20 = vshll.u32 %v1288_v9, 16  ;;  %v400_v21 = vrot.slane %v291_v13, 4  ;;  %v401_v22 = vrot.slane %v294_v14, 5  ;;  %v408_v23 = vrot.slane %v305_v15, 4 }
  0x16   : > { %v409_v24 = vrot.slane %v308_v16, 5  ;;  %v404_v25 = vrot.slane %v298_v17, 4  ;;  %v405_v26 = vrot.slane %v301_v18, 5  ;;  %v412_v27 = vrot.slane %v312_v19, 4 }
  0x17   : > { %v413_v28 = vrot.slane %v315_v20, 5  ;;  %377 = vrot.lane.b32.xlu1 %v1288_v9, %s1215_s24  ;;  %373 = vrot.lane.b32.xlu0 %v1290_v10, %s1215_s24  ;;  %v402_v29 = vor.u32 %v401_v22, %v400_v21  ;;  %v319_v32 = vshrl.u32 %v1292_v11, 16  ;;  %v322_v33 = vshll.u32 %v1292_v11, 16 }
  0x18   : > { %v410_v30 = vor.u32 %v409_v24, %v408_v23  ;;  %v406_v34 = vor.u32 %v405_v26, %v404_v25  ;;  %v293_v38 = vrot.slane %v291_v13, 7  ;;  %v300_v40 = vrot.slane %v298_v17, 7 }
  0x19   : > { %v414_v36 = vor.u32 %v413_v28, %v412_v27  ;;  %v1324_v41 = vrot.slane %v402_v29, 4  ;;  %v416_v43 = vrot.slane %v319_v32, 4  ;;  %v417_v44 = vrot.slane %v322_v33, 5 }
  0x1a   : > { %v1326_v42 = vrot.slane %v410_v30, 4  ;;  %v1334_v47 = vrot.slane %v406_v34, 4  ;;  %v1338_v49 = vor.u32 %v294_v14, %v293_v38  ;;  %v1340_v50 = vor.u32 %v301_v18, %v300_v40  ;;  %v368_v34 = vld [vmem:[#allocation2 + $0x38] sm:$0xf] }
  0x1b   : > { %v1336_v48 = vrot.slane %v414_v36, 4  ;;  %379 = vrot.lane.b32.xlu0 %v1292_v11, %s1215_s24  ;;  %428 = vrot.lane.b32.xlu1 %v1324_v41, %s1216_s25  ;;  %v418_v53 = vor.u32 %v417_v44, %v416_v43  ;;  %v326_v55 = vshrl.u32 %v1294_v12, 16  ;;  %v329_v56 = vshll.u32 %v1294_v12, 16 }
  0x1c   : > { %v706_v52 = vsel %vm1320_vm6, %v1326_v42, %v705_v31  ;;  %v351_v59 = vsel %vm1330_vm7, %v1338_v49, %v350_v39  ;;  %v354_v60 = vsel %vm1330_vm7, %v1340_v50, %v353_v46  ;;  %v307_v61 = vrot.slane %v305_v15, 7 }
  0x1d   : > { %707 = vst [vmem:[#allocation2 + $0xc] sm:$0xf] %v706_v52  ;;  %v709_v58 = vsel %vm1320_vm6, %v1336_v48, %v708_v37  ;;  %v1362_v1 = vrot.slane %v418_v53, 4  ;;  %352 = vst [vmem:[#allocation2 + $0x8] sm:$0xf] %v351_v59  ;;  %v420_v2 = vrot.slane %v326_v55, 4  ;;  %v1368_v18 = vpack.c.bf16 %v249_v51, %v249_v51 }
  0x1e   : > { %710 = vst [vmem:[#allocation2 + $0x14] sm:$0xf] %v709_v58  ;;  %355 = vst [vmem:[#allocation2 + $0x10] sm:$0xf] %v354_v60  ;;  %v421_v3 = vrot.slane %v329_v56, 5  ;;  %v314_v6 = vrot.slane %v312_v19, 7  ;;  %v1366_v13 = vor.u32 %v308_v16, %v307_v61  ;;  %v1395_v28 = vpack.c.bf16 %v250_v63, %v250_v63 }
  0x1f   : > { %v321_v14 = vrot.slane %v319_v32, 7  ;;  %v328_v17 = vrot.slane %v326_v55, 7  ;;  %381 = vrot.lane.b32.xlu0 %v1294_v12, %s1215_s24  ;;  %430 = vrot.lane.b32.xlu1 %v1334_v47, %s1216_s25  ;;  %v712_v15 = vsel %vm1320_vm6, %v1362_v1, %v711_v54  ;;  %v365_v16 = vld [vmem:[#allocation2 + $0x30] sm:$0xf]  ;;  %v333_v25 = vshrl.u32 %v1368_v18, 16  ;;  %v1188_v58 = vld [vmem:[%s1718_s1 + $0x18] sm:$0xff]  }
  0x20   : > { %v422_v19 = vor.u32 %v421_v3, %v420_v2  ;;  %v1379_v21 = vor.u32 %v315_v20, %v314_v6  ;;  %713 = vst [vmem:[#allocation2 + $0x1c] sm:$0xf] %v712_v15  ;;  %v357_v22 = vsel %vm1330_vm7, %v1366_v13, %v356_v57  ;;  %v336_v27 = vshll.u32 %v1368_v18, 16  ;;  %v717_v51 = vld [vmem:[#allocation2 + $0x2c] sm:$0xf]  ;;  %v1187_v57 = vld [vmem:[%s1718_s1 + $0x10] sm:$0xff]  }
  0x21   : > { %v1384_v23 = vor.u32 %v322_v33, %v321_v14  ;;  %v1386_v24 = vor.u32 %v329_v56, %v328_v17  ;;  %358 = vst [vmem:[#allocation2 + $0x18] sm:$0xf] %v357_v22  ;;  %v335_v31 = vrot.slane %v333_v25, 7  ;;  %v424_v32 = vrot.slane %v333_v25, 4  ;;  %v720_v54 = vld [vmem:[#allocation2 + $0x34] sm:$0xf] }
  0x22   : > { %v1389_v26 = vrot.slane %v422_v19, 4  ;;  %v360_v20 = vsel %vm1330_vm7, %v1379_v21, %v359_v62  ;;  %v425_v36 = vrot.slane %v336_v27, 5  ;;  %v478_v37 = vshrl.u32 %v1395_v28, 16  ;;  %v1189_v59 = vld [vmem:[%s1718_s1 + $0x20] sm:$0xff]   ;;  %v1191_v60 = vld [vmem:[%s1718_s1 + $0x30] sm:$0xff]   ;;  %v1192_v63 = vld [vmem:[%s1718_s1 + $0x38] sm:$0xff]  }
  0x23   : > { %361 = vst [vmem:[#allocation2 + $0x20] sm:$0xf] %v360_v20  ;;  %v363_v29 = vsel %vm1330_vm7, %v1384_v23, %v362_v7  ;;  %v366_v30 = vsel %vm1330_vm7, %v1386_v24, %v365_v16  ;;  %432 = vrot.lane.b32.xlu0 %v1326_v42, %s1216_s25  ;;  %434 = vrot.lane.b32.xlu1 %v1336_v48, %s1216_s25  ;;  %v481_v38 = vshll.u32 %v1395_v28, 16  ;;  %v702_v61 = vld [vmem:[#allocation2 + $0x4] sm:$0xf]  ;;  %vm846_vm3 = vcmask 130048  }
  0x24   : > { %v715_v33 = vsel %vm1320_vm6, %v1389_v26, %v714_v8  ;;  %364 = vst [vmem:[#allocation2 + $0x28] sm:$0xf] %v363_v29  ;;  %367 = vst [vmem:[#allocation2 + $0x30] sm:$0xf] %v366_v30  ;;  %v1412_v39 = vor.u32 %v336_v27, %v335_v31  ;;  %v426_v40 = vor.u32 %v425_v36, %v424_v32  ;;  %v567_v43 = vrot.slane %v478_v37, 4 }
  0x25   : > { %716 = vst [vmem:[#allocation2 + $0x24] sm:$0xf] %v715_v33  ;;  %v568_v44 = vrot.slane %v481_v38, 5  ;;  %v703_v62 = vsel %vm1320_vm6, %v1334_v47, %v702_v61  ;;  %vm986_vm5 = vcmask 519168  }
  0x26   : > { %v369_v46 = vsel %vm1330_vm7, %v1412_v39, %v368_v34  ;;  %v1425_v52 = vrot.slane %v426_v40, 4  ;;  %704 = vst [vmem:[#allocation2 + $0x4] sm:$0xf] %v703_v62 }
  0x27   : > { %436 = vrot.lane.b32.xlu0 %v1362_v1, %s1216_s25  ;;  %484 = vrot.lane.b32.xlu1 %v1338_v49, %s1217_s26  ;;  %370 = vst [vmem:[#allocation2 + $0x38] sm:$0xf] %v369_v46  ;;  %v569_v53 = vor.u32 %v568_v44, %v567_v43  ;;  %v1186_v49 = vld [vmem:[%s1718_s1 + $0x8] sm:$0xff]  }
  0x28   : > { %v718_v55 = vsel %vm1320_vm6, %v1425_v52, %v717_v51 }
  0x29   : > { %v1430_v56 = vrot.slane %v569_v53, 4  ;;  %719 = vst [vmem:[#allocation2 + $0x2c] sm:$0xf] %v718_v55 }
  0x2b   : > { %486 = vrot.lane.b32.xlu0 %v1340_v50, %s1217_s26  ;;  %534 = vrot.lane.b32.xlu1 %v1283_v5, %s1218_s27  ;;  %v721_v45 = vsel %vm1320_vm6, %v1430_v56, %v720_v54  ;;  %v1185_v5 = vld [vmem:[%s1718_s1] sm:$0xff]   ;;  %vm946_vm6 = vcmask 516096  }
  0x2c   : > { %722 = vst [vmem:[#allocation2 + $0x34] sm:$0xf] %v721_v45  ;;  %860 = vmatpush1.bf16.msra.mxu0 %v1185_v5  ;;  %1160 = vmatpush1.bf16.msra.mxu1 %v1185_v5  ;;  %v1658_v45 = vld [vmem:[%s1719_s2] ss:$0 sm:$0xff] }
  0x2d   : > { %861 = vmatprep.subr.bf16.mxu0 %v1214_v0  ;;  %1152 = vmatprep.subr.bf16.mxu1 %v1214_v0 }
  0x2f   : > { %536 = vrot.lane.b32.xlu0 %v1290_v10, %s1218_s27  ;;  %438 = vrot.lane.b32.xlu1 %v1389_v26, %s1216_s25 }
  0x30   : > { %862 = vmatpush1.bf16.msra.mxu0 %v1186_v49  ;;  %1161 = vmatpush1.bf16.msra.mxu1 %v1186_v49 }
  0x31   : > { %863 = vmatprep.subr.bf16.mxu0 %v1214_v0  ;;  %1153 = vmatprep.subr.bf16.mxu1 %v1214_v0 }
  0x33   : > { %488 = vrot.lane.b32.xlu0 %v1366_v13, %s1217_s26  ;;  %490 = vrot.lane.b32.xlu1 %v1379_v21, %s1217_s26 }
  0x34   : > { %864 = vmatpush1.bf16.msra.mxu0 %v1187_v57  ;;  %1162 = vmatpush1.bf16.msra.mxu1 %v1187_v57 }
  0x35   : > { %865 = vmatprep.subr.bf16.mxu0 %v1214_v0  ;;  %1154 = vmatprep.subr.bf16.mxu1 %v1214_v0 }
  0x37   : > { %492 = vrot.lane.b32.xlu0 %v1384_v23, %s1217_s26  ;;  %494 = vrot.lane.b32.xlu1 %v1386_v24, %s1217_s26 }
  0x38   : > { %866 = vmatpush1.bf16.msra.mxu0 %v1188_v58  ;;  %1163 = vmatpush1.bf16.msra.mxu1 %v1188_v58 }
  0x39   : > { %867 = vmatprep.subr.bf16.mxu0 %v1214_v0  ;;  %1155 = vmatprep.subr.bf16.mxu1 %v1214_v0 }
  0x3b   : > { %383 = vrot.lane.b32.xlu0 %v1368_v18, %s1215_s24  ;;  %538 = vrot.lane.b32.xlu1 %v1281_v4, %s1218_s27  ;;  %s1220_s24 = smov 96  }
  0x3c   : > { %868 = vmatpush1.bf16.msra.mxu0 %v1189_v59  ;;  %1164 = vmatpush1.bf16.msra.mxu1 %v1189_v59 }
  0x3d   : > { %869 = vmatprep.subr.bf16.mxu0 %v1214_v0  ;;  %1156 = vmatprep.subr.bf16.mxu1 %v1214_v0 }
  0x3f   : > { %540 = vrot.lane.b32.xlu0 %v1288_v9, %s1218_s27  ;;  %542 = vrot.lane.b32.xlu1 %v1292_v11, %s1218_s27 }
  0x43   : > { %544 = vrot.lane.b32.xlu0 %v1294_v12, %s1218_s27  ;;  %571 = vrot.lane.b32.xlu1 %v1324_v41, %s1219_s11  ;;  %v1190_v41 = vld [vmem:[%s1718_s1 + $0x28] sm:$0xff]  }
  0x44   : > { %870 = vmatpush1.bf16.msra.mxu0 %v1190_v41  ;;  %1165 = vmatpush1.bf16.msra.mxu1 %v1190_v41 }
  0x45   : > { %871 = vmatprep.subr.bf16.mxu0 %v1214_v0  ;;  %1157 = vmatprep.subr.bf16.mxu1 %v1214_v0 }
  0x47   : > { %573 = vrot.lane.b32.xlu0 %v1334_v47, %s1219_s11  ;;  %496 = vrot.lane.b32.xlu1 %v1412_v39, %s1217_s26 }
  0x48   : > { %872 = vmatpush1.bf16.msra.mxu0 %v1191_v60  ;;  %1166 = vmatpush1.bf16.msra.mxu1 %v1191_v60 }
  0x49   : > { %873 = vmatprep.subr.bf16.mxu0 %v1214_v0  ;;  %1158 = vmatprep.subr.bf16.mxu1 %v1214_v0 }
  0x4b   : > { %440 = vrot.lane.b32.xlu0 %v1425_v52, %s1216_s25  ;;  %546 = vrot.lane.b32.xlu1 %v1368_v18, %s1218_s27  ;;  %s1221_s25 = smov 112  }
  0x4c   : > { %874 = vmatpush1.bf16.msra.mxu0 %v1192_v63  ;;  %1167 = vmatpush1.bf16.msra.mxu1 %v1192_v63 }
  0x4d   : > { %875 = vmatprep.subr.bf16.mxu0 %v1214_v0  ;;  %1159 = vmatprep.subr.bf16.mxu1 %v1214_v0  ;;  %v480_v0 = vrot.slane %v478_v37, 7 }
  0x4f   : > { %575 = vrot.lane.b32.xlu0 %v1326_v42, %s1219_s11  ;;  %577 = vrot.lane.b32.xlu1 %v1336_v48, %s1219_s11  ;;  %v483_v42 = vor.u32 %v481_v38, %v480_v0 }
  0x50   : > { %876 = vmatpush1.bf16.msra.mxu0 %v1193_v35  ;;  %1168 = vmatpush1.bf16.msra.mxu1 %v1193_v35 }
  0x53   : > { %579 = vrot.lane.b32.xlu0 %v1362_v1, %s1219_s11  ;;  %581 = vrot.lane.b32.xlu1 %v1389_v26, %s1219_s11 }
  0x57   : > { %621 = vrot.lane.b32.xlu0 %v1340_v50, %s1220_s24  ;;  %623 = vrot.lane.b32.xlu1 %v1366_v13, %s1220_s24 }
  0x5b   : > { %665 = vrot.lane.b32.xlu0 %v1290_v10, %s1221_s25  ;;  %667 = vrot.lane.b32.xlu1 %v1281_v4, %s1221_s25 }
  0x5f   : > { %498 = vrot.lane.b32.xlu0 %v483_v42, %s1217_s26  ;;  %583 = vrot.lane.b32.xlu1 %v1425_v52, %s1219_s11 }
  0x63   : > { %625 = vrot.lane.b32.xlu0 %v1379_v21, %s1220_s24  ;;  %627 = vrot.lane.b32.xlu1 %v1384_v23, %s1220_s24  ;;  %v510_v21 = vld [vmem:[#allocation2] sm:$0xf] }
  0x67   : > { %629 = vrot.lane.b32.xlu0 %v1386_v24, %s1220_s24  ;;  %631 = vrot.lane.b32.xlu1 %v1412_v39, %s1220_s24 }
  0x6b   : > { %548 = vrot.lane.b32.xlu0 %v1395_v28, %s1218_s27  ;;  %669 = vrot.lane.b32.xlu1 %v1288_v9, %s1221_s25 }
  0x6f   : > { %671 = vrot.lane.b32.xlu0 %v1292_v11, %s1221_s25  ;;  %673 = vrot.lane.b32.xlu1 %v1294_v12, %s1221_s25 }
  0x73   : > { %675 = vrot.lane.b32.xlu0 %v1368_v18, %s1221_s25  ;;  %633 = vrot.lane.b32.xlu1 %v483_v42, %s1220_s24 }
  0x77   : > { %585 = vrot.lane.b32.xlu0 %v1430_v56, %s1219_s11  ;;  %677 = vrot.lane.b32.xlu1 %v1395_v28, %s1221_s25 }
  0x85   : > { %v376_v4 = vpop.permute.xlu1 %375  ;;  %v372_v10 = vpop.permute.xlu0 %371 }
  0x86   : > { %395 = vst.msk [vmem:[#allocation2 + $0x18] sm:$0xf] %vm392_vm8, %v376_v4  ;;  %393 = vst.msk [vmem:[#allocation2 + $0x8] sm:$0xf] %vm392_vm8, %v372_v10 }
  0x89   : > { %v378_v9 = vpop.permute.xlu1 %377  ;;  %v374_v11 = vpop.permute.xlu0 %373 }
  0x8a   : > { %396 = vst.msk [vmem:[#allocation2 + $0x20] sm:$0xf] %vm392_vm8, %v378_v9  ;;  %394 = vst.msk [vmem:[#allocation2 + $0x10] sm:$0xf] %vm392_vm8, %v374_v11 }
  0x8d   : > { %v380_v47 = vpop.permute.xlu0 %379  ;;  %v429_v48 = vpop.permute.xlu1 %428  ;;  %v452_v50 = vld [vmem:[#allocation2 + $0x8] sm:$0xf]  ;;  %v458_v13 = vld [vmem:[#allocation2 + $0x18] sm:$0xf] }
  0x8e   : > { %397 = vst.msk [vmem:[#allocation2 + $0x28] sm:$0xf] %vm392_vm8, %v380_v47  ;;  %v453_v1 = vsel %vm1554_vm10, %v429_v48, %v452_v50 }
  0x8f   : > { %454 = vst [vmem:[#allocation2 + $0x8] sm:$0xf] %v453_v1 }
  0x91   : > { %v382_v2 = vpop.permute.xlu0 %381  ;;  %v455_v3 = vld [vmem:[#allocation2 + $0x10] sm:$0xf]  ;;  %v431_v6 = vpop.permute.xlu1 %430  ;;  %v461_v8 = vld [vmem:[#allocation2 + $0x20] sm:$0xf] }
  0x92   : > { %398 = vst.msk [vmem:[#allocation2 + $0x30] sm:$0xf] %vm392_vm8, %v382_v2  ;;  %v456_v7 = vsel %vm1554_vm10, %v431_v6, %v455_v3 }
  0x93   : > { %457 = vst [vmem:[#allocation2 + $0x10] sm:$0xf] %v456_v7 }
  0x95   : > { %v433_v14 = vpop.permute.xlu0 %432  ;;  %v435_v17 = vpop.permute.xlu1 %434  ;;  %v464_v16 = vld [vmem:[#allocation2 + $0x28] sm:$0xf] }
  0x96   : > { %v459_v18 = vsel %vm1554_vm10, %v433_v14, %v458_v13  ;;  %v462_v15 = vsel %vm1554_vm10, %v435_v17, %v461_v8  ;;  %v513_v20 = vld [vmem:[#allocation2 + $0x8] sm:$0xf] }
  0x97   : > { %460 = vst [vmem:[#allocation2 + $0x18] sm:$0xf] %v459_v18  ;;  %463 = vst [vmem:[#allocation2 + $0x20] sm:$0xf] %v462_v15 }
  0x99   : > { %v437_v22 = vpop.permute.xlu0 %436  ;;  %v485_v23 = vpop.permute.xlu1 %484  ;;  %v467_v30 = vld [vmem:[#allocation2 + $0x30] sm:$0xf] }
  0x9a   : > { %v465_v24 = vsel %vm1554_vm10, %v437_v22, %v464_v16  ;;  %v511_v25 = vsel %vm1569_vm12, %v485_v23, %v510_v21  ;;  %v516_v34 = vld [vmem:[#allocation2 + $0x10] sm:$0xf] }
  0x9b   : > { %466 = vst [vmem:[#allocation2 + $0x28] sm:$0xf] %v465_v24  ;;  %512 = vst [vmem:[#allocation2] sm:$0xf] %v511_v25 }
  0x9d   : > { %v487_v26 = vpop.permute.xlu0 %486  ;;  %v535_v27 = vpop.permute.xlu1 %534 }
  0x9e   : > { %v514_v28 = vsel %vm1569_vm12, %v487_v26, %v513_v20  ;;  %559 = vst.msk [vmem:[#allocation2] sm:$0xf] %vm558_vm13, %v535_v27  ;;  %v519_v36 = vld [vmem:[#allocation2 + $0x18] sm:$0xf]  ;;  %v522_v43 = vld [vmem:[#allocation2 + $0x20] sm:$0xf] }
  0x9f   : > { %515 = vst [vmem:[#allocation2 + $0x8] sm:$0xf] %v514_v28 }
  0xa1   : > { %v537_v29 = vpop.permute.xlu0 %536  ;;  %v439_v31 = vpop.permute.xlu1 %438 }
  0xa2   : > { %560 = vst.msk [vmem:[#allocation2 + $0x8] sm:$0xf] %vm558_vm13, %v537_v29  ;;  %v468_v32 = vsel %vm1554_vm10, %v439_v31, %v467_v30  ;;  %v525_v44 = vld [vmem:[#allocation2 + $0x28] sm:$0xf] }
  0xa3   : > { %469 = vst [vmem:[#allocation2 + $0x30] sm:$0xf] %v468_v32 }
  0xa5   : > { %v489_v33 = vpop.permute.xlu0 %488  ;;  %v491_v37 = vpop.permute.xlu1 %490  ;;  %v597_v49 = vld [vmem:[#allocation2] sm:$0xf] }
  0xa6   : > { %v517_v38 = vsel %vm1569_vm12, %v489_v33, %v516_v34  ;;  %v520_v39 = vsel %vm1569_vm12, %v491_v37, %v519_v36  ;;  %v1196_v36 = vld [vmem:[#allocation2 + $0x4] ss:$8 sps:$4 sm:$0xff]  }
  0xa7   : > { %518 = vst [vmem:[#allocation2 + $0x10] sm:$0xf] %v517_v38  ;;  %521 = vst [vmem:[#allocation2 + $0x18] sm:$0xf] %v520_v39  ;;  %1135 = vmatprep.mubr.msk.bf16.mxu0 %vm846_vm3, %v1196_v36 }
  0xa9   : > { %v493_v40 = vpop.permute.xlu0 %492  ;;  %v495_v46 = vpop.permute.xlu1 %494  ;;  %v600_v41 = vld [vmem:[#allocation2 + $0x8] sm:$0xf] }
  0xaa   : > { %v523_v51 = vsel %vm1569_vm12, %v493_v40, %v522_v43  ;;  %v526_v52 = vsel %vm1569_vm12, %v495_v46, %v525_v44  ;;  %v528_v60 = vld [vmem:[#allocation2 + $0x30] sm:$0xf] }
  0xab   : > { %524 = vst [vmem:[#allocation2 + $0x20] sm:$0xf] %v523_v51  ;;  %527 = vst [vmem:[#allocation2 + $0x28] sm:$0xf] %v526_v52 }
  0xad   : > { %v384_v53 = vpop.permute.xlu0 %383  ;;  %v539_v54 = vpop.permute.xlu1 %538 }
  0xae   : > { %399 = vst.msk [vmem:[#allocation2 + $0x38] sm:$0xf] %vm392_vm8, %v384_v53 }
  0xaf   : > { %561 = vst.msk [vmem:[#allocation2 + $0x10] sm:$0xf] %vm558_vm13, %v539_v54 }
  0xb1   : > { %v541_v55 = vpop.permute.xlu0 %540  ;;  %v543_v56 = vpop.permute.xlu1 %542 }
  0xb2   : > { %562 = vst.msk [vmem:[#allocation2 + $0x18] sm:$0xf] %vm558_vm13, %v541_v55  ;;  %563 = vst.msk [vmem:[#allocation2 + $0x20] sm:$0xf] %vm558_vm13, %v543_v56 }
  0xb5   : > { %v545_v5 = vpop.permute.xlu0 %544  ;;  %v572_v57 = vpop.permute.xlu1 %571  ;;  %v470_v35 = vld [vmem:[#allocation2 + $0x38] sm:$0xf] }
  0xb6   : > { %564 = vst.msk [vmem:[#allocation2 + $0x28] sm:$0xf] %vm558_vm13, %v545_v5  ;;  %v598_v58 = vsel %vm1596_vm15, %v572_v57, %v597_v49  ;;  %v603_v9 = vld [vmem:[#allocation2 + $0x10] sm:$0xf] }
  0xb7   : > { %599 = vst [vmem:[#allocation2] sm:$0xf] %v598_v58  ;;  %v1197_v58 = vld [vmem:[#allocation2 + $0x14] ss:$8 sps:$4 sm:$0xff]  }
  0xb9   : > { %v574_v59 = vpop.permute.xlu0 %573  ;;  %v497_v61 = vpop.permute.xlu1 %496  ;;  %v606_v11 = vld [vmem:[#allocation2 + $0x18] sm:$0xf]  ;;  %v609_v2 = vld [vmem:[#allocation2 + $0x20] sm:$0xf] }
  0xba   : > { %v601_v62 = vsel %vm1596_vm15, %v574_v59, %v600_v41  ;;  %v529_v63 = vsel %vm1569_vm12, %v497_v61, %v528_v60  ;;  %v1202_v61 = vld [vmem:[#allocation2 + $0x24] ss:$8 sps:$4 sm:$0xff]  }
  0xbb   : > { %602 = vst [vmem:[#allocation2 + $0x8] sm:$0xf] %v601_v62  ;;  %530 = vst [vmem:[#allocation2 + $0x30] sm:$0xf] %v529_v63  ;;  %1137 = vmatprep.mubr.msk.bf16.mxu1 %vm846_vm3, %v1202_v61  ;;  %v1203_v62 = vld [vmem:[#allocation2 + $0x34] ss:$8 sps:$4 sm:$0xff]  }
  0xbd   : > { %v441_v0 = vpop.permute.xlu0 %440  ;;  %v547_v42 = vpop.permute.xlu1 %546  ;;  %v612_v12 = vld [vmem:[#allocation2 + $0x28] sm:$0xf] }
  0xbe   : > { %v471_v4 = vsel %vm1554_vm10, %v441_v0, %v470_v35  ;;  %565 = vst.msk [vmem:[#allocation2 + $0x30] sm:$0xf] %vm558_vm13, %v547_v42  ;;  %v644_v14 = vld [vmem:[#allocation2] sm:$0xf] }
  0xbf   : > { %472 = vst [vmem:[#allocation2 + $0x38] sm:$0xf] %v471_v4 }
  0xc1   : > { %v576_v10 = vpop.permute.xlu0 %575  ;;  %v578_v47 = vpop.permute.xlu1 %577 }
  0xc2   : > { %v604_v48 = vsel %vm1596_vm15, %v576_v10, %v603_v9  ;;  %v607_v50 = vsel %vm1596_vm15, %v578_v47, %v606_v11  ;;  %v647_v18 = vld [vmem:[#allocation2 + $0x8] sm:$0xf] }
  0xc3   : > { %605 = vst [vmem:[#allocation2 + $0x10] sm:$0xf] %v604_v48  ;;  %608 = vst [vmem:[#allocation2 + $0x18] sm:$0xf] %v607_v50 }
  0xc5   : > { %v580_v1 = vpop.permute.xlu0 %579  ;;  %v582_v3 = vpop.permute.xlu1 %581  ;;  %v615_v25 = vld [vmem:[#allocation2 + $0x30] sm:$0xf] }
  0xc6   : > { %v610_v6 = vsel %vm1596_vm15, %v580_v1, %v609_v2  ;;  %v613_v7 = vsel %vm1596_vm15, %v582_v3, %v612_v12  ;;  %v531_v23 = vld [vmem:[#allocation2 + $0x38] sm:$0xf] }
  0xc7   : > { %611 = vst [vmem:[#allocation2 + $0x20] sm:$0xf] %v610_v6  ;;  %614 = vst [vmem:[#allocation2 + $0x28] sm:$0xf] %v613_v7 }
  0xc9   : > { %v622_v13 = vpop.permute.xlu0 %621  ;;  %v624_v17 = vpop.permute.xlu1 %623 }
  0xca   : > { %v645_v15 = vsel %vm1619_vm1, %v622_v13, %v644_v14  ;;  %v648_v21 = vsel %vm1619_vm1, %v624_v17, %v647_v18  ;;  %v650_v28 = vld [vmem:[#allocation2 + $0x10] sm:$0xf]  ;;  %v653_v29 = vld [vmem:[#allocation2 + $0x18] sm:$0xf] }
  0xcb   : > { %646 = vst [vmem:[#allocation2] sm:$0xf] %v645_v15  ;;  %649 = vst [vmem:[#allocation2 + $0x8] sm:$0xf] %v648_v21 }
  0xcd   : > { %v666_v16 = vpop.permute.xlu0 %665  ;;  %v668_v22 = vpop.permute.xlu1 %667 }
  0xce   : > { %687 = vst.msk [vmem:[#allocation2] sm:$0xf] %vm686_vm2, %v666_v16  ;;  %688 = vst.msk [vmem:[#allocation2 + $0x8] sm:$0xf] %vm686_vm2, %v668_v22  ;;  %v656_v37 = vld [vmem:[#allocation2 + $0x20] sm:$0xf] }
  0xcf   : > { %v659_v38 = vld [vmem:[#allocation2 + $0x28] sm:$0xf] }
  0xd1   : > { %v499_v24 = vpop.permute.xlu0 %498  ;;  %v584_v26 = vpop.permute.xlu1 %583 }
  0xd2   : > { %v532_v20 = vsel %vm1569_vm12, %v499_v24, %v531_v23  ;;  %v616_v27 = vsel %vm1596_vm15, %v584_v26, %v615_v25 }
  0xd3   : > { %533 = vst [vmem:[#allocation2 + $0x38] sm:$0xf] %v532_v20  ;;  %617 = vst [vmem:[#allocation2 + $0x30] sm:$0xf] %v616_v27 }
  0xd5   : > { %v626_v30 = vpop.permute.xlu0 %625  ;;  %v628_v31 = vpop.permute.xlu1 %627  ;;  %v1194_v32 = vld [vmem:[#allocation2] ss:$8 sps:$4 sm:$0xff]  }
  0xd6   : > { %v651_v33 = vsel %vm1619_vm1, %v626_v30, %v650_v28  ;;  %v654_v34 = vsel %vm1619_vm1, %v628_v31, %v653_v29  ;;  %892 = vmatmul.mubr.bf16.vlgmr.msra.gmra.mrb[0].mxu0 %v1194_v32 }
  0xd7   : > { %652 = vst [vmem:[#allocation2 + $0x10] sm:$0xf] %v651_v33  ;;  %655 = vst [vmem:[#allocation2 + $0x18] sm:$0xf] %v654_v34  ;;  %1136 = vmatprep.mubr.msk.bf16.mxu0 %vm846_vm3, %v1197_v58 }
  0xd9   : > { %v630_v19 = vpop.permute.xlu0 %629  ;;  %v632_v39 = vpop.permute.xlu1 %631 }
  0xda   : > { %v657_v40 = vsel %vm1619_vm1, %v630_v19, %v656_v37  ;;  %v660_v43 = vsel %vm1619_vm1, %v632_v39, %v659_v38  ;;  %v662_v54 = vld [vmem:[#allocation2 + $0x30] sm:$0xf] }
  0xdb   : > { %658 = vst [vmem:[#allocation2 + $0x20] sm:$0xf] %v657_v40  ;;  %661 = vst [vmem:[#allocation2 + $0x28] sm:$0xf] %v660_v43 }
  0xdd   : > { %v549_v44 = vpop.permute.xlu0 %548  ;;  %v670_v46 = vpop.permute.xlu1 %669 }
  0xde   : > { %566 = vst.msk [vmem:[#allocation2 + $0x38] sm:$0xf] %vm558_vm13, %v549_v44 }
  0xdf   : > { %689 = vst.msk [vmem:[#allocation2 + $0x10] sm:$0xf] %vm686_vm2, %v670_v46 }
  0xe1   : > { %v672_v51 = vpop.permute.xlu0 %671  ;;  %v674_v52 = vpop.permute.xlu1 %673 }
  0xe2   : > { %690 = vst.msk [vmem:[#allocation2 + $0x18] sm:$0xf] %vm686_vm2, %v672_v51  ;;  %691 = vst.msk [vmem:[#allocation2 + $0x20] sm:$0xf] %vm686_vm2, %v674_v52 }
  0xe5   : > { %v676_v53 = vpop.permute.xlu0 %675  ;;  %v634_v55 = vpop.permute.xlu1 %633  ;;  %v618_v5 = vld [vmem:[#allocation2 + $0x38] sm:$0xf] }
  0xe6   : > { %692 = vst.msk [vmem:[#allocation2 + $0x28] sm:$0xf] %vm686_vm2, %v676_v53  ;;  %v663_v56 = vsel %vm1619_vm1, %v634_v55, %v662_v54 }
  0xe7   : > { %664 = vst [vmem:[#allocation2 + $0x30] sm:$0xf] %v663_v56 }
  0xe9   : > { %v586_v49 = vpop.permute.xlu0 %585  ;;  %v678_v57 = vpop.permute.xlu1 %677  ;;  %v1199_v59 = vld [vmem:[#allocation2 + $0x10] ss:$8 sps:$4 sm:$0xff]  }
  0xea   : > { %v619_v41 = vsel %vm1596_vm15, %v586_v49, %v618_v5  ;;  %693 = vst.msk [vmem:[#allocation2 + $0x30] sm:$0xf] %vm686_vm2, %v678_v57  ;;  %900 = vmatmul.mubr.bf16.gmra.mrb[4].mxu0 %v1199_v59 }
  0xeb   : > { %620 = vst [vmem:[#allocation2 + $0x38] sm:$0xf] %v619_v41 }
  0xed   : > { %v1200_v60 = vld [vmem:[#allocation2 + $0x20] ss:$8 sps:$4 sm:$0xff]  }
  0xee   : > { %908 = vmatmul.mubr.bf16.vlgmr.msra.gmra.mrb[0].mxu1 %v1200_v60 }
  0xef   : > { %1138 = vmatprep.mubr.msk.bf16.mxu1 %vm846_vm3, %v1203_v62 }
  0xf2   : > { %v1205_v63 = vld [vmem:[#allocation2 + $0x30] ss:$8 sps:$4 sm:$0xff]  }
  0xf6   : > { %916 = vmatmul.mubr.bf16.gmra.mrb[4].mxu1 %v1205_v63 }
 0x1a9   : > { %v893_v35 = vpop.f32.mrb[0].mxu0 }
 0x1aa   : > { %v894_v0 = vadd.f32 %v1658_v45, %v893_v35  ;;  %v895_v42 = vpop.f32.mrb[1].mxu0 }
 0x1ab   : > { %v896_v4 = vpop.f32.mrb[2].mxu0 }
 0x1ac   : > { %v948_v10 = vmul.f32 %v894_v0, %v894_v0  ;;  %v978_v9 = vpack.c.bf16 %v894_v0, %v894_v0  ;;  %v897_v11 = vadd.f32 %v1658_v45, %v896_v4  ;;  %v898_v47 = vpop.f32.mrb[3].mxu0  ;;  %v925_v48 = vsel %vm924_vm4, %v894_v0, 0.0 }
 0x1ae   : > { %987 = vst.msk [vmem:[%s1665_s6] sm:$0xf] %vm986_vm5, %v978_v9  ;;  %v926_v50 = vsel %vm924_vm4, %v897_v11, 0.0  ;;  %v949_v1 = vmul.f32 %v897_v11, %v897_v11  ;;  %v979_v2 = vpack.c.bf16 %v897_v11, %v897_v11  ;;  %v956_v3 = vsel %vm924_vm4, %v948_v10, 0.0 }
 0x1af   : > { %v927_v12 = vadd.f32 %v926_v50, %v925_v48 }
 0x1b0   : > { %v957_v6 = vsel %vm924_vm4, %v949_v1, 0.0  ;;  %988 = vst.msk [vmem:[%s1665_s6 + $0x4] sm:$0xf] %vm986_vm5, %v979_v2 }
 0x1b1   : > { %v958_v7 = vadd.f32 %v957_v6, %v956_v3 }
 0x1bd   : > { %v901_v8 = vpop.f32.mrb[4].mxu0 }
 0x1be   : > { %v902_v13 = vadd.f32 %v1658_v45, %v901_v8  ;;  %v903_v14 = vpop.f32.mrb[5].mxu0 }
 0x1bf   : > { %v904_v17 = vpop.f32.mrb[6].mxu0 }
 0x1c0   : > { %v928_v18 = vsel %vm924_vm4, %v902_v13, 0.0  ;;  %v950_v15 = vmul.f32 %v902_v13, %v902_v13  ;;  %v980_v21 = vpack.c.bf16 %v902_v13, %v902_v13  ;;  %v905_v16 = vadd.f32 %v1658_v45, %v904_v17  ;;  %v906_v22 = vpop.f32.mrb[7].mxu0 }
 0x1c1   : > { %v929_v23 = vadd.f32 %v928_v18, %v927_v12  ;;  %v909_v24 = vpop.f32.mrb[0].mxu1 }
 0x1c2   : > { %v959_v25 = vsel %vm924_vm4, %v950_v15, 0.0  ;;  %989 = vst.msk [vmem:[%s1665_s6 + $0x8] sm:$0xf] %vm986_vm5, %v980_v21  ;;  %v930_v26 = vsel %vm924_vm4, %v905_v16, 0.0  ;;  %v951_v20 = vmul.f32 %v905_v16, %v905_v16  ;;  %v981_v27 = vpack.c.bf16 %v905_v16, %v905_v16  ;;  %v911_v28 = vpop.f32.mrb[1].mxu1 }
 0x1c3   : > { %v960_v29 = vadd.f32 %v959_v25, %v958_v7  ;;  %v931_v30 = vadd.f32 %v930_v26, %v929_v23  ;;  %v910_v31 = vadd.f32 %v1658_v45, %v909_v24  ;;  %v912_v32 = vpop.f32.mrb[2].mxu1 }
 0x1c4   : > { %v961_v33 = vsel %vm924_vm4, %v951_v20, 0.0  ;;  %990 = vst.msk [vmem:[%s1665_s6 + $0xc] sm:$0xf] %vm986_vm5, %v981_v27  ;;  %v913_v34 = vadd.f32 %v1658_v45, %v912_v32  ;;  %v914_v36 = vpop.f32.mrb[3].mxu1 }
 0x1c5   : > { %v962_v19 = vadd.f32 %v961_v33, %v960_v29  ;;  %v932_v37 = vsel %vm924_vm4, %v910_v31, 0.0  ;;  %v952_v38 = vmul.f32 %v910_v31, %v910_v31  ;;  %v982_v39 = vpack.c.bf16 %v910_v31, %v910_v31 }
 0x1c6   : > { %v933_v40 = vadd.f32 %v932_v37, %v931_v30  ;;  %v934_v43 = vsel %vm924_vm4, %v913_v34, 0.0  ;;  %v953_v44 = vmul.f32 %v913_v34, %v913_v34  ;;  %v983_v46 = vpack.c.bf16 %v913_v34, %v913_v34 }
 0x1c7   : > { %v963_v51 = vsel %vm924_vm4, %v952_v38, 0.0  ;;  %991 = vst.msk [vmem:[%s1665_s6 + $0x10] sm:$0xf] %vm986_vm5, %v982_v39 }
 0x1c8   : > { %v964_v52 = vadd.f32 %v963_v51, %v962_v19  ;;  %v935_v53 = vadd.f32 %v934_v43, %v933_v40  ;;  %v965_v54 = vsel %vm924_vm4, %v953_v44, 0.0  ;;  %992 = vst.msk [vmem:[%s1665_s6 + $0x14] sm:$0xf] %vm986_vm5, %v983_v46 }
 0x1c9   : > { %v917_v55 = vpop.f32.mrb[4].mxu1 }
 0x1ca   : > { %v966_v56 = vadd.f32 %v965_v54, %v964_v52  ;;  %v918_v5 = vadd.f32 %v1658_v45, %v917_v55  ;;  %v919_v49 = vpop.f32.mrb[5].mxu1 }
 0x1cb   : > { %v920_v57 = vpop.f32.mrb[6].mxu1 }
 0x1cc   : > { %v936_v58 = vsel %vm924_vm4, %v918_v5, 0.0  ;;  %v954_v59 = vmul.f32 %v918_v5, %v918_v5  ;;  %v984_v41 = vpack.c.bf16 %v918_v5, %v918_v5  ;;  %v921_v60 = vadd.f32 %v1658_v45, %v920_v57  ;;  %v922_v61 = vpop.f32.mrb[7].mxu1 }
 0x1cd   : > { %v937_v62 = vadd.f32 %v936_v58, %v935_v53 }
 0x1ce   : > { %v967_v63 = vsel %vm924_vm4, %v954_v59, 0.0  ;;  %993 = vst.msk [vmem:[%s1665_s6 + $0x18] sm:$0xf] %vm986_vm5, %v984_v41  ;;  %v938_v35 = vsel %vm924_vm4, %v921_v60, 0.0  ;;  %v955_v0 = vmul.f32 %v921_v60, %v921_v60  ;;  %v985_v42 = vpack.c.bf16 %v921_v60, %v921_v60 }
 0x1cf   : > { %v968_v4 = vadd.f32 %v967_v63, %v966_v56  ;;  %v939_v10 = vadd.f32 %v938_v35, %v937_v62 }
 0x1d0   : > { %v969_v9 = vsel %vm924_vm4, %v955_v0, 0.0  ;;  %994 = vst.msk [vmem:[%s1665_s6 + $0x1c] sm:$0xf] %vm986_vm5, %v985_v42 }
 0x1d1   : > { %v940_v11 = vrot.slane %v939_v10, 4  ;;  %v970_v45 = vadd.f32 %v969_v9, %v968_v4 }
 0x1d3   : > { %v941_v47 = vadd.f32 %v940_v11, %v939_v10  ;;  %v971_v48 = vrot.slane %v970_v45, 4 }
 0x1d5   : > { %v942_v50 = vrot.slane %v941_v47, 2  ;;  %v972_v1 = vadd.f32 %v971_v48, %v970_v45 }
 0x1d7   : > { %v943_v2 = vadd.f32 %v942_v50, %v941_v47  ;;  %v973_v12 = vrot.slane %v972_v1, 2 }
 0x1d9   : > { %v944_v3 = vrot.slane %v943_v2, 1  ;;  %v974_v6 = vadd.f32 %v973_v12, %v972_v1 }
 0x1db   : > { %v945_v7 = vadd.f32 %v944_v3, %v943_v2  ;;  %v975_v8 = vrot.slane %v974_v6, 1 }
 0x1dd   : > { %947 = vst.msk [vmem:[%s238_s9] sm:$0x1] %vm946_vm6, %v945_v7  ;;  %v976_v13 = vadd.f32 %v975_v8, %v974_v6 }
 0x1df   : > { %977 = vst.msk [vmem:[%s241_s12] sm:$0x1] %vm946_vm6, %v976_v13 }
 0x1e0 PF: > { %s16_s18 = sadd.s32 1, %s1212_s18  }
 0x1e1   : > { %p13_p4 = scmp.ge.s32.totalorder %s16_s18, 4  }
 0x1e3   :  { %15 = sbr.rel (!%p13_p4) target bundleno = 1 (0x1), region = 87 }

</bundles_post_ra>
